<compile_context>
chip_gen: v6e
topology: v6e:2x2x1
jax: 0.10.0
libtpu: 0.0.40
codegen_flags: <defaults>
</compile_context>

<pallas_src>
import numpy as np

import jax
import jax.numpy as jnp
from jax import lax
from jax.experimental import pallas as pl
from jax.experimental.pallas import tpu as pltpu


# ----------------------------------------------------------------------------
# Fused Pallas kernel: conv1 + IN + LReLU -> in-VMEM im2col -> conv2 (bf16
# MXU, f32 acc) + IN + LReLU -> final 1-channel reduce.  Grid over batch.
# ----------------------------------------------------------------------------
def _instance_norm_lrelu(y):
    """InstanceNorm2d(affine=False, eps=1e-5, biased var) + LeakyReLU(0.2).

    y: (P, C) f32, normalization over the P spatial positions per channel.
    One-pass statistics (sum / sum-of-squares).
    """
    inv_n = 1.0 / y.shape[0]
    mean = jnp.sum(y, axis=0, keepdims=True) * inv_n
    ex2 = jnp.sum(y * y, axis=0, keepdims=True) * inv_n
    var = ex2 - mean * mean
    yn = (y - mean) * lax.rsqrt(var + 1e-5)
    # LeakyReLU(0.2): max(x, 0.2x) — single VPU max instead of cmp+select.
    return jnp.maximum(yn, 0.2 * yn)


def _disc_kernel(p1_ref, sel_ref, w1_ref, w2_ref, w3_ref, o_ref):
    # p1_ref : (1, 64, 48)   f32  layer-1 im2col patches for this sample
    # sel_ref: (256, 64)     bf16 static gather/zero-pad matrix (tap-major, 0/1)
    # w1_ref : (48, 256)     f32  layer-1 weight, feature order (c, i, j)
    # w2_ref : (4096, 512)   bf16 layer-2 weight, feature order (i, j, c)
    # w3_ref : (16, 512)     f32  layer-3 weight, (i*4 + j, c)
    # o_ref  : (1, 1, 1)     f32
    p1 = p1_ref[0]                                   # (64, 48)
    w1 = w1_ref[...]
    sel = sel_ref[...]
    w2 = w2_ref[...]
    w3 = w3_ref[...]

    # ---- Layer 1: conv(3->256, k4 s2 p1) as matmul, then IN + LeakyReLU ----
    y1 = jnp.dot(p1, w1, preferred_element_type=jnp.float32)        # (64, 256)
    a1 = _instance_norm_lrelu(y1).astype(jnp.bfloat16)              # (64, 256) bf16

    # ---- Layer-2 im2col entirely in VMEM ----
    # sel rows are (tap t = i*4+j, out-pos p2 = oh*4+ow); a zero row encodes
    # the conv zero-padding.  One bf16 MXU matmul performs the gather (exact,
    # since sel is 0/1), then the 16 taps are lane-concatenated into the
    # (16, 4096) patch matrix.
    taps = w2.shape[0] // a1.shape[1]                # 16
    p2n = sel.shape[0] // taps                       # 16
    y1g = jnp.dot(sel, a1, preferred_element_type=jnp.float32)      # (256, 256)
    y1g = y1g.astype(jnp.bfloat16)
    patches2 = jnp.concatenate(
        [y1g[t * p2n:(t + 1) * p2n, :] for t in range(taps)], axis=1)  # (16, 4096)

    # ---- Layer 2: conv(256->512, k4 s2 p1) as bf16 matmul w/ f32 acc ----
    y2 = jnp.dot(patches2, w2, preferred_element_type=jnp.float32)  # (16, 512)
    a2 = _instance_norm_lrelu(y2)                                   # (16, 512)

    # ---- Layer 3: conv(512->1, k4 s1 p0) == full reduce against w3 ----
    o_ref[0] = jnp.sum(a2 * w3, keepdims=True)                      # (1, 1)


# ----------------------------------------------------------------------------
# Glue: layer-1 im2col, static layer-2 gather matrix, weight re-layout,
# spectral norm, full forward.
# ----------------------------------------------------------------------------
def im2col(x, kh, kw, stride, pad):
    """x: (B, C, H, W) -> patches (B, Ho*Wo, C*kh*kw), feature order (c, i, j)."""
    B, C, H, W = x.shape
    xp = jnp.pad(x, ((0, 0), (0, 0), (pad, pad), (pad, pad)))
    Ho = (H + 2 * pad - kh) // stride + 1
    Wo = (W + 2 * pad - kw) // stride + 1
    taps = []
    for i in range(kh):
        for j in range(kw):
            taps.append(xp[:, :, i:i + Ho * stride:stride, j:j + Wo * stride:stride])
    p = jnp.stack(taps, axis=2)                       # (B, C, kh*kw, Ho, Wo)
    p = p.reshape(B, C * kh * kw, Ho * Wo)            # feature idx = c*kh*kw + i*kw + j
    p = jnp.transpose(p, (0, 2, 1))                   # (B, P, K)
    return p, Ho, Wo


def build_layer2_gather(h, w, kh, kw, stride, pad):
    """Static 0/1 matrix mapping layer-1 output rows (h*w, C) to the tap-major
    gathered rows (kh*kw*Ho*Wo, C) needed by the layer-2 conv; zero rows encode
    conv zero-padding.  Stored bf16 (0/1 exactly representable)."""
    ho = (h + 2 * pad - kh) // stride + 1
    wo = (w + 2 * pad - kw) // stride + 1
    sel = np.zeros((kh * kw * ho * wo, h * w), np.float32)
    for i in range(kh):
        for j in range(kw):
            t = i * kw + j
            for oh in range(ho):
                for ow in range(wo):
                    hi = stride * oh - pad + i
                    wi = stride * ow - pad + j
                    if 0 <= hi < h and 0 <= wi < w:
                        sel[t * ho * wo + oh * wo + ow, hi * w + wi] = 1.0
    return jnp.asarray(sel, dtype=jnp.bfloat16), ho * wo, kh * kw


def spectral_norm(w, key, n_iter=1, eps=1e-12):
    """PyTorch-style spectral norm on OIHW conv weight (one power iteration)."""
    # TODO(synk): PyTorch keeps a persistent `u` buffer across calls; here a
    # fresh u is drawn per call (parameter preprocessing, not a kernel concern).
    wm = w.reshape(w.shape[0], -1)
    u = jax.random.normal(key, (wm.shape[0],), dtype=jnp.float32)
    u = u / (jnp.linalg.norm(u) + eps)
    v = u
    for _ in range(n_iter):
        v = wm.T @ u
        v = v / (jnp.linalg.norm(v) + eps)
        u = wm @ v
        u = u / (jnp.linalg.norm(u) + eps)
    sigma = u @ (wm @ v)
    return w / sigma


def discriminator_forward(x, w1, w2, w3):
    """x: (B, 3, 16, 16) NCHW f32 -> (B, 1, 1, 1)."""
    B = x.shape[0]
    C1 = w1.shape[0]          # 256
    C2 = w2.shape[0]          # 512

    # Layer-1 im2col on the raw 3-channel input (only cheap glue left outside
    # the fused kernel): (B, 64, 48).
    p1, ho1, wo1 = im2col(x, 4, 4, 2, 1)
    P1, K1 = p1.shape[1], p1.shape[2]

    # Weight re-layouts (feature orderings matched to the in-kernel patches).
    w1m = w1.reshape(C1, -1).T                                        # (48, 256)
    w2m = jnp.transpose(w2, (2, 3, 1, 0)).reshape(-1, C2)             # (4096, 512)
    w2m = w2m.astype(jnp.bfloat16)                                    # bf16 storage
    w3m = jnp.transpose(w3[0], (1, 2, 0)).reshape(-1, w3.shape[1])    # (16, 512)

    sel, P2, T2 = build_layer2_gather(ho1, wo1, 4, 4, 2, 1)           # (256, 64)
    K2 = T2 * C1                                                       # 4096

    flops = 2 * B * (P1 * K1 * C1 + sel.shape[0] * P1 * C1 + P2 * K2 * C2 + P2 * C2)
    bytes_accessed = (p1.size * 4 + sel.size * 2 + w1m.size * 4
                      + w2m.size * 2 + w3m.size * 4 + B * 4)

    out = pl.pallas_call(
        _disc_kernel,
        out_shape=jax.ShapeDtypeStruct((B, 1, 1), jnp.float32),
        grid=(B,),
        in_specs=[
            pl.BlockSpec((1, P1, K1), lambda b: (b, 0, 0)),       # per-sample patches
            pl.BlockSpec(sel.shape, lambda b: (0, 0)),            # constants: fetched once
            pl.BlockSpec(w1m.shape, lambda b: (0, 0)),
            pl.BlockSpec(w2m.shape, lambda b: (0, 0)),
            pl.BlockSpec(w3m.shape, lambda b: (0, 0)),
        ],
        out_specs=pl.BlockSpec((1, 1, 1), lambda b: (b, 0, 0)),
        compiler_params=pltpu.CompilerParams(
            dimension_semantics=("parallel",),        # batch across TCs on v7x
            vmem_limit_bytes=32 * 1024 * 1024),       # headroom; actual use < 10 MiB
        cost_estimate=pl.CostEstimate(
            flops=flops,
            transcendentals=B * (C1 + C2),
            bytes_accessed=bytes_accessed),
    )(p1, sel, w1m, w2m, w3m)

    return out.reshape(B, 1, 1, 1)


# ----------------------------------------------------------------------------
# Pure-JAX reference for validation
# ----------------------------------------------------------------------------
def reference_forward(x, w1, w2, w3):
    def conv(x, w, stride, pad):
        return lax.conv_general_dilated(
            x, w, (stride, stride), [(pad, pad), (pad, pad)],
            dimension_numbers=("NCHW", "OIHW", "NCHW"))

    def inorm(y):
        m = y.mean(axis=(2, 3), keepdims=True)
        v = ((y - m) ** 2).mean(axis=(2, 3), keepdims=True)
        return (y - m) / jnp.sqrt(v + 1e-5)

    def lrelu(y):
        return jnp.where(y > 0, y, 0.2 * y)

    y = lrelu(inorm(conv(x, w1, 2, 1)))
    y = lrelu(inorm(conv(y, w2, 2, 1)))
    return conv(y, w3, 1, 0)


if __name__ == "__main__":
    key = jax.random.PRNGKey(0)
    kx, k1, k2, k3, ku1, ku2, ku3 = jax.random.split(key, 7)

    B, nc, imsize, ndf = 2, 3, 16, 64

    x = jax.random.normal(kx, (B, nc, imsize, imsize), dtype=jnp.float32)

    # Deterministic synthetic conv weights (OIHW, no bias), then spectral norm.
    w1 = 0.05 * jax.random.normal(k1, (ndf * 4, nc, 4, 4), dtype=jnp.float32)
    w2 = 0.05 * jax.random.normal(k2, (ndf * 8, ndf * 4, 4, 4), dtype=jnp.float32)
    w3 = 0.05 * jax.random.normal(k3, (1, ndf * 8, 4, 4), dtype=jnp.float32)
    w1 = spectral_norm(w1, ku1)
    w2 = spectral_norm(w2, ku2)
    w3 = spectral_norm(w3, ku3)

    out = jax.block_until_ready(discriminator_forward(x, w1, w2, w3))
    ref = jax.block_until_ready(reference_forward(x, w1, w2, w3))

    assert out.shape == (B, 1, 1, 1), out.shape
    # The layer-2 matmul (and the exact 0/1 gather) run bf16 x bf16 with f32
    # accumulation; expected deviation from the f32 reference is ~3e-3, so
    # 2e-2 keeps a comfortable margin.
    assert jnp.allclose(out, ref, atol=2e-2, rtol=2e-2), (out, ref)

    print("KERNEL_OK")
</pallas_src>

<mosaic_0001>
module attributes {stable_mosaic.version = 11 : i64} {
  func.func @_disc_kernel(%arg0: i32, %arg1: memref<1x64x48xf32, #tpu.memory_space<vmem>>, %arg2: memref<256x64xbf16, #tpu.memory_space<vmem>>, %arg3: memref<48x256xf32, #tpu.memory_space<vmem>>, %arg4: memref<4096x512xbf16, #tpu.memory_space<vmem>>, %arg5: memref<16x512xf32, #tpu.memory_space<vmem>>, %arg6: memref<1x1x1xf32, #tpu.memory_space<vmem>>) attributes {dimension_semantics = [#tpu.dimension_semantics<parallel>], iteration_bounds = array<i64: 2>, scalar_prefetch = 0 : i64, scratch_operands = 0 : i64, tpu.core_type = #tpu.core_type<tc>, window_params = [{transform_indices = @transform_0, window_bounds = array<i64: 1, 64, 48>}, {pipeline_mode = #tpu.pipeline_mode<synchronous>, transform_indices = @transform_1, window_bounds = array<i64: 256, 64>}, {pipeline_mode = #tpu.pipeline_mode<synchronous>, transform_indices = @transform_2, window_bounds = array<i64: 48, 256>}, {pipeline_mode = #tpu.pipeline_mode<synchronous>, transform_indices = @transform_3, window_bounds = array<i64: 4096, 512>}, {pipeline_mode = #tpu.pipeline_mode<synchronous>, transform_indices = @transform_4, window_bounds = array<i64: 16, 512>}, {transform_indices = @transform_5, window_bounds = array<i64: 1, 1, 1>}]} {
    %c0 = arith.constant 0 : index
    %c0_0 = arith.constant 0 : index
    %c0_1 = arith.constant 0 : index
    %0 = vector.load %arg1[%c0, %c0_0, %c0_1] : memref<1x64x48xf32, #tpu.memory_space<vmem>>, vector<1x64x48xf32>
    %1 = vector.shape_cast %0 : vector<1x64x48xf32> to vector<64x48xf32>
    %c0_2 = arith.constant 0 : index
    %c0_3 = arith.constant 0 : index
    %2 = vector.load %arg3[%c0_2, %c0_3] : memref<48x256xf32, #tpu.memory_space<vmem>>, vector<48x256xf32>
    %c0_4 = arith.constant 0 : index
    %c0_5 = arith.constant 0 : index
    %3 = vector.load %arg2[%c0_4, %c0_5] : memref<256x64xbf16, #tpu.memory_space<vmem>>, vector<256x64xbf16>
    %c0_6 = arith.constant 0 : index
    %c0_7 = arith.constant 0 : index
    %4 = vector.load %arg4[%c0_6, %c0_7] : memref<4096x512xbf16, #tpu.memory_space<vmem>>, vector<4096x512xbf16>
    %c0_8 = arith.constant 0 : index
    %c0_9 = arith.constant 0 : index
    %5 = vector.load %arg5[%c0_8, %c0_9] : memref<16x512xf32, #tpu.memory_space<vmem>>, vector<16x512xf32>
    %cst = arith.constant dense<0.000000e+00> : vector<64x256xf32>
    %6 = tpu.matmul %1, %2, %cst {dimension_numbers = #tpu.dot_dimension_numbers<[1], [0], [0], [1], [0, 0, 1, 1], [], []>} : vector<64x48xf32>, vector<48x256xf32>, vector<64x256xf32> -> vector<64x256xf32>
    %cst_10 = arith.constant dense<0.000000e+00> : vector<256xf32>
    %7 = vector.multi_reduction <add>, %6, %cst_10 [0] : vector<64x256xf32> to vector<256xf32>
    %8 = vector.shape_cast %7 : vector<256xf32> to vector<1x256xf32>
    %cst_11 = arith.constant 1.562500e-02 : f32
    %9 = vector.broadcast %cst_11 : f32 to vector<1x256xf32>
    %10 = arith.mulf %8, %9 : vector<1x256xf32>
    %11 = arith.mulf %6, %6 : vector<64x256xf32>
    %cst_12 = arith.constant dense<0.000000e+00> : vector<256xf32>
    %12 = vector.multi_reduction <add>, %11, %cst_12 [0] : vector<64x256xf32> to vector<256xf32>
    %13 = vector.shape_cast %12 : vector<256xf32> to vector<1x256xf32>
    %cst_13 = arith.constant 1.562500e-02 : f32
    %14 = vector.broadcast %cst_13 : f32 to vector<1x256xf32>
    %15 = arith.mulf %13, %14 : vector<1x256xf32>
    %16 = arith.mulf %10, %10 : vector<1x256xf32>
    %17 = arith.subf %15, %16 : vector<1x256xf32>
    %18 = vector.broadcast %10 : vector<1x256xf32> to vector<64x256xf32>
    %19 = arith.subf %6, %18 : vector<64x256xf32>
    %cst_14 = arith.constant 9.99999974E-6 : f32
    %20 = vector.broadcast %cst_14 : f32 to vector<1x256xf32>
    %21 = arith.addf %17, %20 : vector<1x256xf32>
    %22 = math.rsqrt %21 : vector<1x256xf32>
    %23 = vector.broadcast %22 : vector<1x256xf32> to vector<64x256xf32>
    %24 = arith.mulf %19, %23 : vector<64x256xf32>
    %cst_15 = arith.constant 2.000000e-01 : f32
    %25 = vector.broadcast %cst_15 : f32 to vector<64x256xf32>
    %26 = arith.mulf %25, %24 : vector<64x256xf32>
    %27 = arith.maximumf %24, %26 : vector<64x256xf32>
    %28 = arith.truncf %27 : vector<64x256xf32> to vector<64x256xbf16>
    %cst_16 = arith.constant dense<0.000000e+00> : vector<256x256xf32>
    %29 = tpu.matmul %3, %28, %cst_16 {dimension_numbers = #tpu.dot_dimension_numbers<[1], [0], [0], [1], [0, 0, 1, 1], [], []>} : vector<256x64xbf16>, vector<64x256xbf16>, vector<256x256xf32> -> vector<256x256xf32>
    %30 = arith.truncf %29 : vector<256x256xf32> to vector<256x256xbf16>
    %31 = vector.extract_strided_slice %30 {offsets = [0, 0], sizes = [16, 256], strides = [1, 1]} : vector<256x256xbf16> to vector<16x256xbf16>
    %32 = vector.extract_strided_slice %30 {offsets = [16, 0], sizes = [16, 256], strides = [1, 1]} : vector<256x256xbf16> to vector<16x256xbf16>
    %33 = vector.extract_strided_slice %30 {offsets = [32, 0], sizes = [16, 256], strides = [1, 1]} : vector<256x256xbf16> to vector<16x256xbf16>
    %34 = vector.extract_strided_slice %30 {offsets = [48, 0], sizes = [16, 256], strides = [1, 1]} : vector<256x256xbf16> to vector<16x256xbf16>
    %35 = vector.extract_strided_slice %30 {offsets = [64, 0], sizes = [16, 256], strides = [1, 1]} : vector<256x256xbf16> to vector<16x256xbf16>
    %36 = vector.extract_strided_slice %30 {offsets = [80, 0], sizes = [16, 256], strides = [1, 1]} : vector<256x256xbf16> to vector<16x256xbf16>
    %37 = vector.extract_strided_slice %30 {offsets = [96, 0], sizes = [16, 256], strides = [1, 1]} : vector<256x256xbf16> to vector<16x256xbf16>
    %38 = vector.extract_strided_slice %30 {offsets = [112, 0], sizes = [16, 256], strides = [1, 1]} : vector<256x256xbf16> to vector<16x256xbf16>
    %39 = vector.extract_strided_slice %30 {offsets = [128, 0], sizes = [16, 256], strides = [1, 1]} : vector<256x256xbf16> to vector<16x256xbf16>
    %40 = vector.extract_strided_slice %30 {offsets = [144, 0], sizes = [16, 256], strides = [1, 1]} : vector<256x256xbf16> to vector<16x256xbf16>
    %41 = vector.extract_strided_slice %30 {offsets = [160, 0], sizes = [16, 256], strides = [1, 1]} : vector<256x256xbf16> to vector<16x256xbf16>
    %42 = vector.extract_strided_slice %30 {offsets = [176, 0], sizes = [16, 256], strides = [1, 1]} : vector<256x256xbf16> to vector<16x256xbf16>
    %43 = vector.extract_strided_slice %30 {offsets = [192, 0], sizes = [16, 256], strides = [1, 1]} : vector<256x256xbf16> to vector<16x256xbf16>
    %44 = vector.extract_strided_slice %30 {offsets = [208, 0], sizes = [16, 256], strides = [1, 1]} : vector<256x256xbf16> to vector<16x256xbf16>
    %45 = vector.extract_strided_slice %30 {offsets = [224, 0], sizes = [16, 256], strides = [1, 1]} : vector<256x256xbf16> to vector<16x256xbf16>
    %46 = vector.extract_strided_slice %30 {offsets = [240, 0], sizes = [16, 256], strides = [1, 1]} : vector<256x256xbf16> to vector<16x256xbf16>
    %47 = tpu.concatenate %31, %32, %33, %34, %35, %36, %37, %38, %39, %40, %41, %42, %43, %44, %45, %46 in 1 : vector<16x256xbf16>, vector<16x256xbf16>, vector<16x256xbf16>, vector<16x256xbf16>, vector<16x256xbf16>, vector<16x256xbf16>, vector<16x256xbf16>, vector<16x256xbf16>, vector<16x256xbf16>, vector<16x256xbf16>, vector<16x256xbf16>, vector<16x256xbf16>, vector<16x256xbf16>, vector<16x256xbf16>, vector<16x256xbf16>, vector<16x256xbf16> -> vector<16x4096xbf16>
    %cst_17 = arith.constant dense<0.000000e+00> : vector<16x512xf32>
    %48 = tpu.matmul %47, %4, %cst_17 {dimension_numbers = #tpu.dot_dimension_numbers<[1], [0], [0], [1], [0, 0, 1, 1], [], []>} : vector<16x4096xbf16>, vector<4096x512xbf16>, vector<16x512xf32> -> vector<16x512xf32>
    %cst_18 = arith.constant dense<0.000000e+00> : vector<512xf32>
    %49 = vector.multi_reduction <add>, %48, %cst_18 [0] : vector<16x512xf32> to vector<512xf32>
    %50 = vector.shape_cast %49 : vector<512xf32> to vector<1x512xf32>
    %cst_19 = arith.constant 6.250000e-02 : f32
    %51 = vector.broadcast %cst_19 : f32 to vector<1x512xf32>
    %52 = arith.mulf %50, %51 : vector<1x512xf32>
    %53 = arith.mulf %48, %48 : vector<16x512xf32>
    %cst_20 = arith.constant dense<0.000000e+00> : vector<512xf32>
    %54 = vector.multi_reduction <add>, %53, %cst_20 [0] : vector<16x512xf32> to vector<512xf32>
    %55 = vector.shape_cast %54 : vector<512xf32> to vector<1x512xf32>
    %cst_21 = arith.constant 6.250000e-02 : f32
    %56 = vector.broadcast %cst_21 : f32 to vector<1x512xf32>
    %57 = arith.mulf %55, %56 : vector<1x512xf32>
    %58 = arith.mulf %52, %52 : vector<1x512xf32>
    %59 = arith.subf %57, %58 : vector<1x512xf32>
    %60 = vector.broadcast %52 : vector<1x512xf32> to vector<16x512xf32>
    %61 = arith.subf %48, %60 : vector<16x512xf32>
    %cst_22 = arith.constant 9.99999974E-6 : f32
    %62 = vector.broadcast %cst_22 : f32 to vector<1x512xf32>
    %63 = arith.addf %59, %62 : vector<1x512xf32>
    %64 = math.rsqrt %63 : vector<1x512xf32>
    %65 = vector.broadcast %64 : vector<1x512xf32> to vector<16x512xf32>
    %66 = arith.mulf %61, %65 : vector<16x512xf32>
    %cst_23 = arith.constant 2.000000e-01 : f32
    %67 = vector.broadcast %cst_23 : f32 to vector<16x512xf32>
    %68 = arith.mulf %67, %66 : vector<16x512xf32>
    %69 = arith.maximumf %66, %68 : vector<16x512xf32>
    %70 = arith.mulf %69, %5 : vector<16x512xf32>
    %71 = vector.shape_cast %70 : vector<16x512xf32> to vector<1x16x512xf32>
    %cst_24 = arith.constant dense<0.000000e+00> : vector<1xf32>
    %72 = vector.multi_reduction <add>, %71, %cst_24 [1, 2] : vector<1x16x512xf32> to vector<1xf32>
    %73 = vector.shape_cast %72 : vector<1xf32> to vector<1x1x1xf32>
    %74 = vector.extract %73[0, 0, 0] : f32 from vector<1x1x1xf32>
    %75 = vector.broadcast %74 : f32 to vector<1x1xf32>
    %c0_25 = arith.constant 0 : index
    %c0_26 = arith.constant 0 : index
    %c0_27 = arith.constant 0 : index
    %76 = vector.load %arg6[%c0_25, %c0_26, %c0_27] : memref<1x1x1xf32, #tpu.memory_space<vmem>>, vector<1x1x1xf32>
    %77 = vector.shape_cast %76 : vector<1x1x1xf32> to vector<1x1xf32>
    %78 = vector.shape_cast %75 : vector<1x1xf32> to vector<1x1x1xf32>
    tpu.vector_store %arg6[%c0_25, %c0_26, %c0_27], %78 {strides = array<i32>} : memref<1x1x1xf32, #tpu.memory_space<vmem>>, vector<1x1x1xf32>,
    return
  }
  func.func @transform_0(%arg0: i32) -> (i32, i32, i32) {
    %c0_i32 = arith.constant 0 : i32
    %c0_i32_0 = arith.constant 0 : i32
    %c0_i32_1 = arith.constant 0 : i32
    return %arg0, %c0_i32, %c0_i32_0 : i32, i32, i32
  }
  func.func @transform_1(%arg0: i32) -> (i32, i32) {
    %c0_i32 = arith.constant 0 : i32
    %c0_i32_0 = arith.constant 0 : i32
    %c0_i32_1 = arith.constant 0 : i32
    return %c0_i32, %c0_i32_0 : i32, i32
  }
  func.func @transform_2(%arg0: i32) -> (i32, i32) {
    %c0_i32 = arith.constant 0 : i32
    %c0_i32_0 = arith.constant 0 : i32
    %c0_i32_1 = arith.constant 0 : i32
    return %c0_i32, %c0_i32_0 : i32, i32
  }
  func.func @transform_3(%arg0: i32) -> (i32, i32) {
    %c0_i32 = arith.constant 0 : i32
    %c0_i32_0 = arith.constant 0 : i32
    %c0_i32_1 = arith.constant 0 : i32
    return %c0_i32, %c0_i32_0 : i32, i32
  }
  func.func @transform_4(%arg0: i32) -> (i32, i32) {
    %c0_i32 = arith.constant 0 : i32
    %c0_i32_0 = arith.constant 0 : i32
    %c0_i32_1 = arith.constant 0 : i32
    return %c0_i32, %c0_i32_0 : i32, i32
  }
  func.func @transform_5(%arg0: i32) -> (i32, i32, i32) {
    %c0_i32 = arith.constant 0 : i32
    %c0_i32_0 = arith.constant 0 : i32
    %c0_i32_1 = arith.constant 0 : i32
    return %arg0, %c0_i32, %c0_i32_0 : i32, i32, i32
  }
}

</mosaic_0001>

<bundles_post_ra>
// kernel: tpu_custom_call.1
= control target key start
LH: loop header
LB: loop body
LE: loop exit
PB: predicated region body
PF: predicated region fallthrough
CT: control target
= control target key end

     0   :  { %10 = vsyncpa [#allocation3], 0  ;;  %s12200_s0 = inlined_call_operand.vmem [shape: f32[2,64,48], index: 0, kind: input, shape index: {}]   ;;  %s12201_s1 = inlined_call_operand.vmem [shape: bf16[256,64], index: 1, kind: input, shape index: {}]   ;;  %s12202_s2 = inlined_call_operand.hbm [shape: f32[48,256], index: 2, kind: input, shape index: {}]   ;;  %s12203_s3 = inlined_call_operand.hbm [shape: bf16[4096,512], index: 3, kind: input, shape index: {}]   ;;  %s12204_s4 = inlined_call_operand.hbm [shape: f32[16,512], index: 4, kind: input, shape index: {}]   ;;  %s12205_s5 = inlined_call_operand.vmem [shape: f32[2,1,1], index: 5, kind: output, shape index: {}]  }
   0x1   :  { %11 = vsyncpa [#allocation5], 0  ;;  %s11539_s18 = smov 0  }
   0x2 LB: > { %s11545_s19 = sadd.s32 4294967295, %s11498_s18   ;;  %p8717_p0 = scmp.ge.s32.totalorder %s11498_s18, 1  ;;  %s11498_s18 = sphi %s11539_s18, %s17_s18  }
   0x3   : > { %p158_p1 = scmp.lt.s32.totalorder %s11498_s18, 3  ;;  %p9819_p2 = scmp.eq.s32.totalorder %s11545_s19, 0 }
   0x4   : > { %s11500_s21 = smov [#allocation4]   ;;  %s11501_s23 = smov [#allocation2]  }
   0x5   : > { %p11550_p3 = pnand %p8717_p0, %p158_p1  ;;  %s186_s22 = sshll.u32 %s11500_s21, 4  ;;  %s187_s22 = int_to_ptr.vmem [resolvable:$true] %s186_s22 }
   0x6   : > { %s173_s24 = sshll.u32 %s11501_s23, 4  ;;  %s11502_s26 = smov [#allocation6]   ;;  %s11556_s24 = int_to_ptr.vmem [resolvable:$true] %s173_s24 }
   0x7   : > { %p9809_p4 = pneg %p11550_p3  ;;  %s199_s27 = sshll.u32 %s11502_s26, 4  ;;  %s11564_s27 = int_to_ptr.vmem [resolvable:$true] %s199_s27 }
   0x8   : > { %s11417_s28 = scalar_lea.vmem %s187_s22, 131072  ;;  %p11425_p10 = scmp.lt.s32.totalorder %s187_s22, %s187_s22 }
   0x9   : > { %p11560_p5 = pnand %p9819_p2, %p9809_p4  ;;  %p11418_p7 = scmp.ne.s32.totalorder %s187_s22, %s11417_s28 }
   0xa   : > { %p11426_p11 = scmp.lt.s32.totalorder %s11417_s28, %s11417_s28 }
   0xb   : > { %p11408_p6 = pneg %p11560_p5 }
   0xc   : > { %p11427_p12 = por %p11426_p11, %p11425_p10 }
   0xd   : > { %p11420_p8 = pnand %p11418_p7, %p11408_p6 }
   0xf   : > { %p11421_p9 = pneg %p11420_p8 }
  0x11   : > { %p11428_p13 = pnand %p11427_p12, %p11421_p9 }
  0x13   : > { %11431 = shalt.err (!%p11428_p13)
}
  0x14   : > { %s11503_s29 = smov 256   ;;  %s11504_s30 = smov 16  }
  0x15   : > { %9815 = dma.hbm_to_vmem [thread:$0]  (!%p11560_p5), %s12203_s3, 131072, %s187_s22, [#allocation5], %s11503_s29, %s11503_s29, %s11504_s30  }
  0x16   : > { %s11443_s8 = scalar_lea.vmem %s11556_s24, 1536  ;;  %p11451_p7 = scmp.lt.s32.totalorder %s11556_s24, %s11556_s24 }
  0x17   : > { %p11444_p0 = scmp.ne.s32.totalorder %s11556_s24, %s11443_s8  ;;  %p11452_p8 = scmp.lt.s32.totalorder %s11443_s8, %s11443_s8 }
  0x19   : > { %p11446_p1 = pnand %p11444_p0, %p11408_p6  ;;  %p11453_p9 = por %p11452_p8, %p11451_p7 }
  0x1b   : > { %p11447_p4 = pneg %p11446_p1 }
  0x1d   : > { %p11454_p10 = pnand %p11453_p9, %p11447_p4 }
  0x1f   : > { %11457 = shalt.err (!%p11454_p10)
}
  0x20   : > { %9812 = dma.hbm_to_vmem [thread:$0]  (!%p11560_p5), %s12202_s2, 1536, %s11556_s24, [#allocation3], %s11503_s29, %s11503_s29, %s11504_s30  }
  0x21   : > { %s11469_s11 = scalar_lea.vmem %s11564_s27, 1024  ;;  %p11477_p0 = scmp.lt.s32.totalorder %s11564_s27, %s11564_s27 }
  0x22   : > { %p11470_p11 = scmp.ne.s32.totalorder %s11564_s27, %s11469_s11  ;;  %p11478_p1 = scmp.lt.s32.totalorder %s11469_s11, %s11469_s11 }
  0x24   : > { %p11472_p12 = pnand %p11470_p11, %p11408_p6  ;;  %p11479_p4 = por %p11478_p1, %p11477_p0 }
  0x26   : > { %p11473_p13 = pneg %p11472_p12 }
  0x28   : > { %p11480_p7 = pnand %p11479_p4, %p11473_p13 }
  0x2a   : > { %11483 = shalt.err (!%p11480_p7)
}
  0x2b   : > { %s11505_s12 = smov 512   ;;  %s11506_s13 = smov 32  }
  0x2c   : > { %9818 = dma.hbm_to_vmem [thread:$0]  (!%p11560_p5), %s12204_s4, 1024, %s11564_s27, [#allocation5], %s11505_s12, %s11505_s12, %s11506_s13  }
  0x2d   : > { %223 = sbr.rel (%p11550_p3) target bundleno = 2033 (0x7f1), region = 40 }
  0x32   : > { %11489 = dma.done.wait (%p9819_p2), [#allocation3], 1536  }
  0x33   : > { %11491 = vsyncadd (%p9819_p2), [#allocation3], 4294965760 }
  0x34   : > { %11493 = dma.done.wait (%p9819_p2), [#allocation5], 132096  }
  0x35   : > { %11495 = vsyncadd (%p9819_p2), [#allocation5], 4294835200  ;;  %v11507_v0 = vmov 0.0   ;;  %p257_p5 = scmp.lt.s32.totalorder %s11545_s19, 1  ;;  %v285_v1 = vld [vmem:[#allocation2 + $0x58] sm:$0xff]  ;;  %v284_v2 = vld [vmem:[#allocation2 + $0x50] sm:$0xff] }
  0x36   : > { %1439 = vmatprep.mubr.f32.mxu1 %v11507_v0  ;;  %v283_v3 = vld [vmem:[#allocation2 + $0x48] sm:$0xff]  ;;  %1395 = vmatprep.subr.mxu1 %v285_v1  ;;  %v282_v4 = vld [vmem:[#allocation2 + $0x40] sm:$0xff]  ;;  %v281_v5 = vld [vmem:[#allocation2 + $0x38] sm:$0xff]  ;;  %vm1350_vm0 = vcmask 392192   ;;  %v11508_v21 = vmov 0   ;;  %vm1720_vm1 = vcmask 523264  }
  0x37   : > { %s12209_s19 = smov (!%p257_p5, %s11545_s19), 1  ;;  %1396 = vmatpush1.msra.mxu1 %v284_v2  ;;  %v280_v6 = vld [vmem:[#allocation2 + $0x30] sm:$0xff]  ;;  %v279_v7 = vld [vmem:[#allocation2 + $0x28] sm:$0xff]  ;;  %v278_v8 = vld [vmem:[#allocation2 + $0x20] sm:$0xff]  ;;  %vm8635_vm2 = vcmask 0  }
  0x38   : > { %s9794_s16 = sshll.u32 %s12209_s19, 6  ;;  %1397 = vmatprep.subr.mxu1 %v283_v3  ;;  %v277_v9 = vld [vmem:[#allocation2 + $0x18] sm:$0xff]  ;;  %v276_v10 = vld [vmem:[#allocation2 + $0x10] sm:$0xff]  ;;  %v275_v11 = vld [vmem:[#allocation2 + $0x8] sm:$0xff]  ;;  %s264_s8 = scalar_lea.vmem %s12205_s5, %s12209_s19 }
  0x39   : > { %1398 = vmatpush1.msra.mxu1 %v282_v4  ;;  %s11620_s21 = scalar_lea.vmem %s12200_s0, %s9794_s16  ;;  %v274_v12 = vld [vmem:[#allocation2] sm:$0xff] }
  0x3a   : > { %1399 = vmatprep.subr.mxu1 %v281_v5  ;;  %v266_v13 = vld [vmem:[%s11620_s21] sm:$0xff]  ;;  %v267_v14 = vld [vmem:[%s11620_s21 + $0x8] sm:$0xff]  ;;  %v268_v15 = vld [vmem:[%s11620_s21 + $0x10] sm:$0xff] }
  0x3b   : > { %1400 = vmatpush1.msra.mxu1 %v280_v6  ;;  %v269_v16 = vld [vmem:[%s11620_s21 + $0x18] sm:$0xff]  ;;  %v270_v17 = vld [vmem:[%s11620_s21 + $0x20] sm:$0xff]  ;;  %v271_v18 = vld [vmem:[%s11620_s21 + $0x28] sm:$0xff] }
  0x3c   : > { %1401 = vmatprep.subr.mxu1 %v279_v7  ;;  %v272_v19 = vld [vmem:[%s11620_s21 + $0x30] sm:$0xff]  ;;  %v273_v20 = vld [vmem:[%s11620_s21 + $0x38] sm:$0xff] }
  0x3d   : > { %1402 = vmatpush1.msra.mxu1 %v278_v8  ;;  %v9848_v25 = vld [vmem:[#allocation4 + $0xe4] ss:$16 sps:$4 sm:$0xff]   ;;  %v9851_v30 = vld [vmem:[#allocation4 + $0xe0] ss:$16 sps:$4 sm:$0xff]  }
  0x3e   : > { %1403 = vmatprep.subr.mxu1 %v277_v9  ;;  %7114 = vmatprep.subr.bf16.mxu0 %v9848_v25  ;;  %v9852_v31 = vld [vmem:[#allocation4 + $0xc4] ss:$16 sps:$4 sm:$0xff]   ;;  %v9854_v32 = vld [vmem:[#allocation4 + $0xc0] ss:$16 sps:$4 sm:$0xff]  }
  0x3f   : > { %1404 = vmatpush1.msra.mxu1 %v276_v10  ;;  %v9855_v33 = vld [vmem:[#allocation4 + $0xa4] ss:$16 sps:$4 sm:$0xff]   ;;  %7115 = vmatpush1.bf16.msra.mxu0 %v9851_v30  ;;  %v9858_v51 = vld [vmem:[#allocation4 + $0xa0] ss:$16 sps:$4 sm:$0xff]  }
  0x40   : > { %1405 = vmatprep.subr.mxu1 %v275_v11  ;;  %7116 = vmatprep.subr.bf16.mxu0 %v9852_v31  ;;  %v9859_v52 = vld [vmem:[#allocation4 + $0x84] ss:$16 sps:$4 sm:$0xff]   ;;  %v9861_v57 = vld [vmem:[#allocation4 + $0x80] ss:$16 sps:$4 sm:$0xff]  }
  0x41   : > { %1406 = vmatpush1.msra.mxu1 %v274_v12  ;;  %v9862_v61 = vld [vmem:[#allocation4 + $0x64] ss:$16 sps:$4 sm:$0xff]  }
  0x42   : > { %8728 = vmatmul.mubr.msk.f32.vlgmr.msra.gmra.mxu1 %vm1350_vm0, %v266_v13 }
  0x43   : > { %1445 = vmatprep.mubr.f32.mxu1 %v11507_v0  ;;  %7117 = vmatpush1.bf16.msra.mxu0 %v9854_v32 }
  0x44   : > { %7118 = vmatprep.subr.bf16.mxu0 %v9855_v33  ;;  %v9874_v33 = vld [vmem:[#allocation4 + $0x40] ss:$16 sps:$4 sm:$0xff]  }
  0x46   : > { %8729 = vmatmul.mubr.msk.f32.gmra.mxu1 %vm1350_vm0, %v267_v14 }
  0x47   : > { %1451 = vmatprep.mubr.f32.mxu1 %v11507_v0  ;;  %7119 = vmatpush1.bf16.msra.mxu0 %v9858_v51  ;;  %v9881_v51 = vld [vmem:[#allocation4 + $0x20] ss:$16 sps:$4 sm:$0xff]  }
  0x48   : > { %7120 = vmatprep.subr.bf16.mxu0 %v9859_v52  ;;  %v9882_v52 = vld [vmem:[#allocation4 + $0x4] ss:$16 sps:$4 sm:$0xff]  }
  0x4a   : > { %8730 = vmatmul.mubr.msk.f32.gmra.mxu1 %vm1350_vm0, %v268_v15 }
  0x4b   : > { %1457 = vmatprep.mubr.f32.mxu1 %v11507_v0  ;;  %7121 = vmatpush1.bf16.msra.mxu0 %v9861_v57  ;;  %v9887_v57 = vld [vmem:[#allocation4] ss:$16 sps:$4 sm:$0xff]  }
  0x4c   : > { %7122 = vmatprep.subr.bf16.mxu0 %v9862_v61 }
  0x4e   : > { %8731 = vmatmul.mubr.msk.f32.gmra.mxu1 %vm1350_vm0, %v269_v16 }
  0x4f   : > { %1463 = vmatprep.mubr.f32.mxu1 %v11507_v0 }
  0x52   : > { %8732 = vmatmul.mubr.msk.f32.gmra.mxu1 %vm1350_vm0, %v270_v17  ;;  %v9868_v17 = vld [vmem:[#allocation4 + $0x60] ss:$16 sps:$4 sm:$0xff]  }
  0x53   : > { %1469 = vmatprep.mubr.f32.mxu1 %v11507_v0  ;;  %7123 = vmatpush1.bf16.msra.mxu0 %v9868_v17  ;;  %v9900_v17 = vld [vmem:[#allocation4 + $0x1c0] ss:$16 sps:$4 sm:$0xff]  }
  0x56   : > { %8733 = vmatmul.mubr.msk.f32.gmra.mxu1 %vm1350_vm0, %v271_v18  ;;  %v9869_v18 = vld [vmem:[#allocation4 + $0x44] ss:$16 sps:$4 sm:$0xff]  }
  0x57   : > { %1475 = vmatprep.mubr.f32.mxu1 %v11507_v0  ;;  %7124 = vmatprep.subr.bf16.mxu0 %v9869_v18 }
  0x58   : > { %7125 = vmatpush1.bf16.msra.mxu0 %v9874_v33 }
  0x5a   : > { %8734 = vmatmul.mubr.msk.f32.gmra.mxu1 %vm1350_vm0, %v272_v19 }
  0x5b   : > { %1481 = vmatprep.mubr.f32.mxu1 %v11507_v0 }
  0x5e   : > { %8735 = vmatmul.mubr.msk.f32.gmra.mxu1 %vm1350_vm0, %v273_v20 }
  0x5f   : > { %1801 = vmatprep.mubr.bf16.mxu1 %v11508_v21 }
 0x102   : > { %v11639_v22 = vpop.f32.mrf.mxu1 }
 0x103   : > { %v1516_v38 = vmul.f32 %v11639_v22, %v11639_v22 }
 0x104   : > { %v11641_v23 = vpop.f32.mrf.mxu1 }
 0x105   : > { %v1517_v41 = vmul.f32 %v11641_v23, %v11641_v23 }
 0x106   : > { %v11643_v24 = vpop.f32.mrf.mxu1 }
 0x107   : > { %v1518_v35 = vmul.f32 %v11643_v24, %v11643_v24  ;;  %v1488_v39 = vadd.f32 %v11643_v24, %v11639_v22 }
 0x108   : > { %v11645_v26 = vpop.f32.mrf.mxu1 }
 0x109   : > { %v1519_v36 = vmul.f32 %v11645_v26, %v11645_v26  ;;  %v1532_v44 = vadd.f32 %v1518_v35, %v1516_v38  ;;  %v1501_v46 = vadd.f32 %v11645_v26, %v11641_v23  ;;  %v9875_v35 = vld [vmem:[#allocation4 + $0x24] ss:$16 sps:$4 sm:$0xff]  }
 0x10a   : > { %v11647_v27 = vpop.f32.mrf.mxu1  ;;  %7126 = vmatprep.subr.bf16.mxu0 %v9875_v35  ;;  %v9907_v35 = vld [vmem:[#allocation4 + $0x1a0] ss:$16 sps:$4 sm:$0xff]  }
 0x10b   : > { %v1520_v40 = vmul.f32 %v11647_v27, %v11647_v27  ;;  %v1489_v45 = vadd.f32 %v1488_v39, %v11647_v27  ;;  %v1545_v48 = vadd.f32 %v1519_v36, %v1517_v41  ;;  %7127 = vmatpush1.bf16.msra.mxu0 %v9881_v51 }
 0x10c   : > { %v11649_v28 = vpop.f32.mrf.mxu1  ;;  %7128 = vmatprep.subr.bf16.mxu0 %v9882_v52 }
 0x10d   : > { %v1521_v42 = vmul.f32 %v11649_v28, %v11649_v28  ;;  %v1533_v53 = vadd.f32 %v1532_v44, %v1520_v40  ;;  %v1502_v54 = vadd.f32 %v1501_v46, %v11649_v28 }
 0x10e   : > { %v11651_v29 = vpop.f32.mrf.mxu1 }
 0x10f   : > { %v1522_v47 = vmul.f32 %v11651_v29, %v11651_v29  ;;  %v1490_v55 = vadd.f32 %v1489_v45, %v11651_v29  ;;  %v1546_v58 = vadd.f32 %v1545_v48, %v1521_v42  ;;  %7129 = vmatpush1.bf16.msra.mxu0 %v9887_v57 }
 0x110   : > { %v11653_v34 = vpop.f32.mrf.mxu1 }
 0x111   : > { %v1523_v49 = vmul.f32 %v11653_v34, %v11653_v34  ;;  %v1534_v62 = vadd.f32 %v1533_v53, %v1522_v47  ;;  %v1503_v0 = vadd.f32 %v1502_v54, %v11653_v34 }
 0x112   : > { %v11659_v37 = vpop.f32.mrf.mxu1 }
 0x113   : > { %v1524_v56 = vmul.f32 %v11659_v37, %v11659_v37  ;;  %v1491_v63 = vadd.f32 %v1490_v55, %v11659_v37  ;;  %v1547_v2 = vadd.f32 %v1546_v58, %v1523_v49 }
 0x114   : > { %v11671_v43 = vpop.f32.mrf.mxu1 }
 0x115   : > { %v1525_v59 = vmul.f32 %v11671_v43, %v11671_v43  ;;  %v1535_v5 = vadd.f32 %v1534_v62, %v1524_v56  ;;  %v1504_v6 = vadd.f32 %v1503_v0, %v11671_v43 }
 0x116   : > { %v11680_v50 = vpop.f32.mrf.mxu1 }
 0x117   : > { %v1526_v1 = vmul.f32 %v11680_v50, %v11680_v50  ;;  %v1492_v7 = vadd.f32 %v1491_v63, %v11680_v50  ;;  %v1548_v9 = vadd.f32 %v1547_v2, %v1525_v59  ;;  %v9888_v63 = vld [vmem:[#allocation4 + $0x1e4] ss:$16 sps:$4 sm:$0xff]  }
 0x118   : > { %v11688_v60 = vpop.f32.mrf.mxu1  ;;  %7130 = vmatprep.subr.bf16.mxu0 %v9888_v63 }
 0x119   : > { %v1527_v3 = vmul.f32 %v11688_v60, %v11688_v60  ;;  %v1536_v11 = vadd.f32 %v1535_v5, %v1526_v1  ;;  %v1505_v13 = vadd.f32 %v1504_v6, %v11688_v60 }
 0x11a   : > { %v11696_v4 = vpop.f32.mrf.mxu1 }
 0x11b   : > { %v1528_v8 = vmul.f32 %v11696_v4, %v11696_v4  ;;  %v1493_v12 = vadd.f32 %v1492_v7, %v11696_v4  ;;  %v1549_v15 = vadd.f32 %v1548_v9, %v1527_v3  ;;  %v9894_v9 = vld [vmem:[#allocation4 + $0x1e0] ss:$16 sps:$4 sm:$0xff]  }
 0x11c   : > { %v11702_v10 = vpop.f32.mrf.mxu1  ;;  %7131 = vmatpush2.bf16.msra.mxu0 %v9894_v9 }
 0x11d   : > { %v1529_v14 = vmul.f32 %v11702_v10, %v11702_v10  ;;  %v1537_v19 = vadd.f32 %v1536_v11, %v1528_v8  ;;  %v1506_v20 = vadd.f32 %v1505_v13, %v11702_v10  ;;  %v9895_v11 = vld [vmem:[#allocation4 + $0x1c4] ss:$16 sps:$4 sm:$0xff]  }
 0x11e   : > { %v11708_v16 = vpop.f32.mrf.mxu1  ;;  %7132 = vmatprep.subr.bf16.mxu0 %v9895_v11 }
 0x11f   : > { %v1494_v25 = vadd.f32 %v1493_v12, %v11708_v16  ;;  %v1530_v30 = vmul.f32 %v11708_v16, %v11708_v16  ;;  %v1550_v31 = vadd.f32 %v1549_v15, %v1529_v14 }
 0x120   : > { %v11714_v32 = vpop.f32.mrf.mxu1  ;;  %7133 = vmatpush2.bf16.msra.mxu0 %v9900_v17 }
 0x121   : > { %v1495_v36 = vrot.slane %v1494_v25, 4  ;;  %v1538_v38 = vadd.f32 %v1537_v19, %v1530_v30  ;;  %v1507_v39 = vadd.f32 %v1506_v20, %v11714_v32  ;;  %v1531_v40 = vmul.f32 %v11714_v32, %v11714_v32  ;;  %v9901_v20 = vld [vmem:[#allocation4 + $0x1a4] ss:$16 sps:$4 sm:$0xff]  }
 0x122   : > { %7134 = vmatprep.subr.bf16.mxu0 %v9901_v20 }
 0x123   : > { %v1496_v41 = vadd.f32 %v1495_v36, %v1494_v25  ;;  %v1539_v42 = vrot.slane %v1538_v38, 4  ;;  %v1508_v44 = vrot.slane %v1507_v39, 4  ;;  %v1551_v45 = vadd.f32 %v1550_v31, %v1531_v40  ;;  %v9908_v36 = vld [vmem:[#allocation4 + $0x184] ss:$16 sps:$4 sm:$0xff]   ;;  %v9920_v40 = vld [vmem:[#allocation4 + $0x160] ss:$16 sps:$4 sm:$0xff]  }
 0x124   : > { %7135 = vmatpush2.bf16.msra.mxu0 %v9907_v35 }
 0x125   : > { %v1497_v46 = vrot.slane %v1496_v41, 2  ;;  %v1540_v47 = vadd.f32 %v1539_v42, %v1538_v38  ;;  %v1509_v48 = vadd.f32 %v1508_v44, %v1507_v39  ;;  %v1552_v49 = vrot.slane %v1551_v45, 4  ;;  %v9913_v38 = vld [vmem:[#allocation4 + $0x180] ss:$16 sps:$4 sm:$0xff]   ;;  %7136 = vmatprep.subr.bf16.mxu0 %v9908_v36  ;;  %v9914_v39 = vld [vmem:[#allocation4 + $0x164] ss:$16 sps:$4 sm:$0xff]  }
 0x126   : > { %v9926_v42 = vld [vmem:[#allocation4 + $0x140] ss:$16 sps:$4 sm:$0xff]  }
 0x127   : > { %v1498_v53 = vadd.f32 %v1497_v46, %v1496_v41  ;;  %v1541_v54 = vrot.slane %v1540_v47, 2  ;;  %v1510_v55 = vrot.slane %v1509_v48, 2  ;;  %v1553_v56 = vadd.f32 %v1552_v49, %v1551_v45  ;;  %v9921_v41 = vld [vmem:[#allocation4 + $0x144] ss:$16 sps:$4 sm:$0xff]  }
 0x128   : > { %7137 = vmatpush2.bf16.msra.mxu0 %v9913_v38 }
 0x129   : > { %v1499_v58 = vrot.slane %v1498_v53, 1  ;;  %v1542_v59 = vadd.f32 %v1541_v54, %v1540_v47  ;;  %v1511_v61 = vadd.f32 %v1510_v55, %v1509_v48  ;;  %v1554_v62 = vrot.slane %v1553_v56, 2  ;;  %7138 = vmatprep.subr.bf16.mxu0 %v9914_v39 }
 0x12b   : > { %v1500_v0 = vadd.f32 %v1499_v58, %v1498_v53  ;;  %v1543_v1 = vrot.slane %v1542_v59, 1  ;;  %v1512_v2 = vrot.slane %v1511_v61, 1  ;;  %v1555_v3 = vadd.f32 %v1554_v62, %v1553_v56 }
 0x12c   : > { %7139 = vmatpush2.bf16.msra.mxu0 %v9920_v40 }
 0x12d   : > { %v11719_v5 = vmul.f32 0.015625, %v1500_v0  ;;  %v1544_v6 = vadd.f32 %v1543_v1, %v1542_v59  ;;  %v1513_v7 = vadd.f32 %v1512_v2, %v1511_v61  ;;  %v1556_v8 = vrot.slane %v1555_v3, 1  ;;  %7140 = vmatprep.subr.bf16.mxu0 %v9921_v41 }
 0x12f   : > { %v1558_v12 = vmul.f32 0.015625, %v1544_v6  ;;  %v1560_v13 = vmul.f32 %v11719_v5, %v11719_v5  ;;  %v11723_v14 = vmul.f32 0.015625, %v1513_v7  ;;  %v1557_v15 = vadd.f32 %v1556_v8, %v1555_v3 }
 0x130   : > { %v1578_v44 = vsub.f32 %v11708_v16, %v11719_v5  ;;  %v1576_v45 = vsub.f32 %v11696_v4, %v11719_v5  ;;  %v1572_v46 = vsub.f32 %v11659_v37, %v11719_v5  ;;  %v1574_v47 = vsub.f32 %v11680_v50, %v11719_v5  ;;  %7141 = vmatpush2.bf16.msra.mxu0 %v9926_v42 }
 0x131   : > { %v1562_v18 = vsub.f32 %v1558_v12, %v1560_v13  ;;  %v1561_v19 = vmul.f32 %v11723_v14, %v11723_v14  ;;  %v1559_v25 = vmul.f32 0.015625, %v1557_v15  ;;  %v1579_v48 = vsub.f32 %v11714_v32, %v11723_v14 }
 0x132   : > { %v1577_v49 = vsub.f32 %v11702_v10, %v11723_v14  ;;  %v1573_v51 = vsub.f32 %v11671_v43, %v11723_v14  ;;  %v1575_v16 = vsub.f32 %v11688_v60, %v11723_v14  ;;  %v1569_v37 = vsub.f32 %v11649_v28, %v11723_v14 }
 0x133   : > { %v1580_v30 = vadd.f32 1e-05, %v1562_v18  ;;  %v1563_v31 = vsub.f32 %v1559_v25, %v1561_v19  ;;  %v1571_v50 = vsub.f32 %v11653_v34, %v11723_v14  ;;  %v1568_v32 = vsub.f32 %v11647_v27, %v11719_v5 }
 0x134   : > { %v1570_v10 = vsub.f32 %v11651_v29, %v11719_v5  ;;  %v1565_v60 = vsub.f32 %v11641_v23, %v11723_v14  ;;  %v1567_v55 = vsub.f32 %v11645_v26, %v11723_v14  ;;  %v1564_v28 = vsub.f32 %v11639_v22, %v11719_v5 }
 0x135   : > { %11394 = vrsqrt.f32 %v1580_v30  ;;  %v1581_v33 = vadd.f32 1e-05, %v1563_v31  ;;  %v1566_v34 = vsub.f32 %v11643_v24, %v11719_v5 }
 0x137   : > { %11396 = vrsqrt.f32 %v1581_v33 }
 0x142   : > { %v11395_v4 = vpop.eup %11394 }
 0x143   : > { %v1598_v52 = vmul.f32 %v11395_v4, %v1578_v44  ;;  %v1596_v53 = vmul.f32 %v11395_v4, %v1576_v45  ;;  %v1592_v43 = vmul.f32 %v11395_v4, %v1572_v46  ;;  %v1594_v54 = vmul.f32 %v11395_v4, %v1574_v47 }
 0x144   : > { %v11397_v27 = vpop.eup %11396  ;;  %v1588_v58 = vmul.f32 %v11395_v4, %v1568_v32  ;;  %v1590_v26 = vmul.f32 %v11395_v4, %v1570_v10  ;;  %v1584_v5 = vmul.f32 %v11395_v4, %v1564_v28  ;;  %v1586_v8 = vmul.f32 %v11395_v4, %v1566_v34  ;;  %v9866_v32 = vld [vmem:[#allocation4 + $0x4e4] ss:$16 sps:$4 sm:$0xff]   ;;  %v9884_v34 = vld [vmem:[#allocation4 + $0x480] ss:$16 sps:$4 sm:$0xff]  }
 0x145   : > { %v1614_v56 = vmul.f32 0.2, %v1598_v52  ;;  %v1612_v29 = vmul.f32 0.2, %v1596_v53  ;;  %v1608_v57 = vmul.f32 0.2, %v1592_v43  ;;  %v1599_v59 = vmul.f32 %v11397_v27, %v1579_v48 }
 0x146   : > { %v1597_v61 = vmul.f32 %v11397_v27, %v1577_v49  ;;  %v1593_v62 = vmul.f32 %v11397_v27, %v1573_v51  ;;  %v1595_v63 = vmul.f32 %v11397_v27, %v1575_v16  ;;  %v1610_v1 = vmul.f32 0.2, %v1594_v54  ;;  %v9842_v10 = vld [vmem:[%s12201_s1] sm:$0xff]  }
 0x147   : > { %v1630_v23 = vmax.f32 %v1598_v52, %v1614_v56  ;;  %v1628_v0 = vmax.f32 %v1596_v53, %v1612_v29  ;;  %v1615_v3 = vmul.f32 0.2, %v1599_v59  ;;  %v1589_v6 = vmul.f32 %v11397_v27, %v1569_v37  ;;  %v9864_v52 = vld [vmem:[#allocation4 + $0x4e0] ss:$16 sps:$4 sm:$0xff]   ;;  %v9873_v53 = vld [vmem:[#allocation4 + $0x4c4] ss:$16 sps:$4 sm:$0xff]  }
 0x148   : > { %v1613_v2 = vmul.f32 0.2, %v1597_v61  ;;  %v1609_v22 = vmul.f32 0.2, %v1593_v62  ;;  %v1611_v7 = vmul.f32 0.2, %v1595_v63  ;;  %v1591_v24 = vmul.f32 %v11397_v27, %v1571_v50 }
 0x149   : > { %v1631_v11 = vmax.f32 %v1599_v59, %v1615_v3  ;;  %v1605_v13 = vmul.f32 0.2, %v1589_v6  ;;  %v1638_v14 = vpack.c.bf16 %v1630_v23, %v1628_v0  ;;  %v1624_v17 = vmax.f32 %v1592_v43, %v1608_v57  ;;  %v9871_v43 = vld [vmem:[#allocation4 + $0x4c0] ss:$16 sps:$4 sm:$0xff]   ;;  %v9886_v28 = vld [vmem:[#allocation4 + $0x484] ss:$16 sps:$4 sm:$0xff]  }
 0x14a   : > { %v1629_v9 = vmax.f32 %v1597_v61, %v1613_v2  ;;  %v1625_v12 = vmax.f32 %v1593_v62, %v1609_v22  ;;  %v1627_v15 = vmax.f32 %v1595_v63, %v1611_v7  ;;  %v1607_v18 = vmul.f32 0.2, %v1591_v24  ;;  %v9844_v56 = vld [vmem:[%s12201_s1 + $0x10] sm:$0xff]   ;;  %v9845_v61 = vld [vmem:[%s12201_s1 + $0x18] sm:$0xff]   ;;  %v9847_v22 = vld [vmem:[%s12201_s1 + $0x28] sm:$0xff]  }
 0x14b   : > { %v1626_v20 = vmax.f32 %v1594_v54, %v1610_v1  ;;  %v1604_v25 = vmul.f32 0.2, %v1588_v58  ;;  %v1585_v30 = vmul.f32 %v11397_v27, %v1565_v60  ;;  %v1621_v33 = vmax.f32 %v1589_v6, %v1605_v13  ;;  %v9879_v54 = vld [vmem:[#allocation4 + $0x4a4] ss:$16 sps:$4 sm:$0xff]   ;;  %v9843_v60 = vld [vmem:[%s12201_s1 + $0x8] sm:$0xff]   ;;  %v9857_v7 = vld [vmem:[%s12201_s1 + $0x38] sm:$0xff]  }
 0x14c   : > { %v1639_v19 = vpack.c.bf16 %v1631_v11, %v1629_v9  ;;  %v1637_v31 = vpack.c.bf16 %v1627_v15, %v1625_v12  ;;  %v1606_v35 = vmul.f32 0.2, %v1590_v26  ;;  %v1587_v36 = vmul.f32 %v11397_v27, %v1567_v55  ;;  %v9877_v55 = vld [vmem:[#allocation4 + $0x4a0] ss:$16 sps:$4 sm:$0xff]   ;;  %v9892_v27 = vld [vmem:[#allocation4 + $0x464] ss:$16 sps:$4 sm:$0xff]  }
 0x14d   : > { %v1623_v38 = vmax.f32 %v1591_v24, %v1607_v18  ;;  %v1601_v39 = vmul.f32 0.2, %v1585_v30  ;;  %v1600_v40 = vmul.f32 0.2, %v1584_v5  ;;  %v1602_v41 = vmul.f32 0.2, %v1586_v8 }
 0x14e   : > { %1777 = vmatprep.subr.bf16.mxu1 %v1639_v19  ;;  %v1603_v42 = vmul.f32 0.2, %v1587_v36  ;;  %v1636_v46 = vpack.c.bf16 %v1626_v20, %v1624_v17  ;;  %v1620_v47 = vmax.f32 %v1588_v58, %v1604_v25  ;;  %v1622_v48 = vmax.f32 %v1590_v26, %v1606_v35  ;;  %v9890_v29 = vld [vmem:[#allocation4 + $0x460] ss:$16 sps:$4 sm:$0xff]   ;;  %v9899_v57 = vld [vmem:[#allocation4 + $0x444] ss:$16 sps:$4 sm:$0xff]  }
 0x14f   : > { %1778 = vmatpush1.bf16.msra.mxu1 %v1638_v14  ;;  %v1616_v44 = vmax.f32 %v1584_v5, %v1600_v40  ;;  %v1618_v45 = vmax.f32 %v1586_v8, %v1602_v41  ;;  %v1635_v49 = vpack.c.bf16 %v1623_v38, %v1621_v33  ;;  %v1617_v51 = vmax.f32 %v1585_v30, %v1601_v39  ;;  %v9897_v58 = vld [vmem:[#allocation4 + $0x440] ss:$16 sps:$4 sm:$0xff]   ;;  %v9905_v59 = vld [vmem:[#allocation4 + $0x424] ss:$16 sps:$4 sm:$0xff]   ;;  %v9880_v11 = vld [vmem:[%s12201_s1 + $0x48] sm:$0xff]  }
 0x150   : > { %1779 = vmatprep.subr.bf16.mxu1 %v1637_v31  ;;  %v1619_v16 = vmax.f32 %v1587_v36, %v1603_v42  ;;  %v1634_v37 = vpack.c.bf16 %v1622_v48, %v1620_v47  ;;  %v9903_v62 = vld [vmem:[#allocation4 + $0x420] ss:$16 sps:$4 sm:$0xff]   ;;  %v9912_v63 = vld [vmem:[#allocation4 + $0x404] ss:$16 sps:$4 sm:$0xff]   ;;  %v9906_v36 = vld [vmem:[%s12201_s1 + $0x58] sm:$0xff]  }
 0x151   : > { %v1632_v4 = vpack.c.bf16 %v1618_v45, %v1616_v44  ;;  %v9910_v23 = vld [vmem:[#allocation4 + $0x400] ss:$16 sps:$4 sm:$0xff]   ;;  %v9918_v0 = vld [vmem:[#allocation4 + $0x5e4] ss:$16 sps:$4 sm:$0xff]   ;;  %v9932_v42 = vld [vmem:[%s12201_s1 + $0x68] sm:$0xff]  }
 0x152   : > { %v1633_v50 = vpack.c.bf16 %v1619_v16, %v1617_v51  ;;  %v9846_v1 = vld [vmem:[%s12201_s1 + $0x20] sm:$0xff]   ;;  %v9850_v6 = vld [vmem:[%s12201_s1 + $0x30] sm:$0xff]   ;;  %v9959_v45 = vld [vmem:[%s12201_s1 + $0x78] sm:$0xff]  }
 0x153   : > { %1780 = vmatpush1.bf16.msra.mxu1 %v1636_v46  ;;  %v9916_v26 = vld [vmem:[#allocation4 + $0x5e0] ss:$16 sps:$4 sm:$0xff]   ;;  %v9925_v2 = vld [vmem:[#allocation4 + $0x5c4] ss:$16 sps:$4 sm:$0xff]  }
 0x154   : > { %1781 = vmatprep.subr.bf16.mxu1 %v1635_v49  ;;  %v9923_v3 = vld [vmem:[#allocation4 + $0x5c0] ss:$16 sps:$4 sm:$0xff]   ;;  %v9927_v5 = vld [vmem:[#allocation4 + $0x124] ss:$16 sps:$4 sm:$0xff]  }
 0x155   : > { %v9867_v24 = vld [vmem:[%s12201_s1 + $0x40] sm:$0xff]   ;;  %7142 = vmatprep.subr.bf16.mxu0 %v9927_v5  ;;  %v9893_v20 = vld [vmem:[%s12201_s1 + $0x50] sm:$0xff]  }
 0x156   : > { %v9929_v8 = vld [vmem:[#allocation4 + $0x5a0] ss:$16 sps:$4 sm:$0xff]   ;;  %v9931_v9 = vld [vmem:[#allocation4 + $0x5a4] ss:$16 sps:$4 sm:$0xff]  }
 0x157   : > { %1782 = vmatpush1.bf16.msra.mxu1 %v1634_v37  ;;  %v9933_v12 = vld [vmem:[#allocation4 + $0x120] ss:$16 sps:$4 sm:$0xff]   ;;  %v9934_v13 = vld [vmem:[#allocation4 + $0x104] ss:$16 sps:$4 sm:$0xff]  }
 0x158   : > { %1783 = vmatprep.subr.bf16.mxu1 %v1633_v50  ;;  %7143 = vmatpush2.bf16.msra.mxu0 %v9933_v12  ;;  %v9936_v14 = vld [vmem:[#allocation4 + $0x580] ss:$16 sps:$4 sm:$0xff]   ;;  %v9938_v15 = vld [vmem:[#allocation4 + $0x584] ss:$16 sps:$4 sm:$0xff]  }
 0x159   : > { %v9939_v17 = vld [vmem:[#allocation4 + $0x100] ss:$16 sps:$4 sm:$0xff]   ;;  %7144 = vmatprep.subr.bf16.mxu0 %v9934_v13  ;;  %v9942_v18 = vld [vmem:[#allocation4 + $0x2e4] ss:$16 sps:$4 sm:$0xff]  }
 0x15a   : > { %v9943_v19 = vld [vmem:[#allocation4 + $0x560] ss:$16 sps:$4 sm:$0xff]   ;;  %v9945_v25 = vld [vmem:[#allocation4 + $0x564] ss:$16 sps:$4 sm:$0xff]  }
 0x15b   : > { %1784 = vmatpush1.bf16.msra.mxu1 %v1632_v4  ;;  %v9950_v30 = vld [vmem:[#allocation4 + $0x540] ss:$16 sps:$4 sm:$0xff]   ;;  %v9952_v31 = vld [vmem:[#allocation4 + $0x544] ss:$16 sps:$4 sm:$0xff]  }
 0x15c   : > { %7200 = vmatprep.subr.bf16.mxu1 %v9866_v32  ;;  %7145 = vmatpush2.bf16.msra.mxu0 %v9939_v17  ;;  %v9956_v33 = vld [vmem:[#allocation4 + $0x520] ss:$16 sps:$4 sm:$0xff]   ;;  %v9958_v35 = vld [vmem:[#allocation4 + $0x524] ss:$16 sps:$4 sm:$0xff]  }
 0x15d   : > { %7157 = vmatprep.subr.bf16.mxu0 %v9942_v18  ;;  %v9963_v38 = vld [vmem:[#allocation4 + $0x500] ss:$16 sps:$4 sm:$0xff]   ;;  %v9965_v39 = vld [vmem:[#allocation4 + $0x504] ss:$16 sps:$4 sm:$0xff]  }
 0x15e   : > { %8752 = vmatmul.mubr.msk.bf16.vlgmr.msra.gmra.mxu1 %vm1720_vm1, %v9842_v10  ;;  %v9971_v40 = vld [vmem:[#allocation4 + $0x8e4] ss:$16 sps:$4 sm:$0xff]   ;;  %v9940_v16 = vld [vmem:[#allocation4 + $0x2e0] ss:$16 sps:$4 sm:$0xff]  }
 0x15f   : > { %1811 = vmatprep.mubr.bf16.mxu1 %v11508_v21  ;;  %7201 = vmatpush1.bf16.msra.mxu1 %v9864_v52  ;;  %v9919_v41 = vld [vmem:[%s12201_s1 + $0x60] sm:$0xff]   ;;  %v9946_v44 = vld [vmem:[%s12201_s1 + $0x70] sm:$0xff]  }
 0x160   : > { %7202 = vmatprep.subr.bf16.mxu1 %v9873_v53  ;;  %v9949_v50 = vld [vmem:[#allocation4 + $0x2c4] ss:$16 sps:$4 sm:$0xff]   ;;  %v9947_v32 = vld [vmem:[#allocation4 + $0x2c0] ss:$16 sps:$4 sm:$0xff]  }
 0x161   : > { %v9955_v52 = vld [vmem:[#allocation4 + $0x2a4] ss:$16 sps:$4 sm:$0xff]   ;;  %v9981_v5 = vld [vmem:[#allocation4 + $0x8a0] ss:$16 sps:$4 sm:$0xff]  }
 0x162   : > { %v9984_v13 = vld [vmem:[#allocation4 + $0x200] ss:$16 sps:$4 sm:$0xff]   ;;  %v9995_v17 = vld [vmem:[#allocation4 + $0x864] ss:$16 sps:$4 sm:$0xff]  }
 0x163   : > { %7203 = vmatpush1.bf16.msra.mxu1 %v9871_v43 }
 0x164   : > { %7204 = vmatprep.subr.bf16.mxu1 %v9879_v54  ;;  %v9953_v54 = vld [vmem:[#allocation4 + $0x2a0] ss:$16 sps:$4 sm:$0xff]  }
 0x166   : > { %8753 = vmatmul.mubr.msk.bf16.gmra.mxu1 %vm1720_vm1, %v9843_v60 }
 0x167   : > { %1821 = vmatprep.mubr.bf16.mxu1 %v11508_v21  ;;  %7205 = vmatpush1.bf16.msra.mxu1 %v9877_v55  ;;  %v9962_v55 = vld [vmem:[#allocation4 + $0x284] ss:$16 sps:$4 sm:$0xff]  }
 0x168   : > { %7206 = vmatprep.subr.bf16.mxu1 %v9886_v28 }
 0x16b   : > { %7207 = vmatpush1.bf16.msra.mxu1 %v9884_v34  ;;  %v9960_v34 = vld [vmem:[#allocation4 + $0x280] ss:$16 sps:$4 sm:$0xff]  }
 0x16c   : > { %7208 = vmatprep.subr.bf16.mxu1 %v9892_v27 }
 0x16e   : > { %8754 = vmatmul.mubr.msk.bf16.gmra.mxu1 %vm1720_vm1, %v9844_v56  ;;  %v9968_v56 = vld [vmem:[#allocation4 + $0x264] ss:$16 sps:$4 sm:$0xff]  }
 0x16f   : > { %1831 = vmatprep.mubr.bf16.mxu1 %v11508_v21  ;;  %7209 = vmatpush1.bf16.msra.mxu1 %v9890_v29 }
 0x170   : > { %7210 = vmatprep.subr.bf16.mxu1 %v9899_v57 }
 0x173   : > { %7211 = vmatpush1.bf16.msra.mxu1 %v9897_v58 }
 0x174   : > { %7212 = vmatprep.subr.bf16.mxu1 %v9905_v59  ;;  %v9966_v59 = vld [vmem:[#allocation4 + $0x260] ss:$16 sps:$4 sm:$0xff]  }
 0x176   : > { %8755 = vmatmul.mubr.msk.bf16.gmra.mxu1 %vm1720_vm1, %v9845_v61  ;;  %v9969_v61 = vld [vmem:[#allocation4 + $0x8e0] ss:$16 sps:$4 sm:$0xff]  }
 0x177   : > { %1841 = vmatprep.mubr.bf16.mxu1 %v11508_v21  ;;  %7213 = vmatpush1.bf16.msra.mxu1 %v9903_v62  ;;  %v9974_v62 = vld [vmem:[#allocation4 + $0x244] ss:$16 sps:$4 sm:$0xff]  }
 0x178   : > { %7214 = vmatprep.subr.bf16.mxu1 %v9912_v63  ;;  %v9977_v63 = vld [vmem:[#allocation4 + $0x8c4] ss:$16 sps:$4 sm:$0xff]  }
 0x17b   : > { %7215 = vmatpush1.bf16.msra.mxu1 %v9910_v23 }
 0x17c   : > { %7216 = vmatprep.subr.bf16.mxu1 %v9918_v0 }
 0x17e   : > { %8756 = vmatmul.mubr.msk.bf16.gmra.mxu1 %vm1720_vm1, %v9846_v1  ;;  %v9972_v1 = vld [vmem:[#allocation4 + $0x240] ss:$16 sps:$4 sm:$0xff]  }
 0x17f   : > { %1851 = vmatprep.mubr.bf16.mxu1 %v11508_v21  ;;  %7217 = vmatpush2.bf16.msra.mxu1 %v9916_v26  ;;  %v9975_v26 = vld [vmem:[#allocation4 + $0x8c0] ss:$16 sps:$4 sm:$0xff]  }
 0x180   : > { %7218 = vmatprep.subr.bf16.mxu1 %v9925_v2  ;;  %v9980_v2 = vld [vmem:[#allocation4 + $0x224] ss:$16 sps:$4 sm:$0xff]  }
 0x183   : > { %7219 = vmatpush2.bf16.msra.mxu1 %v9923_v3  ;;  %v9983_v3 = vld [vmem:[#allocation4 + $0x8a4] ss:$16 sps:$4 sm:$0xff]  }
 0x184   : > { %7220 = vmatprep.subr.bf16.mxu1 %v9931_v9  ;;  %v9989_v9 = vld [vmem:[#allocation4 + $0x884] ss:$16 sps:$4 sm:$0xff]  }
 0x186   : > { %8757 = vmatmul.mubr.msk.bf16.gmra.mxu1 %vm1720_vm1, %v9847_v22 }
 0x187   : > { %1861 = vmatprep.mubr.bf16.mxu1 %v11508_v21  ;;  %7221 = vmatpush2.bf16.msra.mxu1 %v9929_v8  ;;  %v9986_v8 = vld [vmem:[#allocation4 + $0x204] ss:$16 sps:$4 sm:$0xff]  }
 0x188   : > { %7222 = vmatprep.subr.bf16.mxu1 %v9938_v15  ;;  %v9992_v15 = vld [vmem:[#allocation4 + $0x3e4] ss:$16 sps:$4 sm:$0xff]  }
 0x18b   : > { %7223 = vmatpush2.bf16.msra.mxu1 %v9936_v14  ;;  %v9987_v14 = vld [vmem:[#allocation4 + $0x880] ss:$16 sps:$4 sm:$0xff]  }
 0x18c   : > { %7224 = vmatprep.subr.bf16.mxu1 %v9945_v25  ;;  %v9993_v25 = vld [vmem:[#allocation4 + $0x860] ss:$16 sps:$4 sm:$0xff]  }
 0x18e   : > { %8758 = vmatmul.mubr.msk.bf16.gmra.mxu1 %vm1720_vm1, %v9850_v6 }
 0x18f   : > { %1871 = vmatprep.mubr.bf16.mxu1 %v11508_v21  ;;  %7225 = vmatpush2.bf16.msra.mxu1 %v9943_v19 }
 0x190   : > { %7226 = vmatprep.subr.bf16.mxu1 %v9952_v31  ;;  %v9998_v31 = vld [vmem:[#allocation4 + $0x3c4] ss:$16 sps:$4 sm:$0xff]  }
 0x193   : > { %7227 = vmatpush2.bf16.msra.mxu1 %v9950_v30 }
 0x194   : > { %7228 = vmatprep.subr.bf16.mxu1 %v9958_v35 }
 0x196   : > { %8759 = vmatmul.mubr.msk.bf16.gmra.mxu1 %vm1720_vm1, %v9857_v7 }
 0x197   : > { %1881 = vmatprep.mubr.bf16.mxu1 %v11508_v21  ;;  %7229 = vmatpush2.bf16.msra.mxu1 %v9956_v33  ;;  %v10001_v33 = vld [vmem:[#allocation4 + $0x844] ss:$16 sps:$4 sm:$0xff]  }
 0x198   : > { %7230 = vmatprep.subr.bf16.mxu1 %v9965_v39  ;;  %v9999_v39 = vld [vmem:[#allocation4 + $0x840] ss:$16 sps:$4 sm:$0xff]  }
 0x19b   : > { %7231 = vmatpush2.bf16.msra.mxu1 %v9963_v38  ;;  %v9996_v38 = vld [vmem:[#allocation4 + $0x3c0] ss:$16 sps:$4 sm:$0xff]  }
 0x19c   : > { %7286 = vmatprep.subr.bf16.mxu1 %v9971_v40  ;;  %v10004_v40 = vld [vmem:[#allocation4 + $0x3a4] ss:$16 sps:$4 sm:$0xff]  }
 0x19e   : > { %8760 = vmatmul.mubr.msk.bf16.gmra.mxu1 %vm1720_vm1, %v9867_v24  ;;  %v9978_v24 = vld [vmem:[#allocation4 + $0x220] ss:$16 sps:$4 sm:$0xff]  }
 0x19f   : > { %1891 = vmatprep.mubr.bf16.mxu1 %v11508_v21 }
 0x1a6   : > { %8761 = vmatmul.mubr.msk.bf16.gmra.mxu1 %vm1720_vm1, %v9880_v11 }
 0x1a7   : > { %1901 = vmatprep.mubr.bf16.mxu1 %v11508_v21 }
 0x1ae   : > { %8762 = vmatmul.mubr.msk.bf16.gmra.mxu1 %vm1720_vm1, %v9893_v20  ;;  %v9990_v20 = vld [vmem:[#allocation4 + $0x3e0] ss:$16 sps:$4 sm:$0xff]  }
 0x1af   : > { %1911 = vmatprep.mubr.bf16.mxu1 %v11508_v21 }
 0x1b6   : > { %8763 = vmatmul.mubr.msk.bf16.gmra.mxu1 %vm1720_vm1, %v9906_v36 }
 0x1b7   : > { %1921 = vmatprep.mubr.bf16.mxu1 %v11508_v21 }
 0x1be   : > { %8764 = vmatmul.mubr.msk.bf16.gmra.mxu1 %vm1720_vm1, %v9919_v41  ;;  %v10007_v41 = vld [vmem:[#allocation4 + $0x824] ss:$16 sps:$4 sm:$0xff]  }
 0x1bf   : > { %1931 = vmatprep.mubr.bf16.mxu1 %v11508_v21 }
 0x1c6   : > { %8765 = vmatmul.mubr.msk.bf16.gmra.mxu1 %vm1720_vm1, %v9932_v42 }
 0x1c7   : > { %1941 = vmatprep.mubr.bf16.mxu1 %v11508_v21 }
 0x1ce   : > { %8766 = vmatmul.mubr.msk.bf16.gmra.mxu1 %vm1720_vm1, %v9946_v44 }
 0x1cf   : > { %1951 = vmatprep.mubr.bf16.mxu1 %v11508_v21 }
 0x1d6   : > { %8767 = vmatmul.mubr.msk.bf16.gmra.mxu1 %vm1720_vm1, %v9959_v45  ;;  %v10002_v45 = vld [vmem:[#allocation4 + $0x3a0] ss:$16 sps:$4 sm:$0xff]  }
 0x21e   : > { %v1803_v46 = vpop.f32.mrf.mxu1 }
 0x220   : > { %v1805_v47 = vpop.f32.mrf.mxu1 }
 0x222   : > { %v1807_v48 = vpop.f32.mrf.mxu1 }
 0x223   : > { %v11840_v4 = vpack.c.bf16 %v1807_v48, %v1803_v46  ;;  %v10005_v46 = vld [vmem:[#allocation4 + $0x820] ss:$16 sps:$4 sm:$0xff]   ;;  %v10013_v48 = vld [vmem:[#allocation4 + $0x804] ss:$16 sps:$4 sm:$0xff]  }
 0x224   : > { %v1809_v49 = vpop.f32.mrf.mxu1 }
 0x225   : > { %v11838_v51 = vpack.c.bf16 %v1809_v49, %v1805_v47  ;;  %v10010_v47 = vld [vmem:[#allocation4 + $0x384] ss:$16 sps:$4 sm:$0xff]  }
 0x226   : > { %v11842_v37 = vpop.f32.mrf.mxu1 }
 0x227   : > { %7146 = vmatprep.mubr.bf16.mxu0 %v11838_v51 }
 0x228   : > { %v1815_v21 = vpop.f32.mrf.mxu1  ;;  %7147 = vmatmul.mubr.bf16.vlgmr.msra.gmra.mxu0 %v11840_v4 }
 0x229   : > { %7158 = vmatpush1.bf16.msra.mxu0 %v9940_v16  ;;  %v10008_v16 = vld [vmem:[#allocation4 + $0x380] ss:$16 sps:$4 sm:$0xff]  }
 0x22a   : > { %v11846_v10 = vpop.f32.mrf.mxu1  ;;  %7159 = vmatprep.subr.bf16.mxu0 %v9949_v50  ;;  %v10011_v50 = vld [vmem:[#allocation4 + $0x800] ss:$16 sps:$4 sm:$0xff]  }
 0x22c   : > { %v1819_v53 = vpop.f32.mrf.mxu1 }
 0x22d   : > { %v11848_v43 = vpack.c.bf16 %v1819_v53, %v1815_v21  ;;  %7160 = vmatpush1.bf16.msra.mxu0 %v9947_v32  ;;  %v10016_v21 = vld [vmem:[#allocation4 + $0x364] ss:$16 sps:$4 sm:$0xff]   ;;  %v10014_v53 = vld [vmem:[#allocation4 + $0x360] ss:$16 sps:$4 sm:$0xff]  }
 0x22e   : > { %v1823_v60 = vpop.f32.mrf.mxu1  ;;  %7161 = vmatprep.subr.bf16.mxu0 %v9955_v52  ;;  %v10019_v32 = vld [vmem:[#allocation4 + $0x9e4] ss:$16 sps:$4 sm:$0xff]  }
 0x22f   : > { %7189 = vmatprep.mubr.bf16.mxu0 %v11848_v43 }
 0x230   : > { %v1825_v28 = vpop.f32.mrf.mxu1 }
 0x231   : > { %7162 = vmatpush1.bf16.msra.mxu0 %v9953_v54  ;;  %v10017_v54 = vld [vmem:[#allocation4 + $0x9e0] ss:$16 sps:$4 sm:$0xff]  }
 0x232   : > { %v1827_v27 = vpop.f32.mrf.mxu1  ;;  %7163 = vmatprep.subr.bf16.mxu0 %v9962_v55  ;;  %v10025_v55 = vld [vmem:[#allocation4 + $0x9c4] ss:$16 sps:$4 sm:$0xff]  }
 0x233   : > { %v11851_v29 = vpack.c.bf16 %v1827_v27, %v1823_v60  ;;  %v10022_v60 = vld [vmem:[#allocation4 + $0x344] ss:$16 sps:$4 sm:$0xff]   ;;  %v10023_v27 = vld [vmem:[#allocation4 + $0x9c0] ss:$16 sps:$4 sm:$0xff]  }
 0x234   : > { %v1829_v57 = vpop.f32.mrf.mxu1 }
 0x235   : > { %v11853_v58 = vpack.c.bf16 %v1829_v57, %v1825_v28  ;;  %7164 = vmatpush1.bf16.msra.mxu0 %v9960_v34  ;;  %v10020_v34 = vld [vmem:[#allocation4 + $0x340] ss:$16 sps:$4 sm:$0xff]   ;;  %v10031_v57 = vld [vmem:[#allocation4 + $0x9a4] ss:$16 sps:$4 sm:$0xff]  }
 0x236   : > { %7165 = vmatprep.subr.bf16.mxu0 %v9968_v56  ;;  %v1833_v23 = vpop.f32.mrf.mxu1  ;;  %v10028_v56 = vld [vmem:[#allocation4 + $0x324] ss:$16 sps:$4 sm:$0xff]  }
 0x237   : > { %7232 = vmatprep.mubr.bf16.mxu1 %v11853_v58 }
 0x238   : > { %7233 = vmatmul.mubr.bf16.vlgmr.msra.gmra.mxu1 %v11851_v29  ;;  %v11857_v0 = vpop.f32.mrf.mxu1 }
 0x239   : > { %7166 = vmatpush1.bf16.msra.mxu0 %v9966_v59  ;;  %7287 = vmatpush1.bf16.msra.mxu1 %v9969_v61  ;;  %v10026_v61 = vld [vmem:[#allocation4 + $0x320] ss:$16 sps:$4 sm:$0xff]  }
 0x23a   : > { %7167 = vmatprep.subr.bf16.mxu0 %v9974_v62  ;;  %7288 = vmatprep.subr.bf16.mxu1 %v9977_v63  ;;  %v1837_v22 = vpop.f32.mrf.mxu1  ;;  %v10029_v62 = vld [vmem:[#allocation4 + $0x9a0] ss:$16 sps:$4 sm:$0xff]   ;;  %v10034_v63 = vld [vmem:[#allocation4 + $0x304] ss:$16 sps:$4 sm:$0xff]  }
 0x23b   : > { %v11859_v6 = vpack.c.bf16 %v1837_v22, %v1833_v23  ;;  %v10037_v23 = vld [vmem:[#allocation4 + $0x984] ss:$16 sps:$4 sm:$0xff]  }
 0x23c   : > { %v11861_v7 = vpop.f32.mrf.mxu1  ;;  %v10040_v22 = vld [vmem:[#allocation4 + $0x6e4] ss:$16 sps:$4 sm:$0xff]  }
 0x23d   : > { %7168 = vmatpush1.bf16.msra.mxu0 %v9972_v1  ;;  %7289 = vmatpush1.bf16.msra.mxu1 %v9975_v26  ;;  %v10032_v26 = vld [vmem:[#allocation4 + $0x300] ss:$16 sps:$4 sm:$0xff]  }
 0x23e   : > { %7169 = vmatprep.subr.bf16.mxu0 %v9980_v2  ;;  %7290 = vmatprep.subr.bf16.mxu1 %v9983_v3  ;;  %v11863_v11 = vpop.f32.mrf.mxu1  ;;  %v10035_v2 = vld [vmem:[#allocation4 + $0x980] ss:$16 sps:$4 sm:$0xff]  }
 0x240   : > { %v1845_v12 = vpop.f32.mrf.mxu1 }
 0x241   : > { %7170 = vmatpush1.bf16.msra.mxu0 %v9978_v24  ;;  %7291 = vmatpush1.bf16.msra.mxu1 %v9981_v5  ;;  %v10043_v24 = vld [vmem:[#allocation4 + $0x964] ss:$16 sps:$4 sm:$0xff]  }
 0x242   : > { %7171 = vmatprep.subr.bf16.mxu0 %v9986_v8  ;;  %7292 = vmatprep.subr.bf16.mxu1 %v9989_v9  ;;  %v11865_v18 = vpop.f32.mrf.mxu1  ;;  %v10038_v8 = vld [vmem:[#allocation4 + $0x6e0] ss:$16 sps:$4 sm:$0xff]  }
 0x243   : > { %v10041_v9 = vld [vmem:[#allocation4 + $0x960] ss:$16 sps:$4 sm:$0xff]  }
 0x244   : > { %v1849_v19 = vpop.f32.mrf.mxu1 }
 0x245   : > { %7172 = vmatpush1.bf16.msra.mxu0 %v9984_v13  ;;  %7293 = vmatpush1.bf16.msra.mxu1 %v9987_v14  ;;  %v11867_v30 = vpack.c.bf16 %v1849_v19, %v1845_v12  ;;  %v11888_v13 = vpack.c.bf16 %v11846_v10, %v11842_v37  ;;  %v10046_v14 = vld [vmem:[#allocation4 + $0x6c4] ss:$16 sps:$4 sm:$0xff]   ;;  %v11894_v19 = vpack.c.bf16 %v11861_v7, %v11857_v0  ;;  %v10050_v0 = vld [vmem:[#allocation4 + $0x6a0] ss:$16 sps:$4 sm:$0xff]  }
 0x246   : > { %7173 = vmatprep.subr.bf16.mxu0 %v9992_v15  ;;  %7294 = vmatprep.subr.bf16.mxu1 %v9995_v17  ;;  %v1853_v35 = vpop.f32.mrf.mxu1  ;;  %v10049_v15 = vld [vmem:[#allocation4 + $0x944] ss:$16 sps:$4 sm:$0xff]   ;;  %v10053_v7 = vld [vmem:[#allocation4 + $0x920] ss:$16 sps:$4 sm:$0xff]  }
 0x247   : > { %7318 = vmatprep.mubr.bf16.mxu1 %v11867_v30  ;;  %v10052_v10 = vld [vmem:[#allocation4 + $0x6a4] ss:$16 sps:$4 sm:$0xff]  }
 0x248   : > { %v11870_v36 = vpop.f32.mrf.mxu1 }
 0x249   : > { %7174 = vmatpush2.bf16.msra.mxu0 %v9990_v20  ;;  %7295 = vmatpush1.bf16.msra.mxu1 %v9993_v25  ;;  %v10044_v25 = vld [vmem:[#allocation4 + $0x6c0] ss:$16 sps:$4 sm:$0xff]  }
 0x24a   : > { %7175 = vmatprep.subr.bf16.mxu0 %v9998_v31  ;;  %7296 = vmatprep.subr.bf16.mxu1 %v10001_v33  ;;  %v1857_v42 = vpop.f32.mrf.mxu1  ;;  %v10047_v31 = vld [vmem:[#allocation4 + $0x940] ss:$16 sps:$4 sm:$0xff]   ;;  %v10055_v33 = vld [vmem:[#allocation4 + $0x924] ss:$16 sps:$4 sm:$0xff]  }
 0x24b   : > { %v11872_v44 = vpack.c.bf16 %v1857_v42, %v1853_v35  ;;  %v10056_v42 = vld [vmem:[#allocation4 + $0x680] ss:$16 sps:$4 sm:$0xff]  }
 0x24c   : > { %v11874_v49 = vpop.f32.mrf.mxu1 }
 0x24d   : > { %7176 = vmatpush2.bf16.msra.mxu0 %v9996_v38  ;;  %7297 = vmatpush1.bf16.msra.mxu1 %v9999_v39  ;;  %v10058_v39 = vld [vmem:[#allocation4 + $0x684] ss:$16 sps:$4 sm:$0xff]  }
 0x24e   : > { %7177 = vmatprep.subr.bf16.mxu0 %v10004_v40  ;;  %7298 = vmatprep.subr.bf16.mxu1 %v10007_v41  ;;  %v11876_v52 = vpop.f32.mrf.mxu1  ;;  %v10061_v40 = vld [vmem:[#allocation4 + $0x904] ss:$16 sps:$4 sm:$0xff]  }
 0x250   : > { %v11878_v28 = vpop.f32.mrf.mxu1 }
 0x251   : > { %7178 = vmatpush2.bf16.msra.mxu0 %v10002_v45  ;;  %7299 = vmatpush1.bf16.msra.mxu1 %v10005_v46  ;;  %v10059_v45 = vld [vmem:[#allocation4 + $0x900] ss:$16 sps:$4 sm:$0xff]  }
 0x252   : > { %7179 = vmatprep.subr.bf16.mxu0 %v10010_v47  ;;  %7300 = vmatprep.subr.bf16.mxu1 %v10013_v48  ;;  %v11880_v59 = vpop.f32.mrf.mxu1  ;;  %v10064_v47 = vld [vmem:[#allocation4 + $0x664] ss:$16 sps:$4 sm:$0xff]  }
 0x253   : > { %v10067_v48 = vld [vmem:[#allocation4 + $0xce4] ss:$16 sps:$4 sm:$0xff]  }
 0x254   : > { %v11882_v1 = vpop.f32.mrf.mxu1 }
 0x255   : > { %7180 = vmatpush2.bf16.msra.mxu0 %v10008_v16  ;;  %7301 = vmatpush1.bf16.msra.mxu1 %v10011_v50  ;;  %v11912_v50 = vpack.c.bf16 %v11865_v18, %v11863_v11  ;;  %v10068_v11 = vld [vmem:[#allocation4 + $0x640] ss:$16 sps:$4 sm:$0xff]  }
 0x256   : > { %7181 = vmatprep.subr.bf16.mxu0 %v10016_v21  ;;  %7302 = vmatprep.subr.bf16.mxu1 %v10019_v32  ;;  %v1873_v3 = vpop.f32.mrf.mxu1  ;;  %v10062_v21 = vld [vmem:[#allocation4 + $0x660] ss:$16 sps:$4 sm:$0xff]  }
 0x257   : > { %v10065_v32 = vld [vmem:[#allocation4 + $0xce0] ss:$16 sps:$4 sm:$0xff]  }
 0x258   : > { %v11884_v5 = vpop.f32.mrf.mxu1  ;;  %v10071_v18 = vld [vmem:[#allocation4 + $0xcc0] ss:$16 sps:$4 sm:$0xff]  }
 0x259   : > { %7182 = vmatpush2.bf16.msra.mxu0 %v10014_v53  ;;  %7303 = vmatpush2.bf16.msra.mxu1 %v10017_v54  ;;  %v10070_v54 = vld [vmem:[#allocation4 + $0x644] ss:$16 sps:$4 sm:$0xff]  }
 0x25a   : > { %7183 = vmatprep.subr.bf16.mxu0 %v10022_v60  ;;  %7304 = vmatprep.subr.bf16.mxu1 %v10025_v55  ;;  %v1877_v12 = vpop.f32.mrf.mxu1  ;;  %v10073_v60 = vld [vmem:[#allocation4 + $0xcc4] ss:$16 sps:$4 sm:$0xff]  }
 0x25b   : > { %v11890_v17 = vpack.c.bf16 %v1877_v12, %v1873_v3  ;;  %v10080_v3 = vld [vmem:[#allocation4 + $0x600] ss:$16 sps:$4 sm:$0xff]  }
 0x25c   : > { %v11896_v20 = vpop.f32.mrf.mxu1 }
 0x25d   : > { %7184 = vmatpush2.bf16.msra.mxu0 %v10020_v34  ;;  %7305 = vmatpush2.bf16.msra.mxu1 %v10023_v27  ;;  %v11918_v34 = vpack.c.bf16 %v11882_v1, %v11878_v28  ;;  %v10074_v28 = vld [vmem:[#allocation4 + $0x620] ss:$16 sps:$4 sm:$0xff]   ;;  %v10082_v1 = vld [vmem:[#allocation4 + $0x604] ss:$16 sps:$4 sm:$0xff]  }
 0x25e   : > { %7185 = vmatprep.subr.bf16.mxu0 %v10028_v56  ;;  %7306 = vmatprep.subr.bf16.mxu1 %v10031_v57  ;;  %v11899_v37 = vpop.f32.mrf.mxu1  ;;  %v10076_v57 = vld [vmem:[#allocation4 + $0x624] ss:$16 sps:$4 sm:$0xff]  }
 0x260   : > { %v11902_v35 = vpop.f32.mrf.mxu1 }
 0x261   : > { %7186 = vmatpush2.bf16.msra.mxu0 %v10026_v61  ;;  %7307 = vmatpush2.bf16.msra.mxu1 %v10029_v62  ;;  %v10079_v61 = vld [vmem:[#allocation4 + $0xca4] ss:$16 sps:$4 sm:$0xff]  }
 0x262   : > { %7187 = vmatprep.subr.bf16.mxu0 %v10034_v63  ;;  %7308 = vmatprep.subr.bf16.mxu1 %v10037_v23  ;;  %v11904_v38 = vpop.f32.mrf.mxu1  ;;  %v10077_v63 = vld [vmem:[#allocation4 + $0xca0] ss:$16 sps:$4 sm:$0xff]  }
 0x264   : > { %v11906_v41 = vpop.f32.mrf.mxu1 }
 0x265   : > { %7188 = vmatpush2.bf16.msra.mxu0 %v10032_v26  ;;  %7309 = vmatpush2.bf16.msra.mxu1 %v10035_v2  ;;  %v10085_v26 = vld [vmem:[#allocation4 + $0xc84] ss:$16 sps:$4 sm:$0xff]  }
 0x266   : > { %7243 = vmatprep.subr.bf16.mxu0 %v10040_v22  ;;  %7310 = vmatprep.subr.bf16.mxu1 %v10043_v24  ;;  %v1893_v46 = vpop.f32.mrf.mxu1  ;;  %v10083_v22 = vld [vmem:[#allocation4 + $0xc80] ss:$16 sps:$4 sm:$0xff]  }
 0x268   : > { %7190 = vmatmul.mubr.bf16.vlgmr.msra.gmra.mxu0 %v11888_v13  ;;  %v11908_v16 = vpop.f32.mrf.mxu1 }
 0x269   : > { %7244 = vmatpush1.bf16.msra.mxu0 %v10038_v8  ;;  %7311 = vmatpush2.bf16.msra.mxu1 %v10041_v9  ;;  %v10088_v8 = vld [vmem:[#allocation4 + $0x7e4] ss:$16 sps:$4 sm:$0xff]  }
 0x26a   : > { %7245 = vmatprep.subr.bf16.mxu0 %v10046_v14  ;;  %7312 = vmatprep.subr.bf16.mxu1 %v10049_v15  ;;  %v1897_v53 = vpop.f32.mrf.mxu1  ;;  %v10091_v9 = vld [vmem:[#allocation4 + $0xc64] ss:$16 sps:$4 sm:$0xff]   ;;  %v10086_v14 = vld [vmem:[#allocation4 + $0x7e0] ss:$16 sps:$4 sm:$0xff]  }
 0x26b   : > { %7275 = vmatprep.mubr.bf16.mxu0 %v11894_v19  ;;  %v11914_v55 = vpack.c.bf16 %v1897_v53, %v1893_v46  ;;  %v10089_v15 = vld [vmem:[#allocation4 + $0xc60] ss:$16 sps:$4 sm:$0xff]   ;;  %v10109_v53 = vld [vmem:[#allocation4 + $0xc04] ss:$16 sps:$4 sm:$0xff]  }
 0x26c   : > { %v11920_v27 = vpop.f32.mrf.mxu1 }
 0x26d   : > { %7246 = vmatpush1.bf16.msra.mxu0 %v10044_v25  ;;  %7313 = vmatpush2.bf16.msra.mxu1 %v10047_v31  ;;  %v10094_v31 = vld [vmem:[#allocation4 + $0x7c4] ss:$16 sps:$4 sm:$0xff]  }
 0x26e   : > { %7247 = vmatprep.subr.bf16.mxu0 %v10052_v10  ;;  %7314 = vmatprep.subr.bf16.mxu1 %v10055_v33  ;;  %v11923_v56 = vpop.f32.mrf.mxu1  ;;  %v10097_v10 = vld [vmem:[#allocation4 + $0xc44] ss:$16 sps:$4 sm:$0xff]  }
 0x270   : > { %v11926_v62 = vpop.f32.mrf.mxu1 }
 0x271   : > { %7248 = vmatpush1.bf16.msra.mxu0 %v10050_v0  ;;  %7315 = vmatpush2.bf16.msra.mxu1 %v10053_v7  ;;  %v10092_v7 = vld [vmem:[#allocation4 + $0x7c0] ss:$16 sps:$4 sm:$0xff]  }
 0x272   : > { %7249 = vmatprep.subr.bf16.mxu0 %v10058_v39  ;;  %7316 = vmatprep.subr.bf16.mxu1 %v10061_v40  ;;  %v11928_v23 = vpop.f32.mrf.mxu1  ;;  %v10095_v39 = vld [vmem:[#allocation4 + $0xc40] ss:$16 sps:$4 sm:$0xff]  }
 0x274   : > { %v11930_v2 = vpop.f32.mrf.mxu1 }
 0x275   : > { %7250 = vmatpush1.bf16.msra.mxu0 %v10056_v42  ;;  %7317 = vmatpush2.bf16.msra.mxu1 %v10059_v45  ;;  %v10100_v42 = vld [vmem:[#allocation4 + $0x7a4] ss:$16 sps:$4 sm:$0xff]  }
 0x276   : > { %7251 = vmatprep.subr.bf16.mxu0 %v10064_v47  ;;  %7372 = vmatprep.subr.bf16.mxu1 %v10067_v48  ;;  %v1913_v24 = vpop.f32.mrf.mxu1  ;;  %v10103_v45 = vld [vmem:[#allocation4 + $0xc24] ss:$16 sps:$4 sm:$0xff]   ;;  %v10098_v47 = vld [vmem:[#allocation4 + $0x7a0] ss:$16 sps:$4 sm:$0xff]  }
 0x277   : > { %v10101_v48 = vld [vmem:[#allocation4 + $0xc20] ss:$16 sps:$4 sm:$0xff]  }
 0x278   : > { %7319 = vmatmul.mubr.bf16.vlgmr.msra.gmra.mxu1 %v11912_v50  ;;  %v11932_v12 = vpop.f32.mrf.mxu1 }
 0x279   : > { %7252 = vmatpush1.bf16.msra.mxu0 %v10062_v21  ;;  %7373 = vmatpush1.bf16.msra.mxu1 %v10065_v32  ;;  %v10106_v32 = vld [vmem:[#allocation4 + $0x784] ss:$16 sps:$4 sm:$0xff]  }
 0x27a   : > { %7253 = vmatprep.subr.bf16.mxu0 %v10070_v54  ;;  %7374 = vmatprep.subr.bf16.mxu1 %v10073_v60  ;;  %v1917_v25 = vpop.f32.mrf.mxu1 }
 0x27b   : > { %7404 = vmatprep.mubr.bf16.mxu1 %v11918_v34  ;;  %v11934_v33 = vpack.c.bf16 %v1917_v25, %v1913_v24  ;;  %v10121_v24 = vld [vmem:[#allocation4 + $0xdc4] ss:$16 sps:$4 sm:$0xff]  }
 0x27c   : > { %v11936_v0 = vpop.f32.mrf.mxu1 }
 0x27d   : > { %7254 = vmatpush1.bf16.msra.mxu0 %v10068_v11  ;;  %7375 = vmatpush1.bf16.msra.mxu1 %v10071_v18  ;;  %v10104_v11 = vld [vmem:[#allocation4 + $0x780] ss:$16 sps:$4 sm:$0xff]  }
 0x27e   : > { %7255 = vmatprep.subr.bf16.mxu0 %v10076_v57  ;;  %7376 = vmatprep.subr.bf16.mxu1 %v10079_v61  ;;  %v1923_v40 = vpop.f32.mrf.mxu1  ;;  %v10107_v18 = vld [vmem:[#allocation4 + $0xc00] ss:$16 sps:$4 sm:$0xff]   ;;  %v10112_v61 = vld [vmem:[#allocation4 + $0x764] ss:$16 sps:$4 sm:$0xff]  }
 0x280   : > { %v11938_v46 = vpop.f32.mrf.mxu1 }
 0x281   : > { %7256 = vmatpush1.bf16.msra.mxu0 %v10074_v28  ;;  %7377 = vmatpush1.bf16.msra.mxu1 %v10077_v63  ;;  %v10115_v28 = vld [vmem:[#allocation4 + $0xde4] ss:$16 sps:$4 sm:$0xff]  }
 0x282   : > { %7257 = vmatprep.subr.bf16.mxu0 %v10082_v1  ;;  %7378 = vmatprep.subr.bf16.mxu1 %v10085_v26  ;;  %v1927_v21 = vpop.f32.mrf.mxu1  ;;  %v10110_v1 = vld [vmem:[#allocation4 + $0x760] ss:$16 sps:$4 sm:$0xff]  }
 0x283   : > { %v11940_v54 = vpack.c.bf16 %v1927_v21, %v1923_v40  ;;  %v10113_v26 = vld [vmem:[#allocation4 + $0xde0] ss:$16 sps:$4 sm:$0xff]  }
 0x284   : > { %v11942_v60 = vpop.f32.mrf.mxu1  ;;  %v10125_v40 = vld [vmem:[#allocation4 + $0xda0] ss:$16 sps:$4 sm:$0xff]  }
 0x285   : > { %7258 = vmatpush1.bf16.msra.mxu0 %v10080_v3  ;;  %7379 = vmatpush1.bf16.msra.mxu1 %v10083_v22  ;;  %v10118_v22 = vld [vmem:[#allocation4 + $0x744] ss:$16 sps:$4 sm:$0xff]  }
 0x286   : > { %7259 = vmatprep.subr.bf16.mxu0 %v10088_v8  ;;  %7380 = vmatprep.subr.bf16.mxu1 %v10091_v9  ;;  %v1933_v57 = vpop.f32.mrf.mxu1 }
 0x288   : > { %v11944_v63 = vpop.f32.mrf.mxu1 }
 0x289   : > { %7260 = vmatpush2.bf16.msra.mxu0 %v10086_v14  ;;  %7381 = vmatpush1.bf16.msra.mxu1 %v10089_v15  ;;  %v10116_v14 = vld [vmem:[#allocation4 + $0x740] ss:$16 sps:$4 sm:$0xff]  }
 0x28a   : > { %7261 = vmatprep.subr.bf16.mxu0 %v10094_v31  ;;  %7382 = vmatprep.subr.bf16.mxu1 %v10097_v10  ;;  %v1937_v3 = vpop.f32.mrf.mxu1  ;;  %v10119_v15 = vld [vmem:[#allocation4 + $0xdc0] ss:$16 sps:$4 sm:$0xff]   ;;  %v10124_v31 = vld [vmem:[#allocation4 + $0x724] ss:$16 sps:$4 sm:$0xff]  }
 0x28b   : > { %v11946_v8 = vpack.c.bf16 %v1937_v3, %v1933_v57  ;;  %v10127_v10 = vld [vmem:[#allocation4 + $0xda4] ss:$16 sps:$4 sm:$0xff]  }
 0x28c   : > { %v11948_v9 = vpop.f32.mrf.mxu1  ;;  %v10139_v57 = vld [vmem:[#allocation4 + $0xd64] ss:$16 sps:$4 sm:$0xff]  }
 0x28d   : > { %7262 = vmatpush2.bf16.msra.mxu0 %v10092_v7  ;;  %7383 = vmatpush1.bf16.msra.mxu1 %v10095_v39  ;;  %v10122_v39 = vld [vmem:[#allocation4 + $0x720] ss:$16 sps:$4 sm:$0xff]   ;;  %v10142_v3 = vld [vmem:[#allocation4 + $0xac4] ss:$16 sps:$4 sm:$0xff]  }
 0x28e   : > { %7263 = vmatprep.subr.bf16.mxu0 %v10100_v42  ;;  %7384 = vmatprep.subr.bf16.mxu1 %v10103_v45  ;;  %v1943_v25 = vpop.f32.mrf.mxu1  ;;  %v10130_v45 = vld [vmem:[#allocation4 + $0x704] ss:$16 sps:$4 sm:$0xff]  }
 0x290   : > { %v11950_v7 = vpop.f32.mrf.mxu1 }
 0x291   : > { %7264 = vmatpush2.bf16.msra.mxu0 %v10098_v47  ;;  %7385 = vmatpush1.bf16.msra.mxu1 %v10101_v48  ;;  %v10133_v47 = vld [vmem:[#allocation4 + $0xd84] ss:$16 sps:$4 sm:$0xff]  }
 0x292   : > { %7265 = vmatprep.subr.bf16.mxu0 %v10106_v32  ;;  %7386 = vmatprep.subr.bf16.mxu1 %v10109_v53  ;;  %v1947_v42 = vpop.f32.mrf.mxu1  ;;  %v10128_v32 = vld [vmem:[#allocation4 + $0x700] ss:$16 sps:$4 sm:$0xff]  }
 0x293   : > { %v11952_v48 = vpack.c.bf16 %v1947_v42, %v1943_v25  ;;  %v10131_v53 = vld [vmem:[#allocation4 + $0xd80] ss:$16 sps:$4 sm:$0xff]  }
 0x294   : > { %v11954_v21 = vpop.f32.mrf.mxu1  ;;  %v10143_v25 = vld [vmem:[#allocation4 + $0xd40] ss:$16 sps:$4 sm:$0xff]  }
 0x295   : > { %7266 = vmatpush2.bf16.msra.mxu0 %v10104_v11  ;;  %7387 = vmatpush1.bf16.msra.mxu1 %v10107_v18  ;;  %v10136_v18 = vld [vmem:[#allocation4 + $0xae4] ss:$16 sps:$4 sm:$0xff]   ;;  %v10152_v42 = vld [vmem:[#allocation4 + $0xa80] ss:$16 sps:$4 sm:$0xff]  }
 0x296   : > { %7267 = vmatprep.subr.bf16.mxu0 %v10112_v61  ;;  %7388 = vmatprep.subr.bf16.mxu1 %v10115_v28  ;;  %v1953_v11 = vpop.f32.mrf.mxu1  ;;  %v10134_v28 = vld [vmem:[#allocation4 + $0xae0] ss:$16 sps:$4 sm:$0xff]  }
 0x298   : > { %v11956_v61 = vpop.f32.mrf.mxu1 }
 0x299   : > { %7268 = vmatpush2.bf16.msra.mxu0 %v10110_v1  ;;  %7389 = vmatpush2.bf16.msra.mxu1 %v10113_v26  ;;  %v10137_v1 = vld [vmem:[#allocation4 + $0xd60] ss:$16 sps:$4 sm:$0xff]  }
 0x29a   : > { %7269 = vmatprep.subr.bf16.mxu0 %v10118_v22  ;;  %7390 = vmatprep.subr.bf16.mxu1 %v10121_v24  ;;  %v1957_v26 = vpop.f32.mrf.mxu1  ;;  %v10145_v22 = vld [vmem:[#allocation4 + $0xd44] ss:$16 sps:$4 sm:$0xff]  }
 0x29b   : > { %v11958_v24 = vpack.c.bf16 %v1957_v26, %v1953_v11  ;;  %v10158_v11 = vld [vmem:[#allocation4 + $0xa60] ss:$16 sps:$4 sm:$0xff]  }
 0x29c   : > { %v10164_v26 = vld [vmem:[#allocation4 + $0xa40] ss:$16 sps:$4 sm:$0xff]  }
 0x29d   : > { %7270 = vmatpush2.bf16.msra.mxu0 %v10116_v14  ;;  %7391 = vmatpush2.bf16.msra.mxu1 %v10119_v15  ;;  %v11962_v14 = vpack.c.bf16 %v11874_v49, %v11870_v36  ;;  %v10140_v15 = vld [vmem:[#allocation4 + $0xac0] ss:$16 sps:$4 sm:$0xff]   ;;  %v10154_v36 = vld [vmem:[#allocation4 + $0xa84] ss:$16 sps:$4 sm:$0xff]  }
 0x29e   : > { %7271 = vmatprep.subr.bf16.mxu0 %v10124_v31  ;;  %7392 = vmatprep.subr.bf16.mxu1 %v10127_v10  ;;  %v10148_v31 = vld [vmem:[#allocation4 + $0xaa4] ss:$16 sps:$4 sm:$0xff]  }
 0x29f   : > { %v10151_v10 = vld [vmem:[#allocation4 + $0xd24] ss:$16 sps:$4 sm:$0xff]  }
 0x2a0   : > { %v10157_v49 = vld [vmem:[#allocation4 + $0xd04] ss:$16 sps:$4 sm:$0xff]  }
 0x2a1   : > { %7272 = vmatpush2.bf16.msra.mxu0 %v10122_v39  ;;  %7393 = vmatpush2.bf16.msra.mxu1 %v10125_v40  ;;  %v10146_v39 = vld [vmem:[#allocation4 + $0xaa0] ss:$16 sps:$4 sm:$0xff]  }
 0x2a2   : > { %7273 = vmatprep.subr.bf16.mxu0 %v10130_v45  ;;  %7394 = vmatprep.subr.bf16.mxu1 %v10133_v47  ;;  %v10149_v40 = vld [vmem:[#allocation4 + $0xd20] ss:$16 sps:$4 sm:$0xff]   ;;  %v10160_v47 = vld [vmem:[#allocation4 + $0xa64] ss:$16 sps:$4 sm:$0xff]  }
 0x2a3   : > { %v10155_v45 = vld [vmem:[#allocation4 + $0xd00] ss:$16 sps:$4 sm:$0xff]  }
 0x2a5   : > { %7274 = vmatpush2.bf16.msra.mxu0 %v10128_v32  ;;  %7395 = vmatpush2.bf16.msra.mxu1 %v10131_v53  ;;  %v10163_v32 = vld [vmem:[#allocation4 + $0x10e4] ss:$16 sps:$4 sm:$0xff]   ;;  %v11968_v53 = vpack.c.bf16 %v11880_v59, %v11876_v52 }
 0x2a6   : > { %7329 = vmatprep.subr.bf16.mxu0 %v10136_v18  ;;  %7396 = vmatprep.subr.bf16.mxu1 %v10139_v57  ;;  %v10161_v18 = vld [vmem:[#allocation4 + $0x10e0] ss:$16 sps:$4 sm:$0xff]   ;;  %v10166_v57 = vld [vmem:[#allocation4 + $0xa44] ss:$16 sps:$4 sm:$0xff]  }
 0x2a7   : > { %v10172_v52 = vld [vmem:[#allocation4 + $0xa24] ss:$16 sps:$4 sm:$0xff]  }
 0x2a8   : > { %7276 = vmatmul.mubr.bf16.vlgmr.msra.gmra.mxu0 %v11859_v6  ;;  %v10175_v59 = vld [vmem:[#allocation4 + $0x10a4] ss:$16 sps:$4 sm:$0xff]  }
 0x2a9   : > { %7330 = vmatpush1.bf16.msra.mxu0 %v10134_v28  ;;  %7397 = vmatpush2.bf16.msra.mxu1 %v10137_v1  ;;  %v10169_v28 = vld [vmem:[#allocation4 + $0x10c4] ss:$16 sps:$4 sm:$0xff]   ;;  %v11972_v1 = vpack.c.bf16 %v11906_v41, %v11902_v35 }
 0x2aa   : > { %7331 = vmatprep.subr.bf16.mxu0 %v10142_v3  ;;  %7398 = vmatprep.subr.bf16.mxu1 %v10145_v22  ;;  %v10167_v3 = vld [vmem:[#allocation4 + $0x10c0] ss:$16 sps:$4 sm:$0xff]   ;;  %v10178_v35 = vld [vmem:[#allocation4 + $0xa04] ss:$16 sps:$4 sm:$0xff]  }
 0x2ab   : > { %7361 = vmatprep.mubr.bf16.mxu0 %v11962_v14  ;;  %v10170_v22 = vld [vmem:[#allocation4 + $0xa20] ss:$16 sps:$4 sm:$0xff]   ;;  %v10181_v41 = vld [vmem:[#allocation4 + $0x1084] ss:$16 sps:$4 sm:$0xff]  }
 0x2ad   : > { %7332 = vmatpush1.bf16.msra.mxu0 %v10140_v15  ;;  %7399 = vmatpush2.bf16.msra.mxu1 %v10143_v25  ;;  %v10173_v15 = vld [vmem:[#allocation4 + $0x10a0] ss:$16 sps:$4 sm:$0xff]  }
 0x2ae   : > { %7333 = vmatprep.subr.bf16.mxu0 %v10148_v31  ;;  %7400 = vmatprep.subr.bf16.mxu1 %v10151_v10  ;;  %v10176_v25 = vld [vmem:[#allocation4 + $0xa00] ss:$16 sps:$4 sm:$0xff]   ;;  %v10184_v10 = vld [vmem:[#allocation4 + $0xbe4] ss:$16 sps:$4 sm:$0xff]  }
 0x2af   : > { %v10179_v31 = vld [vmem:[#allocation4 + $0x1080] ss:$16 sps:$4 sm:$0xff]  }
 0x2b1   : > { %7334 = vmatpush1.bf16.msra.mxu0 %v10146_v39  ;;  %7401 = vmatpush2.bf16.msra.mxu1 %v10149_v40  ;;  %v10187_v39 = vld [vmem:[#allocation4 + $0x1064] ss:$16 sps:$4 sm:$0xff]   ;;  %v10182_v40 = vld [vmem:[#allocation4 + $0xbe0] ss:$16 sps:$4 sm:$0xff]  }
 0x2b2   : > { %7335 = vmatprep.subr.bf16.mxu0 %v10154_v36  ;;  %7402 = vmatprep.subr.bf16.mxu1 %v10157_v49  ;;  %v10185_v36 = vld [vmem:[#allocation4 + $0x1060] ss:$16 sps:$4 sm:$0xff]   ;;  %v10190_v49 = vld [vmem:[#allocation4 + $0xbc4] ss:$16 sps:$4 sm:$0xff]  }
 0x2b5   : > { %7336 = vmatpush1.bf16.msra.mxu0 %v10152_v42  ;;  %7403 = vmatpush2.bf16.msra.mxu1 %v10155_v45  ;;  %v10193_v42 = vld [vmem:[#allocation4 + $0x1044] ss:$16 sps:$4 sm:$0xff]   ;;  %v10188_v45 = vld [vmem:[#allocation4 + $0xbc0] ss:$16 sps:$4 sm:$0xff]  }
 0x2b6   : > { %7337 = vmatprep.subr.bf16.mxu0 %v10160_v47  ;;  %7458 = vmatprep.subr.bf16.mxu1 %v10163_v32  ;;  %v10191_v47 = vld [vmem:[#allocation4 + $0x1040] ss:$16 sps:$4 sm:$0xff]   ;;  %v10196_v32 = vld [vmem:[#allocation4 + $0xba4] ss:$16 sps:$4 sm:$0xff]  }
 0x2b8   : > { %7405 = vmatmul.mubr.bf16.vlgmr.msra.gmra.mxu1 %v11968_v53 }
 0x2b9   : > { %7338 = vmatpush1.bf16.msra.mxu0 %v10158_v11  ;;  %7459 = vmatpush1.bf16.msra.mxu1 %v10161_v18  ;;  %v10199_v11 = vld [vmem:[#allocation4 + $0x1024] ss:$16 sps:$4 sm:$0xff]   ;;  %v10194_v18 = vld [vmem:[#allocation4 + $0xba0] ss:$16 sps:$4 sm:$0xff]  }
 0x2ba   : > { %7339 = vmatprep.subr.bf16.mxu0 %v10166_v57  ;;  %7460 = vmatprep.subr.bf16.mxu1 %v10169_v28  ;;  %v10197_v57 = vld [vmem:[#allocation4 + $0x1020] ss:$16 sps:$4 sm:$0xff]   ;;  %v10202_v28 = vld [vmem:[#allocation4 + $0xb84] ss:$16 sps:$4 sm:$0xff]  }
 0x2bb   : > { %7490 = vmatprep.mubr.bf16.mxu1 %v11972_v1 }
 0x2bd   : > { %7340 = vmatpush1.bf16.msra.mxu0 %v10164_v26  ;;  %7461 = vmatpush1.bf16.msra.mxu1 %v10167_v3  ;;  %v10205_v26 = vld [vmem:[#allocation4 + $0x1004] ss:$16 sps:$4 sm:$0xff]   ;;  %v10200_v3 = vld [vmem:[#allocation4 + $0xb80] ss:$16 sps:$4 sm:$0xff]  }
 0x2be   : > { %7341 = vmatprep.subr.bf16.mxu0 %v10172_v52  ;;  %7462 = vmatprep.subr.bf16.mxu1 %v10175_v59  ;;  %v10203_v52 = vld [vmem:[#allocation4 + $0x1000] ss:$16 sps:$4 sm:$0xff]   ;;  %v10208_v59 = vld [vmem:[#allocation4 + $0xb64] ss:$16 sps:$4 sm:$0xff]  }
 0x2c1   : > { %7342 = vmatpush1.bf16.msra.mxu0 %v10170_v22  ;;  %7463 = vmatpush1.bf16.msra.mxu1 %v10173_v15  ;;  %v10211_v22 = vld [vmem:[#allocation4 + $0x11e4] ss:$16 sps:$4 sm:$0xff]   ;;  %v10206_v15 = vld [vmem:[#allocation4 + $0xb60] ss:$16 sps:$4 sm:$0xff]  }
 0x2c2   : > { %7343 = vmatprep.subr.bf16.mxu0 %v10178_v35  ;;  %7464 = vmatprep.subr.bf16.mxu1 %v10181_v41  ;;  %v10209_v35 = vld [vmem:[#allocation4 + $0x11e0] ss:$16 sps:$4 sm:$0xff]   ;;  %v10214_v41 = vld [vmem:[#allocation4 + $0xb44] ss:$16 sps:$4 sm:$0xff]  }
 0x2c5   : > { %7344 = vmatpush1.bf16.msra.mxu0 %v10176_v25  ;;  %7465 = vmatpush1.bf16.msra.mxu1 %v10179_v31  ;;  %v10217_v25 = vld [vmem:[#allocation4 + $0x11c4] ss:$16 sps:$4 sm:$0xff]   ;;  %v10212_v31 = vld [vmem:[#allocation4 + $0xb40] ss:$16 sps:$4 sm:$0xff]  }
 0x2c6   : > { %7345 = vmatprep.subr.bf16.mxu0 %v10184_v10  ;;  %7466 = vmatprep.subr.bf16.mxu1 %v10187_v39  ;;  %v10215_v10 = vld [vmem:[#allocation4 + $0x11c0] ss:$16 sps:$4 sm:$0xff]   ;;  %v10220_v39 = vld [vmem:[#allocation4 + $0xb24] ss:$16 sps:$4 sm:$0xff]  }
 0x2c9   : > { %7346 = vmatpush2.bf16.msra.mxu0 %v10182_v40  ;;  %7467 = vmatpush1.bf16.msra.mxu1 %v10185_v36  ;;  %v10223_v40 = vld [vmem:[#allocation4 + $0x11a4] ss:$16 sps:$4 sm:$0xff]   ;;  %v10218_v36 = vld [vmem:[#allocation4 + $0xb20] ss:$16 sps:$4 sm:$0xff]  }
 0x2ca   : > { %7347 = vmatprep.subr.bf16.mxu0 %v10190_v49  ;;  %7468 = vmatprep.subr.bf16.mxu1 %v10193_v42  ;;  %v10221_v49 = vld [vmem:[#allocation4 + $0x11a0] ss:$16 sps:$4 sm:$0xff]   ;;  %v10226_v42 = vld [vmem:[#allocation4 + $0xb04] ss:$16 sps:$4 sm:$0xff]  }
 0x2cd   : > { %7348 = vmatpush2.bf16.msra.mxu0 %v10188_v45  ;;  %7469 = vmatpush1.bf16.msra.mxu1 %v10191_v47  ;;  %v10229_v45 = vld [vmem:[#allocation4 + $0x1184] ss:$16 sps:$4 sm:$0xff]   ;;  %v10224_v47 = vld [vmem:[#allocation4 + $0xb00] ss:$16 sps:$4 sm:$0xff]  }
 0x2ce   : > { %7349 = vmatprep.subr.bf16.mxu0 %v10196_v32  ;;  %7470 = vmatprep.subr.bf16.mxu1 %v10199_v11  ;;  %v10227_v32 = vld [vmem:[#allocation4 + $0x1180] ss:$16 sps:$4 sm:$0xff]   ;;  %v10232_v11 = vld [vmem:[#allocation4 + $0xee4] ss:$16 sps:$4 sm:$0xff]  }
 0x2d1   : > { %7350 = vmatpush2.bf16.msra.mxu0 %v10194_v18  ;;  %7471 = vmatpush1.bf16.msra.mxu1 %v10197_v57  ;;  %v10235_v18 = vld [vmem:[#allocation4 + $0x1164] ss:$16 sps:$4 sm:$0xff]   ;;  %v10230_v57 = vld [vmem:[#allocation4 + $0xee0] ss:$16 sps:$4 sm:$0xff]  }
 0x2d2   : > { %7351 = vmatprep.subr.bf16.mxu0 %v10202_v28  ;;  %7472 = vmatprep.subr.bf16.mxu1 %v10205_v26  ;;  %v10233_v28 = vld [vmem:[#allocation4 + $0x1160] ss:$16 sps:$4 sm:$0xff]   ;;  %v10238_v26 = vld [vmem:[#allocation4 + $0xec4] ss:$16 sps:$4 sm:$0xff]  }
 0x2d5   : > { %7352 = vmatpush2.bf16.msra.mxu0 %v10200_v3  ;;  %7473 = vmatpush1.bf16.msra.mxu1 %v10203_v52  ;;  %v10241_v3 = vld [vmem:[#allocation4 + $0x1144] ss:$16 sps:$4 sm:$0xff]   ;;  %v11978_v52 = vpack.c.bf16 %v11896_v20, %v11884_v5 }
 0x2d6   : > { %7353 = vmatprep.subr.bf16.mxu0 %v10208_v59  ;;  %7474 = vmatprep.subr.bf16.mxu1 %v10211_v22  ;;  %v10236_v59 = vld [vmem:[#allocation4 + $0xec0] ss:$16 sps:$4 sm:$0xff]   ;;  %v10250_v5 = vld [vmem:[#allocation4 + $0xe84] ss:$16 sps:$4 sm:$0xff]  }
 0x2d7   : > { %v10239_v22 = vld [vmem:[#allocation4 + $0x1140] ss:$16 sps:$4 sm:$0xff]   ;;  %v10253_v20 = vld [vmem:[#allocation4 + $0x1104] ss:$16 sps:$4 sm:$0xff]  }
 0x2d9   : > { %7354 = vmatpush2.bf16.msra.mxu0 %v10206_v15  ;;  %7475 = vmatpush2.bf16.msra.mxu1 %v10209_v35  ;;  %v10244_v15 = vld [vmem:[#allocation4 + $0xea4] ss:$16 sps:$4 sm:$0xff]  }
 0x2da   : > { %7355 = vmatprep.subr.bf16.mxu0 %v10214_v41  ;;  %7476 = vmatprep.subr.bf16.mxu1 %v10217_v25  ;;  %v10247_v35 = vld [vmem:[#allocation4 + $0x1124] ss:$16 sps:$4 sm:$0xff]   ;;  %v10242_v41 = vld [vmem:[#allocation4 + $0xea0] ss:$16 sps:$4 sm:$0xff]  }
 0x2db   : > { %v10245_v25 = vld [vmem:[#allocation4 + $0x1120] ss:$16 sps:$4 sm:$0xff]  }
 0x2dd   : > { %7356 = vmatpush2.bf16.msra.mxu0 %v10212_v31  ;;  %7477 = vmatpush2.bf16.msra.mxu1 %v10215_v10  ;;  %v10248_v31 = vld [vmem:[#allocation4 + $0xe80] ss:$16 sps:$4 sm:$0xff]  }
 0x2de   : > { %7357 = vmatprep.subr.bf16.mxu0 %v10220_v39  ;;  %7478 = vmatprep.subr.bf16.mxu1 %v10223_v40  ;;  %v10251_v10 = vld [vmem:[#allocation4 + $0x1100] ss:$16 sps:$4 sm:$0xff]   ;;  %v10256_v39 = vld [vmem:[#allocation4 + $0xe64] ss:$16 sps:$4 sm:$0xff]  }
 0x2df   : > { %v10259_v40 = vld [vmem:[#allocation4 + $0x14e4] ss:$16 sps:$4 sm:$0xff]  }
 0x2e1   : > { %7358 = vmatpush2.bf16.msra.mxu0 %v10218_v36  ;;  %7479 = vmatpush2.bf16.msra.mxu1 %v10221_v49  ;;  %v11984_v36 = vpack.c.bf16 %v11904_v38, %v11899_v37  ;;  %v10254_v49 = vld [vmem:[#allocation4 + $0xe60] ss:$16 sps:$4 sm:$0xff]   ;;  %v10268_v37 = vld [vmem:[#allocation4 + $0xe24] ss:$16 sps:$4 sm:$0xff]  }
 0x2e2   : > { %7359 = vmatprep.subr.bf16.mxu0 %v10226_v42  ;;  %7480 = vmatprep.subr.bf16.mxu1 %v10229_v45  ;;  %v10257_v42 = vld [vmem:[#allocation4 + $0x14e0] ss:$16 sps:$4 sm:$0xff]   ;;  %v10262_v45 = vld [vmem:[#allocation4 + $0xe44] ss:$16 sps:$4 sm:$0xff]  }
 0x2e3   : > { %v10271_v38 = vld [vmem:[#allocation4 + $0x14a4] ss:$16 sps:$4 sm:$0xff]  }
 0x2e5   : > { %7360 = vmatpush2.bf16.msra.mxu0 %v10224_v47  ;;  %7481 = vmatpush2.bf16.msra.mxu1 %v10227_v32  ;;  %v10265_v47 = vld [vmem:[#allocation4 + $0x14c4] ss:$16 sps:$4 sm:$0xff]   ;;  %v11988_v32 = vpack.c.bf16 %v11930_v2, %v11926_v62 }
 0x2e6   : > { %7415 = vmatprep.subr.bf16.mxu0 %v10232_v11  ;;  %7482 = vmatprep.subr.bf16.mxu1 %v10235_v18  ;;  %v10260_v11 = vld [vmem:[#allocation4 + $0xe40] ss:$16 sps:$4 sm:$0xff]   ;;  %v10274_v62 = vld [vmem:[#allocation4 + $0xe04] ss:$16 sps:$4 sm:$0xff]  }
 0x2e7   : > { %v10263_v18 = vld [vmem:[#allocation4 + $0x14c0] ss:$16 sps:$4 sm:$0xff]   ;;  %v10277_v2 = vld [vmem:[#allocation4 + $0x1484] ss:$16 sps:$4 sm:$0xff]  }
 0x2e8   : > { %7362 = vmatmul.mubr.bf16.vlgmr.msra.gmra.mxu0 %v11872_v44 }
 0x2e9   : > { %7416 = vmatpush1.bf16.msra.mxu0 %v10230_v57  ;;  %7483 = vmatpush2.bf16.msra.mxu1 %v10233_v28  ;;  %v10266_v57 = vld [vmem:[#allocation4 + $0xe20] ss:$16 sps:$4 sm:$0xff]  }
 0x2ea   : > { %7417 = vmatprep.subr.bf16.mxu0 %v10238_v26  ;;  %7484 = vmatprep.subr.bf16.mxu1 %v10241_v3  ;;  %v10269_v28 = vld [vmem:[#allocation4 + $0x14a0] ss:$16 sps:$4 sm:$0xff]  }
 0x2eb   : > { %7447 = vmatprep.mubr.bf16.mxu0 %v11978_v52  ;;  %v10272_v26 = vld [vmem:[#allocation4 + $0xe00] ss:$16 sps:$4 sm:$0xff]  }
 0x2ec   : > { %v10275_v3 = vld [vmem:[#allocation4 + $0x1480] ss:$16 sps:$4 sm:$0xff]  }
 0x2ed   : > { %7418 = vmatpush1.bf16.msra.mxu0 %v10236_v59  ;;  %7485 = vmatpush2.bf16.msra.mxu1 %v10239_v22  ;;  %v10280_v59 = vld [vmem:[#allocation4 + $0xfe4] ss:$16 sps:$4 sm:$0xff]  }
 0x2ee   : > { %7419 = vmatprep.subr.bf16.mxu0 %v10244_v15  ;;  %7486 = vmatprep.subr.bf16.mxu1 %v10247_v35  ;;  %v10283_v22 = vld [vmem:[#allocation4 + $0x1464] ss:$16 sps:$4 sm:$0xff]   ;;  %v10278_v15 = vld [vmem:[#allocation4 + $0xfe0] ss:$16 sps:$4 sm:$0xff]  }
 0x2ef   : > { %v10281_v35 = vld [vmem:[#allocation4 + $0x1460] ss:$16 sps:$4 sm:$0xff]  }
 0x2f1   : > { %7420 = vmatpush1.bf16.msra.mxu0 %v10242_v41  ;;  %7487 = vmatpush2.bf16.msra.mxu1 %v10245_v25  ;;  %v10286_v41 = vld [vmem:[#allocation4 + $0xfc4] ss:$16 sps:$4 sm:$0xff]  }
 0x2f2   : > { %7421 = vmatprep.subr.bf16.mxu0 %v10250_v5  ;;  %7488 = vmatprep.subr.bf16.mxu1 %v10253_v20  ;;  %v10289_v25 = vld [vmem:[#allocation4 + $0x1444] ss:$16 sps:$4 sm:$0xff]   ;;  %v10284_v5 = vld [vmem:[#allocation4 + $0xfc0] ss:$16 sps:$4 sm:$0xff]  }
 0x2f3   : > { %v10287_v20 = vld [vmem:[#allocation4 + $0x1440] ss:$16 sps:$4 sm:$0xff]  }
 0x2f5   : > { %7422 = vmatpush1.bf16.msra.mxu0 %v10248_v31  ;;  %7489 = vmatpush2.bf16.msra.mxu1 %v10251_v10  ;;  %v10292_v31 = vld [vmem:[#allocation4 + $0xfa4] ss:$16 sps:$4 sm:$0xff]  }
 0x2f6   : > { %7423 = vmatprep.subr.bf16.mxu0 %v10256_v39  ;;  %7544 = vmatprep.subr.bf16.mxu1 %v10259_v40  ;;  %v10295_v10 = vld [vmem:[#allocation4 + $0x1424] ss:$16 sps:$4 sm:$0xff]   ;;  %v10290_v39 = vld [vmem:[#allocation4 + $0xfa0] ss:$16 sps:$4 sm:$0xff]  }
 0x2f7   : > { %v10293_v40 = vld [vmem:[#allocation4 + $0x1420] ss:$16 sps:$4 sm:$0xff]  }
 0x2f8   : > { %7491 = vmatmul.mubr.bf16.vlgmr.msra.gmra.mxu1 %v11984_v36 }
 0x2f9   : > { %7424 = vmatpush1.bf16.msra.mxu0 %v10254_v49  ;;  %7545 = vmatpush1.bf16.msra.mxu1 %v10257_v42  ;;  %v10298_v49 = vld [vmem:[#allocation4 + $0xf84] ss:$16 sps:$4 sm:$0xff]  }
 0x2fa   : > { %7425 = vmatprep.subr.bf16.mxu0 %v10262_v45  ;;  %7546 = vmatprep.subr.bf16.mxu1 %v10265_v47  ;;  %v10301_v42 = vld [vmem:[#allocation4 + $0x1404] ss:$16 sps:$4 sm:$0xff]   ;;  %v10296_v45 = vld [vmem:[#allocation4 + $0xf80] ss:$16 sps:$4 sm:$0xff]  }
 0x2fb   : > { %7576 = vmatprep.mubr.bf16.mxu1 %v11988_v32  ;;  %v10299_v47 = vld [vmem:[#allocation4 + $0x1400] ss:$16 sps:$4 sm:$0xff]  }
 0x2fd   : > { %7426 = vmatpush1.bf16.msra.mxu0 %v10260_v11  ;;  %7547 = vmatpush1.bf16.msra.mxu1 %v10263_v18  ;;  %v10304_v11 = vld [vmem:[#allocation4 + $0xf64] ss:$16 sps:$4 sm:$0xff]  }
 0x2fe   : > { %7427 = vmatprep.subr.bf16.mxu0 %v10268_v37  ;;  %7548 = vmatprep.subr.bf16.mxu1 %v10271_v38  ;;  %v10307_v18 = vld [vmem:[#allocation4 + $0x15e4] ss:$16 sps:$4 sm:$0xff]   ;;  %v10302_v37 = vld [vmem:[#allocation4 + $0xf60] ss:$16 sps:$4 sm:$0xff]  }
 0x2ff   : > { %v10305_v38 = vld [vmem:[#allocation4 + $0x15e0] ss:$16 sps:$4 sm:$0xff]  }
 0x301   : > { %7428 = vmatpush1.bf16.msra.mxu0 %v10266_v57  ;;  %7549 = vmatpush1.bf16.msra.mxu1 %v10269_v28  ;;  %v10310_v57 = vld [vmem:[#allocation4 + $0xf44] ss:$16 sps:$4 sm:$0xff]  }
 0x302   : > { %7429 = vmatprep.subr.bf16.mxu0 %v10274_v62  ;;  %7550 = vmatprep.subr.bf16.mxu1 %v10277_v2  ;;  %v10313_v28 = vld [vmem:[#allocation4 + $0x15c4] ss:$16 sps:$4 sm:$0xff]   ;;  %v10308_v62 = vld [vmem:[#allocation4 + $0xf40] ss:$16 sps:$4 sm:$0xff]  }
 0x303   : > { %v10311_v2 = vld [vmem:[#allocation4 + $0x15c0] ss:$16 sps:$4 sm:$0xff]  }
 0x305   : > { %7430 = vmatpush1.bf16.msra.mxu0 %v10272_v26  ;;  %7551 = vmatpush1.bf16.msra.mxu1 %v10275_v3  ;;  %v7148_v26 = vpop.f32.mrf.mxu0  ;;  %v10316_v3 = vld [vmem:[#allocation4 + $0xf24] ss:$16 sps:$4 sm:$0xff]  }
 0x306   : > { %7431 = vmatprep.subr.bf16.mxu0 %v10280_v59  ;;  %7552 = vmatprep.subr.bf16.mxu1 %v10283_v22  ;;  %v10319_v59 = vld [vmem:[#allocation4 + $0x15a4] ss:$16 sps:$4 sm:$0xff]   ;;  %v10314_v22 = vld [vmem:[#allocation4 + $0xf20] ss:$16 sps:$4 sm:$0xff]  }
 0x309   : > { %7432 = vmatpush2.bf16.msra.mxu0 %v10278_v15  ;;  %7553 = vmatpush1.bf16.msra.mxu1 %v10281_v35  ;;  %v10317_v15 = vld [vmem:[#allocation4 + $0x15a0] ss:$16 sps:$4 sm:$0xff]   ;;  %v7150_v35 = vpop.f32.mrf.mxu0 }
 0x30a   : > { %7433 = vmatprep.subr.bf16.mxu0 %v10286_v41  ;;  %7554 = vmatprep.subr.bf16.mxu1 %v10289_v25  ;;  %v10322_v41 = vld [vmem:[#allocation4 + $0xf04] ss:$16 sps:$4 sm:$0xff]  }
 0x30b   : > { %v10325_v25 = vld [vmem:[#allocation4 + $0x1584] ss:$16 sps:$4 sm:$0xff]  }
 0x30d   : > { %7434 = vmatpush2.bf16.msra.mxu0 %v10284_v5  ;;  %7555 = vmatpush1.bf16.msra.mxu1 %v10287_v20  ;;  %v11992_v5 = vpop.f32.mrf.mxu1  ;;  %v10320_v20 = vld [vmem:[#allocation4 + $0xf00] ss:$16 sps:$4 sm:$0xff]  }
 0x30e   : > { %7435 = vmatprep.subr.bf16.mxu0 %v10292_v31  ;;  %7556 = vmatprep.subr.bf16.mxu1 %v10295_v10  ;;  %v10323_v31 = vld [vmem:[#allocation4 + $0x1580] ss:$16 sps:$4 sm:$0xff]   ;;  %v7152_v10 = vpop.f32.mrf.mxu0 }
 0x311   : > { %7436 = vmatpush2.bf16.msra.mxu0 %v10290_v39  ;;  %7557 = vmatpush1.bf16.msra.mxu1 %v10293_v40  ;;  %v10328_v39 = vld [vmem:[#allocation4 + $0x12e4] ss:$16 sps:$4 sm:$0xff]  }
 0x312   : > { %7437 = vmatprep.subr.bf16.mxu0 %v10298_v49  ;;  %7558 = vmatprep.subr.bf16.mxu1 %v10301_v42  ;;  %v10331_v40 = vld [vmem:[#allocation4 + $0x1564] ss:$16 sps:$4 sm:$0xff]   ;;  %v7234_v49 = vpop.f32.mrf.mxu1  ;;  %v10326_v42 = vld [vmem:[#allocation4 + $0x12e0] ss:$16 sps:$4 sm:$0xff]  }
 0x315   : > { %7438 = vmatpush2.bf16.msra.mxu0 %v10296_v45  ;;  %7559 = vmatpush1.bf16.msra.mxu1 %v10299_v47  ;;  %v10329_v45 = vld [vmem:[#allocation4 + $0x1560] ss:$16 sps:$4 sm:$0xff]   ;;  %v7154_v47 = vpop.f32.mrf.mxu0 }
 0x316   : > { %7439 = vmatprep.subr.bf16.mxu0 %v10304_v11  ;;  %7560 = vmatprep.subr.bf16.mxu1 %v10307_v18  ;;  %v7236_v11 = vpop.f32.mrf.mxu1  ;;  %v10334_v18 = vld [vmem:[#allocation4 + $0x12c4] ss:$16 sps:$4 sm:$0xff]  }
 0x319   : > { %7440 = vmatpush2.bf16.msra.mxu0 %v10302_v37  ;;  %7561 = vmatpush2.bf16.msra.mxu1 %v10305_v38  ;;  %v10337_v37 = vld [vmem:[#allocation4 + $0x1544] ss:$16 sps:$4 sm:$0xff]   ;;  %v11996_v38 = vpack.c.bf16 %v11920_v27, %v11908_v16 }
 0x31a   : > { %7441 = vmatprep.subr.bf16.mxu0 %v10310_v57  ;;  %7562 = vmatprep.subr.bf16.mxu1 %v10313_v28 }
 0x31d   : > { %7442 = vmatpush2.bf16.msra.mxu0 %v10308_v62  ;;  %7563 = vmatpush2.bf16.msra.mxu1 %v10311_v2  ;;  %v10332_v62 = vld [vmem:[#allocation4 + $0x12c0] ss:$16 sps:$4 sm:$0xff]  }
 0x31e   : > { %7443 = vmatprep.subr.bf16.mxu0 %v10316_v3  ;;  %7564 = vmatprep.subr.bf16.mxu1 %v10319_v59  ;;  %v10335_v2 = vld [vmem:[#allocation4 + $0x1540] ss:$16 sps:$4 sm:$0xff]   ;;  %v7238_v59 = vpop.f32.mrf.mxu1 }
 0x321   : > { %7444 = vmatpush2.bf16.msra.mxu0 %v10314_v22  ;;  %7565 = vmatpush2.bf16.msra.mxu1 %v10317_v15  ;;  %v10340_v22 = vld [vmem:[#allocation4 + $0x12a4] ss:$16 sps:$4 sm:$0xff]  }
 0x322   : > { %7445 = vmatprep.subr.bf16.mxu0 %v10322_v41  ;;  %7566 = vmatprep.subr.bf16.mxu1 %v10325_v25  ;;  %v10343_v15 = vld [vmem:[#allocation4 + $0x1524] ss:$16 sps:$4 sm:$0xff]  }
 0x325   : > { %7446 = vmatpush2.bf16.msra.mxu0 %v10320_v20  ;;  %7567 = vmatpush2.bf16.msra.mxu1 %v10323_v31  ;;  %v10341_v31 = vld [vmem:[#allocation4 + $0x1520] ss:$16 sps:$4 sm:$0xff]  }
 0x326   : > { %7501 = vmatprep.subr.bf16.mxu0 %v10328_v39  ;;  %7568 = vmatprep.subr.bf16.mxu1 %v10331_v40  ;;  %v7240_v40 = vpop.f32.mrf.mxu1 }
 0x328   : > { %v7191_v57 = vpop.f32.mrf.mxu0  ;;  %7448 = vmatmul.mubr.bf16.vlgmr.msra.gmra.mxu0 %v11890_v17 }
 0x329   : > { %v7192_v28 = vadd.f32 %v7191_v57, %v7148_v26  ;;  %7502 = vmatpush1.bf16.msra.mxu0 %v10326_v42  ;;  %7569 = vmatpush2.bf16.msra.mxu1 %v10329_v45  ;;  %v10338_v26 = vld [vmem:[#allocation4 + $0x12a0] ss:$16 sps:$4 sm:$0xff]   ;;  %v10346_v42 = vld [vmem:[#allocation4 + $0x1284] ss:$16 sps:$4 sm:$0xff]  }
 0x32a   : > { %v7193_v3 = vpop.f32.mrf.mxu0  ;;  %7503 = vmatprep.subr.bf16.mxu0 %v10334_v18  ;;  %7570 = vmatprep.subr.bf16.mxu1 %v10337_v37  ;;  %v10349_v45 = vld [vmem:[#allocation4 + $0x1504] ss:$16 sps:$4 sm:$0xff]  }
 0x32b   : > { %v7194_v41 = vadd.f32 %v7193_v3, %v7150_v35  ;;  %v11999_v25 = vadd.f32 %v7234_v49, %v7192_v28  ;;  %7533 = vmatprep.mubr.bf16.mxu0 %v11996_v38  ;;  %v10352_v37 = vld [vmem:[#allocation4 + $0x1264] ss:$16 sps:$4 sm:$0xff]   ;;  %v12010_v28 = vpack.c.bf16 %v11928_v23, %v11923_v56 }
 0x32c   : > { %v7195_v16 = vpop.f32.mrf.mxu0  ;;  %v10355_v57 = vld [vmem:[#allocation4 + $0x18e4] ss:$16 sps:$4 sm:$0xff]  }
 0x32d   : > { %v7196_v27 = vadd.f32 %v7195_v16, %v7152_v10  ;;  %v12002_v20 = vadd.f32 %v7236_v11, %v7194_v41  ;;  %7504 = vmatpush1.bf16.msra.mxu0 %v10332_v62  ;;  %7571 = vmatpush2.bf16.msra.mxu1 %v10335_v2  ;;  %v10344_v10 = vld [vmem:[#allocation4 + $0x1280] ss:$16 sps:$4 sm:$0xff]   ;;  %v10358_v2 = vld [vmem:[#allocation4 + $0x1244] ss:$16 sps:$4 sm:$0xff]  }
 0x32e   : > { %v7197_v39 = vpop.f32.mrf.mxu0  ;;  %7505 = vmatprep.subr.bf16.mxu0 %v10340_v22  ;;  %7572 = vmatprep.subr.bf16.mxu1 %v10343_v15  ;;  %v10347_v11 = vld [vmem:[#allocation4 + $0x1500] ss:$16 sps:$4 sm:$0xff]   ;;  %v10361_v3 = vld [vmem:[#allocation4 + $0x18c4] ss:$16 sps:$4 sm:$0xff]  }
 0x32f   : > { %v7198_v18 = vadd.f32 %v7197_v39, %v7154_v47  ;;  %v12004_v35 = vadd.f32 %v7238_v59, %v7196_v27  ;;  %v10350_v62 = vld [vmem:[#allocation4 + $0x1260] ss:$16 sps:$4 sm:$0xff]   ;;  %v12014_v59 = vpack.c.bf16 %v11942_v60, %v11938_v46  ;;  %v10364_v56 = vld [vmem:[#allocation4 + $0x1224] ss:$16 sps:$4 sm:$0xff]  }
 0x330   : > { %v10353_v47 = vld [vmem:[#allocation4 + $0x18e0] ss:$16 sps:$4 sm:$0xff]   ;;  %v10367_v23 = vld [vmem:[#allocation4 + $0x18a4] ss:$16 sps:$4 sm:$0xff]  }
 0x331   : > { %v12006_v49 = vadd.f32 %v7240_v40, %v7198_v18  ;;  %7506 = vmatpush1.bf16.msra.mxu0 %v10338_v26  ;;  %7573 = vmatpush2.bf16.msra.mxu1 %v10341_v31  ;;  %v10356_v22 = vld [vmem:[#allocation4 + $0x1240] ss:$16 sps:$4 sm:$0xff]   ;;  %v10370_v46 = vld [vmem:[#allocation4 + $0x1204] ss:$16 sps:$4 sm:$0xff]  }
 0x332   : > { %7507 = vmatprep.subr.bf16.mxu0 %v10346_v42  ;;  %7574 = vmatprep.subr.bf16.mxu1 %v10349_v45  ;;  %v10359_v15 = vld [vmem:[#allocation4 + $0x18c0] ss:$16 sps:$4 sm:$0xff]   ;;  %v10373_v60 = vld [vmem:[#allocation4 + $0x1884] ss:$16 sps:$4 sm:$0xff]  }
 0x333   : > { %v10362_v41 = vld [vmem:[#allocation4 + $0x1220] ss:$16 sps:$4 sm:$0xff]   ;;  %v10376_v31 = vld [vmem:[#allocation4 + $0x13e4] ss:$16 sps:$4 sm:$0xff]  }
 0x334   : > { %v10365_v16 = vld [vmem:[#allocation4 + $0x18a0] ss:$16 sps:$4 sm:$0xff]   ;;  %v10379_v39 = vld [vmem:[#allocation4 + $0x1864] ss:$16 sps:$4 sm:$0xff]  }
 0x335   : > { %7508 = vmatpush1.bf16.msra.mxu0 %v10344_v10  ;;  %7575 = vmatpush2.bf16.msra.mxu1 %v10347_v11  ;;  %v10368_v27 = vld [vmem:[#allocation4 + $0x1200] ss:$16 sps:$4 sm:$0xff]   ;;  %v10382_v45 = vld [vmem:[#allocation4 + $0x13c4] ss:$16 sps:$4 sm:$0xff]  }
 0x336   : > { %7509 = vmatprep.subr.bf16.mxu0 %v10352_v37  ;;  %7630 = vmatprep.subr.bf16.mxu1 %v10355_v57  ;;  %v10371_v26 = vld [vmem:[#allocation4 + $0x1880] ss:$16 sps:$4 sm:$0xff]   ;;  %v10385_v18 = vld [vmem:[#allocation4 + $0x1844] ss:$16 sps:$4 sm:$0xff]  }
 0x337   : > { %v10374_v40 = vld [vmem:[#allocation4 + $0x13e0] ss:$16 sps:$4 sm:$0xff]   ;;  %v10388_v37 = vld [vmem:[#allocation4 + $0x13a4] ss:$16 sps:$4 sm:$0xff]  }
 0x338   : > { %7577 = vmatmul.mubr.bf16.vlgmr.msra.gmra.mxu1 %v12010_v28  ;;  %v10377_v42 = vld [vmem:[#allocation4 + $0x1860] ss:$16 sps:$4 sm:$0xff]   ;;  %v10391_v57 = vld [vmem:[#allocation4 + $0x1824] ss:$16 sps:$4 sm:$0xff]  }
 0x339   : > { %7510 = vmatpush1.bf16.msra.mxu0 %v10350_v62  ;;  %7631 = vmatpush1.bf16.msra.mxu1 %v10353_v47  ;;  %v10380_v10 = vld [vmem:[#allocation4 + $0x13c0] ss:$16 sps:$4 sm:$0xff]  }
 0x33a   : > { %7511 = vmatprep.subr.bf16.mxu0 %v10358_v2  ;;  %7632 = vmatprep.subr.bf16.mxu1 %v10361_v3  ;;  %v10383_v11 = vld [vmem:[#allocation4 + $0x1840] ss:$16 sps:$4 sm:$0xff]   ;;  %v10394_v2 = vld [vmem:[#allocation4 + $0x1384] ss:$16 sps:$4 sm:$0xff]  }
 0x33b   : > { %7662 = vmatprep.mubr.bf16.mxu1 %v12014_v59  ;;  %v10386_v62 = vld [vmem:[#allocation4 + $0x13a0] ss:$16 sps:$4 sm:$0xff]   ;;  %v10397_v3 = vld [vmem:[#allocation4 + $0x1804] ss:$16 sps:$4 sm:$0xff]  }
 0x33c   : > { %v10389_v47 = vld [vmem:[#allocation4 + $0x1820] ss:$16 sps:$4 sm:$0xff]  }
 0x33d   : > { %7512 = vmatpush1.bf16.msra.mxu0 %v10356_v22  ;;  %7633 = vmatpush1.bf16.msra.mxu1 %v10359_v15  ;;  %v10392_v22 = vld [vmem:[#allocation4 + $0x1380] ss:$16 sps:$4 sm:$0xff]  }
 0x33e   : > { %7513 = vmatprep.subr.bf16.mxu0 %v10364_v56  ;;  %7634 = vmatprep.subr.bf16.mxu1 %v10367_v23  ;;  %v10395_v15 = vld [vmem:[#allocation4 + $0x1800] ss:$16 sps:$4 sm:$0xff]   ;;  %v10400_v56 = vld [vmem:[#allocation4 + $0x1364] ss:$16 sps:$4 sm:$0xff]  }
 0x33f   : > { %v10403_v23 = vld [vmem:[#allocation4 + $0x19e4] ss:$16 sps:$4 sm:$0xff]  }
 0x341   : > { %7514 = vmatpush1.bf16.msra.mxu0 %v10362_v41  ;;  %7635 = vmatpush1.bf16.msra.mxu1 %v10365_v16  ;;  %v10398_v41 = vld [vmem:[#allocation4 + $0x1360] ss:$16 sps:$4 sm:$0xff]  }
 0x342   : > { %7515 = vmatprep.subr.bf16.mxu0 %v10370_v46  ;;  %7636 = vmatprep.subr.bf16.mxu1 %v10373_v60  ;;  %v10401_v16 = vld [vmem:[#allocation4 + $0x19e0] ss:$16 sps:$4 sm:$0xff]   ;;  %v10406_v46 = vld [vmem:[#allocation4 + $0x1344] ss:$16 sps:$4 sm:$0xff]  }
 0x343   : > { %v10409_v60 = vld [vmem:[#allocation4 + $0x19c4] ss:$16 sps:$4 sm:$0xff]  }
 0x345   : > { %7516 = vmatpush1.bf16.msra.mxu0 %v10368_v27  ;;  %7637 = vmatpush1.bf16.msra.mxu1 %v10371_v26  ;;  %v10404_v27 = vld [vmem:[#allocation4 + $0x1340] ss:$16 sps:$4 sm:$0xff]  }
 0x346   : > { %7517 = vmatprep.subr.bf16.mxu0 %v10376_v31  ;;  %7638 = vmatprep.subr.bf16.mxu1 %v10379_v39  ;;  %v10407_v26 = vld [vmem:[#allocation4 + $0x19c0] ss:$16 sps:$4 sm:$0xff]   ;;  %v10412_v31 = vld [vmem:[#allocation4 + $0x1324] ss:$16 sps:$4 sm:$0xff]  }
 0x347   : > { %v10415_v39 = vld [vmem:[#allocation4 + $0x19a4] ss:$16 sps:$4 sm:$0xff]  }
 0x349   : > { %7518 = vmatpush2.bf16.msra.mxu0 %v10374_v40  ;;  %7639 = vmatpush1.bf16.msra.mxu1 %v10377_v42  ;;  %v10410_v40 = vld [vmem:[#allocation4 + $0x1320] ss:$16 sps:$4 sm:$0xff]  }
 0x34a   : > { %7519 = vmatprep.subr.bf16.mxu0 %v10382_v45  ;;  %7640 = vmatprep.subr.bf16.mxu1 %v10385_v18  ;;  %v10413_v42 = vld [vmem:[#allocation4 + $0x19a0] ss:$16 sps:$4 sm:$0xff]   ;;  %v10418_v45 = vld [vmem:[#allocation4 + $0x1304] ss:$16 sps:$4 sm:$0xff]  }
 0x34b   : > { %v10421_v18 = vld [vmem:[#allocation4 + $0x1984] ss:$16 sps:$4 sm:$0xff]  }
 0x34d   : > { %7520 = vmatpush2.bf16.msra.mxu0 %v10380_v10  ;;  %7641 = vmatpush1.bf16.msra.mxu1 %v10383_v11  ;;  %v10416_v10 = vld [vmem:[#allocation4 + $0x1300] ss:$16 sps:$4 sm:$0xff]  }
 0x34e   : > { %7521 = vmatprep.subr.bf16.mxu0 %v10388_v37  ;;  %7642 = vmatprep.subr.bf16.mxu1 %v10391_v57  ;;  %v10419_v11 = vld [vmem:[#allocation4 + $0x1980] ss:$16 sps:$4 sm:$0xff]   ;;  %v10424_v37 = vld [vmem:[#allocation4 + $0x16e4] ss:$16 sps:$4 sm:$0xff]  }
 0x34f   : > { %v10427_v57 = vld [vmem:[#allocation4 + $0x1964] ss:$16 sps:$4 sm:$0xff]  }
 0x351   : > { %7522 = vmatpush2.bf16.msra.mxu0 %v10386_v62  ;;  %7643 = vmatpush1.bf16.msra.mxu1 %v10389_v47  ;;  %v7320_v62 = vpop.f32.mrf.mxu1  ;;  %v10422_v47 = vld [vmem:[#allocation4 + $0x16e0] ss:$16 sps:$4 sm:$0xff]  }
 0x352   : > { %7523 = vmatprep.subr.bf16.mxu0 %v10394_v2  ;;  %7644 = vmatprep.subr.bf16.mxu1 %v10397_v3  ;;  %v10425_v2 = vld [vmem:[#allocation4 + $0x1960] ss:$16 sps:$4 sm:$0xff]  }
 0x353   : > { %v7322_v3 = vpop.f32.mrf.mxu1 }
 0x355   : > { %7524 = vmatpush2.bf16.msra.mxu0 %v10392_v22  ;;  %7645 = vmatpush1.bf16.msra.mxu1 %v10395_v15  ;;  %v10430_v22 = vld [vmem:[#allocation4 + $0x16c4] ss:$16 sps:$4 sm:$0xff]   ;;  %v12020_v15 = vpack.c.bf16 %v11936_v0, %v11932_v12 }
 0x356   : > { %7525 = vmatprep.subr.bf16.mxu0 %v10400_v56  ;;  %7646 = vmatprep.subr.bf16.mxu1 %v10403_v23  ;;  %v10433_v56 = vld [vmem:[#allocation4 + $0x1944] ss:$16 sps:$4 sm:$0xff]  }
 0x357   : > { %v10439_v0 = vld [vmem:[#allocation4 + $0x1924] ss:$16 sps:$4 sm:$0xff]  }
 0x359   : > { %7526 = vmatpush2.bf16.msra.mxu0 %v10398_v41  ;;  %7647 = vmatpush2.bf16.msra.mxu1 %v10401_v16  ;;  %v10428_v16 = vld [vmem:[#allocation4 + $0x16c0] ss:$16 sps:$4 sm:$0xff]  }
 0x35a   : > { %7527 = vmatprep.subr.bf16.mxu0 %v10406_v46  ;;  %7648 = vmatprep.subr.bf16.mxu1 %v10409_v60  ;;  %v10431_v60 = vld [vmem:[#allocation4 + $0x1940] ss:$16 sps:$4 sm:$0xff]  }
 0x35d   : > { %7528 = vmatpush2.bf16.msra.mxu0 %v10404_v27  ;;  %7649 = vmatpush2.bf16.msra.mxu1 %v10407_v26  ;;  %v7324_v27 = vpop.f32.mrf.mxu1  ;;  %v10436_v26 = vld [vmem:[#allocation4 + $0x16a4] ss:$16 sps:$4 sm:$0xff]  }
 0x35e   : > { %7529 = vmatprep.subr.bf16.mxu0 %v10412_v31  ;;  %7650 = vmatprep.subr.bf16.mxu1 %v10415_v39 }
 0x361   : > { %7530 = vmatpush2.bf16.msra.mxu0 %v10410_v40  ;;  %7651 = vmatpush2.bf16.msra.mxu1 %v10413_v42  ;;  %v10434_v42 = vld [vmem:[#allocation4 + $0x16a0] ss:$16 sps:$4 sm:$0xff]  }
 0x362   : > { %7531 = vmatprep.subr.bf16.mxu0 %v10418_v45  ;;  %7652 = vmatprep.subr.bf16.mxu1 %v10421_v18  ;;  %v7326_v18 = vpop.f32.mrf.mxu1 }
 0x365   : > { %7532 = vmatpush2.bf16.msra.mxu0 %v10416_v10  ;;  %7653 = vmatpush2.bf16.msra.mxu1 %v10419_v11  ;;  %v10437_v10 = vld [vmem:[#allocation4 + $0x1920] ss:$16 sps:$4 sm:$0xff]   ;;  %v10442_v11 = vld [vmem:[#allocation4 + $0x1684] ss:$16 sps:$4 sm:$0xff]  }
 0x366   : > { %7587 = vmatprep.subr.bf16.mxu0 %v10424_v37  ;;  %7654 = vmatprep.subr.bf16.mxu1 %v10427_v57  ;;  %v10445_v57 = vld [vmem:[#allocation4 + $0x1904] ss:$16 sps:$4 sm:$0xff]  }
 0x368   : > { %v7277_v23 = vpop.f32.mrf.mxu0  ;;  %7534 = vmatmul.mubr.bf16.vlgmr.msra.gmra.mxu0 %v11914_v55 }
 0x369   : > { %v7278_v41 = vadd.f32 %v7277_v23, %v11999_v25  ;;  %7588 = vmatpush1.bf16.msra.mxu0 %v10422_v47  ;;  %7619 = vmatprep.mubr.bf16.mxu0 %v12020_v15  ;;  %v10443_v47 = vld [vmem:[#allocation4 + $0x1900] ss:$16 sps:$4 sm:$0xff]   ;;  %v10457_v23 = vld [vmem:[#allocation4 + $0x1cc4] ss:$16 sps:$4 sm:$0xff]  }
 0x36a   : > { %7655 = vmatpush2.bf16.msra.mxu1 %v10425_v2  ;;  %v7279_v46 = vpop.f32.mrf.mxu0  ;;  %7589 = vmatprep.subr.bf16.mxu0 %v10430_v22  ;;  %v10448_v2 = vld [vmem:[#allocation4 + $0x1664] ss:$16 sps:$4 sm:$0xff]   ;;  %v10446_v22 = vld [vmem:[#allocation4 + $0x1660] ss:$16 sps:$4 sm:$0xff]  }
 0x36b   : > { %v7280_v31 = vadd.f32 %v7279_v46, %v12002_v20  ;;  %v12026_v12 = vadd.f32 %v7320_v62, %v7278_v41  ;;  %7656 = vmatprep.subr.bf16.mxu1 %v10433_v56  ;;  %v10449_v56 = vld [vmem:[#allocation4 + $0x1ce0] ss:$16 sps:$4 sm:$0xff]   ;;  %v12038_v41 = vpack.c.bf16 %v11954_v21, %v11950_v7  ;;  %v10469_v7 = vld [vmem:[#allocation4 + $0x1c84] ss:$16 sps:$4 sm:$0xff]  }
 0x36c   : > { %v7281_v39 = vpop.f32.mrf.mxu0  ;;  %v10455_v46 = vld [vmem:[#allocation4 + $0x1cc0] ss:$16 sps:$4 sm:$0xff]  }
 0x36d   : > { %v7282_v40 = vadd.f32 %v7281_v39, %v12004_v35  ;;  %v12029_v25 = vadd.f32 %v7322_v3, %v7280_v31  ;;  %7590 = vmatpush1.bf16.msra.mxu0 %v10428_v16  ;;  %v10440_v35 = vld [vmem:[#allocation4 + $0x1680] ss:$16 sps:$4 sm:$0xff]   ;;  %v10451_v3 = vld [vmem:[#allocation4 + $0x1ce4] ss:$16 sps:$4 sm:$0xff]  }
 0x36e   : > { %7657 = vmatpush2.bf16.msra.mxu1 %v10431_v60  ;;  %v7283_v45 = vpop.f32.mrf.mxu0  ;;  %7591 = vmatprep.subr.bf16.mxu0 %v10436_v26  ;;  %v10452_v16 = vld [vmem:[#allocation4 + $0x1640] ss:$16 sps:$4 sm:$0xff]   ;;  %v10460_v60 = vld [vmem:[#allocation4 + $0x1624] ss:$16 sps:$4 sm:$0xff]  }
 0x36f   : > { %v7284_v37 = vadd.f32 %v7283_v45, %v12006_v49  ;;  %v12032_v20 = vadd.f32 %v7324_v27, %v7282_v40  ;;  %7658 = vmatprep.subr.bf16.mxu1 %v10439_v0  ;;  %v10454_v49 = vld [vmem:[#allocation4 + $0x1644] ss:$16 sps:$4 sm:$0xff]   ;;  %v10458_v26 = vld [vmem:[#allocation4 + $0x1620] ss:$16 sps:$4 sm:$0xff]  }
 0x370   : > { %v10463_v27 = vld [vmem:[#allocation4 + $0x1ca4] ss:$16 sps:$4 sm:$0xff]   ;;  %v10461_v31 = vld [vmem:[#allocation4 + $0x1ca0] ss:$16 sps:$4 sm:$0xff]  }
 0x371   : > { %v12034_v62 = vadd.f32 %v7326_v18, %v7284_v37  ;;  %7592 = vmatpush1.bf16.msra.mxu0 %v10434_v42  ;;  %v10466_v0 = vld [vmem:[#allocation4 + $0x1604] ss:$16 sps:$4 sm:$0xff]   ;;  %v10464_v21 = vld [vmem:[#allocation4 + $0x1600] ss:$16 sps:$4 sm:$0xff]  }
 0x372   : > { %7659 = vmatpush2.bf16.msra.mxu1 %v10437_v10  ;;  %7593 = vmatprep.subr.bf16.mxu0 %v10442_v11  ;;  %v10467_v39 = vld [vmem:[#allocation4 + $0x1c80] ss:$16 sps:$4 sm:$0xff]   ;;  %v10472_v40 = vld [vmem:[#allocation4 + $0x17e4] ss:$16 sps:$4 sm:$0xff]  }
 0x373   : > { %7660 = vmatprep.subr.bf16.mxu1 %v10445_v57  ;;  %v10475_v42 = vld [vmem:[#allocation4 + $0x1c64] ss:$16 sps:$4 sm:$0xff]   ;;  %v10470_v45 = vld [vmem:[#allocation4 + $0x17e0] ss:$16 sps:$4 sm:$0xff]  }
 0x374   : > { %v10473_v18 = vld [vmem:[#allocation4 + $0x1c60] ss:$16 sps:$4 sm:$0xff]   ;;  %v10478_v10 = vld [vmem:[#allocation4 + $0x17c4] ss:$16 sps:$4 sm:$0xff]  }
 0x375   : > { %7594 = vmatpush1.bf16.msra.mxu0 %v10440_v35  ;;  %v10481_v11 = vld [vmem:[#allocation4 + $0x1c44] ss:$16 sps:$4 sm:$0xff]   ;;  %v10476_v37 = vld [vmem:[#allocation4 + $0x17c0] ss:$16 sps:$4 sm:$0xff]  }
 0x376   : > { %7661 = vmatpush2.bf16.msra.mxu1 %v10443_v47  ;;  %7595 = vmatprep.subr.bf16.mxu0 %v10448_v2  ;;  %v10479_v57 = vld [vmem:[#allocation4 + $0x1c40] ss:$16 sps:$4 sm:$0xff]   ;;  %v10484_v35 = vld [vmem:[#allocation4 + $0x17a4] ss:$16 sps:$4 sm:$0xff]  }
 0x377   : > { %7716 = vmatprep.subr.bf16.mxu1 %v10451_v3  ;;  %v10487_v47 = vld [vmem:[#allocation4 + $0x1c24] ss:$16 sps:$4 sm:$0xff]   ;;  %v10482_v2 = vld [vmem:[#allocation4 + $0x17a0] ss:$16 sps:$4 sm:$0xff]  }
 0x378   : > { %v10485_v3 = vld [vmem:[#allocation4 + $0x1c20] ss:$16 sps:$4 sm:$0xff]  }
 0x379   : > { %7663 = vmatmul.mubr.bf16.vlgmr.msra.gmra.mxu1 %v11940_v54  ;;  %7596 = vmatpush1.bf16.msra.mxu0 %v10446_v22  ;;  %v10490_v22 = vld [vmem:[#allocation4 + $0x1784] ss:$16 sps:$4 sm:$0xff]  }
 0x37a   : > { %7717 = vmatpush1.bf16.msra.mxu1 %v10449_v56  ;;  %7748 = vmatprep.mubr.bf16.mxu1 %v12038_v41  ;;  %v10493_v56 = vld [vmem:[#allocation4 + $0x1c04] ss:$16 sps:$4 sm:$0xff]  }
 0x37b   : > { %7597 = vmatprep.subr.bf16.mxu0 %v10454_v49  ;;  %7718 = vmatprep.subr.bf16.mxu1 %v10457_v23  ;;  %v10488_v49 = vld [vmem:[#allocation4 + $0x1780] ss:$16 sps:$4 sm:$0xff]  }
 0x37c   : > { %v10491_v23 = vld [vmem:[#allocation4 + $0x1c00] ss:$16 sps:$4 sm:$0xff]  }
 0x37d   : > { %7598 = vmatpush1.bf16.msra.mxu0 %v10452_v16  ;;  %v10496_v16 = vld [vmem:[#allocation4 + $0x1764] ss:$16 sps:$4 sm:$0xff]  }
 0x37e   : > { %7719 = vmatpush1.bf16.msra.mxu1 %v10455_v46  ;;  %7599 = vmatprep.subr.bf16.mxu0 %v10460_v60  ;;  %v10499_v46 = vld [vmem:[#allocation4 + $0x1de4] ss:$16 sps:$4 sm:$0xff]   ;;  %v10494_v60 = vld [vmem:[#allocation4 + $0x1760] ss:$16 sps:$4 sm:$0xff]  }
 0x37f   : > { %7720 = vmatprep.subr.bf16.mxu1 %v10463_v27  ;;  %v10497_v27 = vld [vmem:[#allocation4 + $0x1de0] ss:$16 sps:$4 sm:$0xff]  }
 0x381   : > { %7600 = vmatpush1.bf16.msra.mxu0 %v10458_v26  ;;  %v10502_v26 = vld [vmem:[#allocation4 + $0x1744] ss:$16 sps:$4 sm:$0xff]  }
 0x382   : > { %7721 = vmatpush1.bf16.msra.mxu1 %v10461_v31  ;;  %7601 = vmatprep.subr.bf16.mxu0 %v10466_v0  ;;  %v10505_v31 = vld [vmem:[#allocation4 + $0x1dc4] ss:$16 sps:$4 sm:$0xff]   ;;  %v10500_v0 = vld [vmem:[#allocation4 + $0x1740] ss:$16 sps:$4 sm:$0xff]  }
 0x383   : > { %7722 = vmatprep.subr.bf16.mxu1 %v10469_v7  ;;  %v10503_v7 = vld [vmem:[#allocation4 + $0x1dc0] ss:$16 sps:$4 sm:$0xff]  }
 0x385   : > { %7602 = vmatpush1.bf16.msra.mxu0 %v10464_v21  ;;  %v10508_v21 = vld [vmem:[#allocation4 + $0x1724] ss:$16 sps:$4 sm:$0xff]  }
 0x386   : > { %7723 = vmatpush1.bf16.msra.mxu1 %v10467_v39  ;;  %7603 = vmatprep.subr.bf16.mxu0 %v10472_v40  ;;  %v10511_v39 = vld [vmem:[#allocation4 + $0x1da4] ss:$16 sps:$4 sm:$0xff]   ;;  %v10506_v40 = vld [vmem:[#allocation4 + $0x1720] ss:$16 sps:$4 sm:$0xff]  }
 0x387   : > { %7724 = vmatprep.subr.bf16.mxu1 %v10475_v42  ;;  %v10509_v42 = vld [vmem:[#allocation4 + $0x1da0] ss:$16 sps:$4 sm:$0xff]  }
 0x389   : > { %7604 = vmatpush2.bf16.msra.mxu0 %v10470_v45  ;;  %v10514_v45 = vld [vmem:[#allocation4 + $0x1704] ss:$16 sps:$4 sm:$0xff]  }
 0x38a   : > { %7725 = vmatpush1.bf16.msra.mxu1 %v10473_v18  ;;  %7605 = vmatprep.subr.bf16.mxu0 %v10478_v10  ;;  %v10517_v18 = vld [vmem:[#allocation4 + $0x1d84] ss:$16 sps:$4 sm:$0xff]   ;;  %v10512_v10 = vld [vmem:[#allocation4 + $0x1700] ss:$16 sps:$4 sm:$0xff]  }
 0x38b   : > { %7726 = vmatprep.subr.bf16.mxu1 %v10481_v11  ;;  %v10515_v11 = vld [vmem:[#allocation4 + $0x1d80] ss:$16 sps:$4 sm:$0xff]  }
 0x38d   : > { %7606 = vmatpush2.bf16.msra.mxu0 %v10476_v37  ;;  %v10520_v37 = vld [vmem:[#allocation4 + $0x1ae4] ss:$16 sps:$4 sm:$0xff]  }
 0x38e   : > { %7727 = vmatpush1.bf16.msra.mxu1 %v10479_v57  ;;  %7607 = vmatprep.subr.bf16.mxu0 %v10484_v35  ;;  %v7406_v57 = vpop.f32.mrf.mxu1  ;;  %v10523_v35 = vld [vmem:[#allocation4 + $0x1d64] ss:$16 sps:$4 sm:$0xff]  }
 0x38f   : > { %7728 = vmatprep.subr.bf16.mxu1 %v10487_v47  ;;  %v10518_v47 = vld [vmem:[#allocation4 + $0x1ae0] ss:$16 sps:$4 sm:$0xff]  }
 0x391   : > { %7608 = vmatpush2.bf16.msra.mxu0 %v10482_v2  ;;  %v10521_v2 = vld [vmem:[#allocation4 + $0x1d60] ss:$16 sps:$4 sm:$0xff]  }
 0x392   : > { %7729 = vmatpush1.bf16.msra.mxu1 %v10485_v3  ;;  %7609 = vmatprep.subr.bf16.mxu0 %v10490_v22  ;;  %v7408_v3 = vpop.f32.mrf.mxu1  ;;  %v10526_v22 = vld [vmem:[#allocation4 + $0x1ac4] ss:$16 sps:$4 sm:$0xff]  }
 0x393   : > { %7730 = vmatprep.subr.bf16.mxu1 %v10493_v56  ;;  %v12044_v56 = vpack.c.bf16 %v11948_v9, %v11944_v63 }
 0x395   : > { %7610 = vmatpush2.bf16.msra.mxu0 %v10488_v49  ;;  %v10529_v49 = vld [vmem:[#allocation4 + $0x1d44] ss:$16 sps:$4 sm:$0xff]  }
 0x396   : > { %7731 = vmatpush1.bf16.msra.mxu1 %v10491_v23  ;;  %7611 = vmatprep.subr.bf16.mxu0 %v10496_v16 }
 0x397   : > { %7732 = vmatprep.subr.bf16.mxu1 %v10499_v46  ;;  %v10524_v46 = vld [vmem:[#allocation4 + $0x1ac0] ss:$16 sps:$4 sm:$0xff]  }
 0x399   : > { %7612 = vmatpush2.bf16.msra.mxu0 %v10494_v60 }
 0x39a   : > { %7733 = vmatpush2.bf16.msra.mxu1 %v10497_v27  ;;  %7613 = vmatprep.subr.bf16.mxu0 %v10502_v26  ;;  %v10527_v27 = vld [vmem:[#allocation4 + $0x1d40] ss:$16 sps:$4 sm:$0xff]   ;;  %v7410_v26 = vpop.f32.mrf.mxu1 }
 0x39b   : > { %7734 = vmatprep.subr.bf16.mxu1 %v10505_v31  ;;  %v10532_v31 = vld [vmem:[#allocation4 + $0x1aa4] ss:$16 sps:$4 sm:$0xff]  }
 0x39d   : > { %7614 = vmatpush2.bf16.msra.mxu0 %v10500_v0  ;;  %v10535_v0 = vld [vmem:[#allocation4 + $0x1d24] ss:$16 sps:$4 sm:$0xff]  }
 0x39e   : > { %7735 = vmatpush2.bf16.msra.mxu1 %v10503_v7  ;;  %7615 = vmatprep.subr.bf16.mxu0 %v10508_v21 }
 0x39f   : > { %7736 = vmatprep.subr.bf16.mxu1 %v10511_v39  ;;  %v10530_v39 = vld [vmem:[#allocation4 + $0x1aa0] ss:$16 sps:$4 sm:$0xff]  }
 0x3a1   : > { %7616 = vmatpush2.bf16.msra.mxu0 %v10506_v40 }
 0x3a2   : > { %7737 = vmatpush2.bf16.msra.mxu1 %v10509_v42  ;;  %7617 = vmatprep.subr.bf16.mxu0 %v10514_v45  ;;  %v7412_v42 = vpop.f32.mrf.mxu1  ;;  %v10533_v45 = vld [vmem:[#allocation4 + $0x1d20] ss:$16 sps:$4 sm:$0xff]  }
 0x3a3   : > { %7738 = vmatprep.subr.bf16.mxu1 %v10517_v18  ;;  %v10538_v18 = vld [vmem:[#allocation4 + $0x1a84] ss:$16 sps:$4 sm:$0xff]  }
 0x3a5   : > { %7618 = vmatpush2.bf16.msra.mxu0 %v10512_v10 }
 0x3a6   : > { %7739 = vmatpush2.bf16.msra.mxu1 %v10515_v11  ;;  %7673 = vmatprep.subr.bf16.mxu0 %v10520_v37  ;;  %v10541_v11 = vld [vmem:[#allocation4 + $0x1d04] ss:$16 sps:$4 sm:$0xff]  }
 0x3a7   : > { %7740 = vmatprep.subr.bf16.mxu1 %v10523_v35  ;;  %v10544_v35 = vld [vmem:[#allocation4 + $0x1a64] ss:$16 sps:$4 sm:$0xff]  }
 0x3a8   : > { %v7363_v23 = vpop.f32.mrf.mxu0  ;;  %7620 = vmatmul.mubr.bf16.vlgmr.msra.gmra.mxu0 %v11934_v33 }
 0x3a9   : > { %v7364_v16 = vadd.f32 %v7363_v23, %v12026_v12  ;;  %7674 = vmatpush1.bf16.msra.mxu0 %v10518_v47  ;;  %7705 = vmatprep.mubr.bf16.mxu0 %v12044_v56  ;;  %v10547_v47 = vld [vmem:[#allocation4 + $0xec] ss:$16 sps:$4 sm:$0xff]   ;;  %v10551_v23 = vld [vmem:[#allocation4 + $0xc8] ss:$16 sps:$4 sm:$0xff]  }
 0x3aa   : > { %7741 = vmatpush2.bf16.msra.mxu1 %v10521_v2  ;;  %v7365_v60 = vpop.f32.mrf.mxu0  ;;  %7675 = vmatprep.subr.bf16.mxu0 %v10526_v22  ;;  %v10542_v2 = vld [vmem:[#allocation4 + $0x1a60] ss:$16 sps:$4 sm:$0xff]   ;;  %v10553_v22 = vld [vmem:[#allocation4 + $0xcc] ss:$16 sps:$4 sm:$0xff]  }
 0x3ab   : > { %v7366_v63 = vadd.f32 %v7365_v60, %v12029_v25  ;;  %v12050_v9 = vadd.f32 %v7406_v57, %v7364_v16  ;;  %7742 = vmatprep.subr.bf16.mxu1 %v10529_v49  ;;  %v10539_v57 = vld [vmem:[#allocation4 + $0x1d00] ss:$16 sps:$4 sm:$0xff]   ;;  %v10556_v16 = vld [vmem:[#allocation4 + $0x1a24] ss:$16 sps:$4 sm:$0xff]  }
 0x3ac   : > { %v7367_v7 = vpop.f32.mrf.mxu0  ;;  %v10548_v49 = vld [vmem:[#allocation4 + $0x1a40] ss:$16 sps:$4 sm:$0xff]  }
 0x3ad   : > { %v7368_v21 = vadd.f32 %v7367_v7, %v12032_v20  ;;  %v12053_v12 = vadd.f32 %v7408_v3, %v7366_v63  ;;  %7676 = vmatpush1.bf16.msra.mxu0 %v10524_v46  ;;  %v10536_v20 = vld [vmem:[#allocation4 + $0x1a80] ss:$16 sps:$4 sm:$0xff]   ;;  %v10545_v3 = vld [vmem:[#allocation4 + $0xe8] ss:$16 sps:$4 sm:$0xff]   ;;  %v10559_v46 = vld [vmem:[#allocation4 + $0xac] ss:$16 sps:$4 sm:$0xff]  }
 0x3ae   : > { %7743 = vmatpush2.bf16.msra.mxu1 %v10527_v27  ;;  %v7369_v40 = vpop.f32.mrf.mxu0  ;;  %7677 = vmatprep.subr.bf16.mxu0 %v10532_v31  ;;  %v10554_v60 = vld [vmem:[#allocation4 + $0x1a20] ss:$16 sps:$4 sm:$0xff]   ;;  %v10557_v27 = vld [vmem:[#allocation4 + $0xa8] ss:$16 sps:$4 sm:$0xff]   ;;  %v10565_v31 = vld [vmem:[#allocation4 + $0x8c] ss:$16 sps:$4 sm:$0xff]  }
 0x3af   : > { %v7370_v10 = vadd.f32 %v7369_v40, %v12034_v62  ;;  %v12056_v25 = vadd.f32 %v7410_v26, %v7368_v21  ;;  %7744 = vmatprep.subr.bf16.mxu1 %v10535_v0  ;;  %v10550_v62 = vld [vmem:[#allocation4 + $0x1a44] ss:$16 sps:$4 sm:$0xff]   ;;  %v10560_v63 = vld [vmem:[#allocation4 + $0x1a00] ss:$16 sps:$4 sm:$0xff]   ;;  %v10563_v0 = vld [vmem:[#allocation4 + $0x88] ss:$16 sps:$4 sm:$0xff]  }
 0x3b0   : > { %v10562_v26 = vld [vmem:[#allocation4 + $0x1a04] ss:$16 sps:$4 sm:$0xff]   ;;  %v10566_v21 = vld [vmem:[#allocation4 + $0x1be0] ss:$16 sps:$4 sm:$0xff]  }
 0x3b1   : > { %v12058_v37 = vadd.f32 %v7412_v42, %v7370_v10  ;;  %7678 = vmatpush1.bf16.msra.mxu0 %v10530_v39  ;;  %v10568_v7 = vld [vmem:[#allocation4 + $0x1be4] ss:$16 sps:$4 sm:$0xff]   ;;  %v10569_v39 = vld [vmem:[#allocation4 + $0x68] ss:$16 sps:$4 sm:$0xff]   ;;  %v10577_v42 = vld [vmem:[#allocation4 + $0x4c] ss:$16 sps:$4 sm:$0xff]  }
 0x3b2   : > { %7745 = vmatpush2.bf16.msra.mxu1 %v10533_v45  ;;  %7679 = vmatprep.subr.bf16.mxu0 %v10538_v18  ;;  %v10574_v40 = vld [vmem:[#allocation4 + $0x1bc4] ss:$16 sps:$4 sm:$0xff]   ;;  %v10572_v45 = vld [vmem:[#allocation4 + $0x1bc0] ss:$16 sps:$4 sm:$0xff]   ;;  %v10575_v18 = vld [vmem:[#allocation4 + $0x48] ss:$16 sps:$4 sm:$0xff]  }
 0x3b3   : > { %7746 = vmatprep.subr.bf16.mxu1 %v10541_v11  ;;  %v10580_v10 = vld [vmem:[#allocation4 + $0x1ba4] ss:$16 sps:$4 sm:$0xff]   ;;  %v10583_v11 = vld [vmem:[#allocation4 + $0x2c] ss:$16 sps:$4 sm:$0xff]  }
 0x3b5   : > { %7680 = vmatpush1.bf16.msra.mxu0 %v10536_v20  ;;  %v10578_v20 = vld [vmem:[#allocation4 + $0x1ba0] ss:$16 sps:$4 sm:$0xff]  }
 0x3b6   : > { %7747 = vmatpush2.bf16.msra.mxu1 %v10539_v57  ;;  %7681 = vmatprep.subr.bf16.mxu0 %v10544_v35  ;;  %v10581_v57 = vld [vmem:[#allocation4 + $0x28] ss:$16 sps:$4 sm:$0xff]   ;;  %v10586_v35 = vld [vmem:[#allocation4 + $0x1b84] ss:$16 sps:$4 sm:$0xff]  }
 0x3b7   : > { %7802 = vmatprep.subr.bf16.mxu1 %v10547_v47  ;;  %v10589_v47 = vld [vmem:[#allocation4 + $0xc] ss:$16 sps:$4 sm:$0xff]  }
 0x3b9   : > { %7749 = vmatmul.mubr.bf16.vlgmr.msra.gmra.mxu1 %v11952_v48  ;;  %7682 = vmatpush1.bf16.msra.mxu0 %v10542_v2  ;;  %v10584_v2 = vld [vmem:[#allocation4 + $0x1b80] ss:$16 sps:$4 sm:$0xff]  }
 0x3ba   : > { %7803 = vmatpush1.bf16.msra.mxu1 %v10545_v3  ;;  %7834 = vmatprep.mubr.bf16.mxu1 %v11838_v51  ;;  %v10571_v51 = vld [vmem:[#allocation4 + $0x6c] ss:$16 sps:$4 sm:$0xff]   ;;  %v10587_v3 = vld [vmem:[#allocation4 + $0x8] ss:$16 sps:$4 sm:$0xff]  }
 0x3bb   : > { %7683 = vmatprep.subr.bf16.mxu0 %v10550_v62  ;;  %7804 = vmatprep.subr.bf16.mxu1 %v10553_v22  ;;  %v10592_v62 = vld [vmem:[#allocation4 + $0x1b64] ss:$16 sps:$4 sm:$0xff]   ;;  %v10595_v22 = vld [vmem:[#allocation4 + $0x1ec] ss:$16 sps:$4 sm:$0xff]  }
 0x3bd   : > { %7684 = vmatpush1.bf16.msra.mxu0 %v10548_v49  ;;  %v10590_v49 = vld [vmem:[#allocation4 + $0x1b60] ss:$16 sps:$4 sm:$0xff]  }
 0x3be   : > { %7805 = vmatpush1.bf16.msra.mxu1 %v10551_v23  ;;  %7685 = vmatprep.subr.bf16.mxu0 %v10556_v16  ;;  %v10593_v23 = vld [vmem:[#allocation4 + $0x1e8] ss:$16 sps:$4 sm:$0xff]   ;;  %v10598_v16 = vld [vmem:[#allocation4 + $0x1b44] ss:$16 sps:$4 sm:$0xff]  }
 0x3bf   : > { %7806 = vmatprep.subr.bf16.mxu1 %v10559_v46  ;;  %v10601_v46 = vld [vmem:[#allocation4 + $0x1cc] ss:$16 sps:$4 sm:$0xff]  }
 0x3c1   : > { %7686 = vmatpush1.bf16.msra.mxu0 %v10554_v60  ;;  %v10596_v60 = vld [vmem:[#allocation4 + $0x1b40] ss:$16 sps:$4 sm:$0xff]  }
 0x3c2   : > { %7807 = vmatpush1.bf16.msra.mxu1 %v10557_v27  ;;  %7687 = vmatprep.subr.bf16.mxu0 %v10562_v26  ;;  %v10599_v27 = vld [vmem:[#allocation4 + $0x1c8] ss:$16 sps:$4 sm:$0xff]   ;;  %v10604_v26 = vld [vmem:[#allocation4 + $0x1b24] ss:$16 sps:$4 sm:$0xff]  }
 0x3c3   : > { %7808 = vmatprep.subr.bf16.mxu1 %v10565_v31  ;;  %v10607_v31 = vld [vmem:[#allocation4 + $0x1ac] ss:$16 sps:$4 sm:$0xff]  }
 0x3c5   : > { %7688 = vmatpush1.bf16.msra.mxu0 %v10560_v63  ;;  %v10602_v63 = vld [vmem:[#allocation4 + $0x1b20] ss:$16 sps:$4 sm:$0xff]  }
 0x3c6   : > { %7809 = vmatpush1.bf16.msra.mxu1 %v10563_v0  ;;  %7689 = vmatprep.subr.bf16.mxu0 %v10568_v7  ;;  %v10605_v0 = vld [vmem:[#allocation4 + $0x1a8] ss:$16 sps:$4 sm:$0xff]   ;;  %v10610_v7 = vld [vmem:[#allocation4 + $0x1b04] ss:$16 sps:$4 sm:$0xff]  }
 0x3c7   : > { %7810 = vmatprep.subr.bf16.mxu1 %v10571_v51  ;;  %v10613_v51 = vld [vmem:[#allocation4 + $0x18c] ss:$16 sps:$4 sm:$0xff]  }
 0x3c9   : > { %7690 = vmatpush2.bf16.msra.mxu0 %v10566_v21  ;;  %v10608_v21 = vld [vmem:[#allocation4 + $0x1b00] ss:$16 sps:$4 sm:$0xff]  }
 0x3ca   : > { %7811 = vmatpush1.bf16.msra.mxu1 %v10569_v39  ;;  %7691 = vmatprep.subr.bf16.mxu0 %v10574_v40  ;;  %v10611_v39 = vld [vmem:[#allocation4 + $0x188] ss:$16 sps:$4 sm:$0xff]   ;;  %v10616_v40 = vld [vmem:[#allocation4 + $0x1ee4] ss:$16 sps:$4 sm:$0xff]  }
 0x3cb   : > { %7812 = vmatprep.subr.bf16.mxu1 %v10577_v42  ;;  %v10619_v42 = vld [vmem:[#allocation4 + $0x16c] ss:$16 sps:$4 sm:$0xff]  }
 0x3cd   : > { %7692 = vmatpush2.bf16.msra.mxu0 %v10572_v45  ;;  %v7492_v45 = vpop.f32.mrf.mxu1 }
 0x3ce   : > { %7813 = vmatpush1.bf16.msra.mxu1 %v10575_v18  ;;  %7693 = vmatprep.subr.bf16.mxu0 %v10580_v10  ;;  %v10614_v18 = vld [vmem:[#allocation4 + $0x1ee0] ss:$16 sps:$4 sm:$0xff]   ;;  %v10617_v10 = vld [vmem:[#allocation4 + $0x168] ss:$16 sps:$4 sm:$0xff]  }
 0x3cf   : > { %7814 = vmatprep.subr.bf16.mxu1 %v10583_v11  ;;  %v10622_v11 = vld [vmem:[#allocation4 + $0x1ec4] ss:$16 sps:$4 sm:$0xff]  }
 0x3d1   : > { %7694 = vmatpush2.bf16.msra.mxu0 %v10578_v20  ;;  %v12064_v20 = vpack.c.bf16 %v11992_v5, %v11956_v61 }
 0x3d2   : > { %7815 = vmatpush1.bf16.msra.mxu1 %v10581_v57  ;;  %7695 = vmatprep.subr.bf16.mxu0 %v10586_v35  ;;  %v10625_v57 = vld [vmem:[#allocation4 + $0x14c] ss:$16 sps:$4 sm:$0xff]  }
 0x3d3   : > { %7816 = vmatprep.subr.bf16.mxu1 %v10589_v47  ;;  %v7494_v47 = vpop.f32.mrf.mxu1 }
 0x3d5   : > { %7696 = vmatpush2.bf16.msra.mxu0 %v10584_v2 }
 0x3d6   : > { %7817 = vmatpush1.bf16.msra.mxu1 %v10587_v3  ;;  %7697 = vmatprep.subr.bf16.mxu0 %v10592_v62  ;;  %v10620_v3 = vld [vmem:[#allocation4 + $0x1ec0] ss:$16 sps:$4 sm:$0xff]  }
 0x3d7   : > { %7818 = vmatprep.subr.bf16.mxu1 %v10595_v22  ;;  %v10623_v22 = vld [vmem:[#allocation4 + $0x148] ss:$16 sps:$4 sm:$0xff]  }
 0x3d9   : > { %7698 = vmatpush2.bf16.msra.mxu0 %v10590_v49  ;;  %v10628_v49 = vld [vmem:[#allocation4 + $0x1ea4] ss:$16 sps:$4 sm:$0xff]  }
 0x3da   : > { %7819 = vmatpush2.bf16.msra.mxu1 %v10593_v23  ;;  %7699 = vmatprep.subr.bf16.mxu0 %v10598_v16  ;;  %v10631_v23 = vld [vmem:[#allocation4 + $0x12c] ss:$16 sps:$4 sm:$0xff]  }
 0x3db   : > { %7820 = vmatprep.subr.bf16.mxu1 %v10601_v46  ;;  %v7496_v46 = vpop.f32.mrf.mxu1 }
 0x3dd   : > { %7700 = vmatpush2.bf16.msra.mxu0 %v10596_v60 }
 0x3de   : > { %7821 = vmatpush2.bf16.msra.mxu1 %v10599_v27  ;;  %7701 = vmatprep.subr.bf16.mxu0 %v10604_v26  ;;  %v10626_v27 = vld [vmem:[#allocation4 + $0x1ea0] ss:$16 sps:$4 sm:$0xff]  }
 0x3df   : > { %7822 = vmatprep.subr.bf16.mxu1 %v10607_v31  ;;  %v10629_v31 = vld [vmem:[#allocation4 + $0x128] ss:$16 sps:$4 sm:$0xff]  }
 0x3e1   : > { %7702 = vmatpush2.bf16.msra.mxu0 %v10602_v63  ;;  %v10634_v63 = vld [vmem:[#allocation4 + $0x1e84] ss:$16 sps:$4 sm:$0xff]  }
 0x3e2   : > { %7823 = vmatpush2.bf16.msra.mxu1 %v10605_v0  ;;  %7703 = vmatprep.subr.bf16.mxu0 %v10610_v7  ;;  %v10637_v7 = vld [vmem:[#allocation4 + $0x10c] ss:$16 sps:$4 sm:$0xff]  }
 0x3e3   : > { %7824 = vmatprep.subr.bf16.mxu1 %v10613_v51  ;;  %v7498_v51 = vpop.f32.mrf.mxu1 }
 0x3e5   : > { %7704 = vmatpush2.bf16.msra.mxu0 %v10608_v21 }
 0x3e6   : > { %7825 = vmatpush2.bf16.msra.mxu1 %v10611_v39  ;;  %7759 = vmatprep.subr.bf16.mxu0 %v10616_v40  ;;  %v10635_v39 = vld [vmem:[#allocation4 + $0x108] ss:$16 sps:$4 sm:$0xff]   ;;  %v10640_v40 = vld [vmem:[#allocation4 + $0x1e64] ss:$16 sps:$4 sm:$0xff]  }
 0x3e7   : > { %7826 = vmatprep.subr.bf16.mxu1 %v10619_v42  ;;  %v10643_v42 = vld [vmem:[#allocation4 + $0x4ec] ss:$16 sps:$4 sm:$0xff]  }
 0x3e8   : > { %v7449_v35 = vpop.f32.mrf.mxu0  ;;  %7706 = vmatmul.mubr.bf16.vlgmr.msra.gmra.mxu0 %v11946_v8 }
 0x3e9   : > { %v7450_v2 = vadd.f32 %v7449_v35, %v12050_v9  ;;  %7760 = vmatpush1.bf16.msra.mxu0 %v10614_v18  ;;  %7791 = vmatprep.mubr.bf16.mxu0 %v12064_v20  ;;  %v10646_v18 = vld [vmem:[#allocation4 + $0x1e44] ss:$16 sps:$4 sm:$0xff]  }
 0x3ea   : > { %7827 = vmatpush2.bf16.msra.mxu1 %v10617_v10  ;;  %v7451_v62 = vpop.f32.mrf.mxu0  ;;  %7761 = vmatprep.subr.bf16.mxu0 %v10622_v11  ;;  %v10649_v10 = vld [vmem:[#allocation4 + $0x4cc] ss:$16 sps:$4 sm:$0xff]   ;;  %v10644_v11 = vld [vmem:[#allocation4 + $0x1e40] ss:$16 sps:$4 sm:$0xff]   ;;  %v10652_v35 = vld [vmem:[#allocation4 + $0x1e24] ss:$16 sps:$4 sm:$0xff]  }
 0x3eb   : > { %v7452_v61 = vadd.f32 %v7451_v62, %v12053_v12  ;;  %v12070_v5 = vadd.f32 %v7492_v45, %v7450_v2  ;;  %7828 = vmatprep.subr.bf16.mxu1 %v10625_v57  ;;  %v10638_v45 = vld [vmem:[#allocation4 + $0x1e60] ss:$16 sps:$4 sm:$0xff]   ;;  %v10647_v57 = vld [vmem:[#allocation4 + $0x4c8] ss:$16 sps:$4 sm:$0xff]   ;;  %v10658_v62 = vld [vmem:[#allocation4 + $0x1e04] ss:$16 sps:$4 sm:$0xff]  }
 0x3ec   : > { %v7453_v16 = vpop.f32.mrf.mxu0  ;;  %v10650_v2 = vld [vmem:[#allocation4 + $0x1e20] ss:$16 sps:$4 sm:$0xff]  }
 0x3ed   : > { %v7454_v60 = vadd.f32 %v7453_v16, %v12056_v25  ;;  %v12073_v9 = vadd.f32 %v7494_v47, %v7452_v61  ;;  %7762 = vmatpush1.bf16.msra.mxu0 %v10620_v3  ;;  %v10632_v25 = vld [vmem:[#allocation4 + $0x1e80] ss:$16 sps:$4 sm:$0xff]   ;;  %v10655_v47 = vld [vmem:[#allocation4 + $0x4ac] ss:$16 sps:$4 sm:$0xff]   ;;  %v10653_v3 = vld [vmem:[#allocation4 + $0x4a8] ss:$16 sps:$4 sm:$0xff]  }
 0x3ee   : > { %7829 = vmatpush2.bf16.msra.mxu1 %v10623_v22  ;;  %v7455_v26 = vpop.f32.mrf.mxu0  ;;  %7763 = vmatprep.subr.bf16.mxu0 %v10628_v49  ;;  %v10661_v22 = vld [vmem:[#allocation4 + $0x48c] ss:$16 sps:$4 sm:$0xff]   ;;  %v10659_v49 = vld [vmem:[#allocation4 + $0x488] ss:$16 sps:$4 sm:$0xff]   ;;  %v10664_v61 = vld [vmem:[#allocation4 + $0x1fe4] ss:$16 sps:$4 sm:$0xff]  }
 0x3ef   : > { %v7456_v0 = vadd.f32 %v7455_v26, %v12058_v37  ;;  %v12076_v12 = vadd.f32 %v7496_v46, %v7454_v60  ;;  %7830 = vmatprep.subr.bf16.mxu1 %v10631_v23  ;;  %v10641_v37 = vld [vmem:[#allocation4 + $0x4e8] ss:$16 sps:$4 sm:$0xff]   ;;  %v10662_v23 = vld [vmem:[#allocation4 + $0x1fe0] ss:$16 sps:$4 sm:$0xff]   ;;  %v10670_v46 = vld [vmem:[#allocation4 + $0x1fc4] ss:$16 sps:$4 sm:$0xff]  }
 0x3f0   : > { %v10665_v16 = vld [vmem:[#allocation4 + $0x468] ss:$16 sps:$4 sm:$0xff]   ;;  %v10673_v60 = vld [vmem:[#allocation4 + $0x44c] ss:$16 sps:$4 sm:$0xff]  }
 0x3f1   : > { %v12078_v21 = vadd.f32 %v7498_v51, %v7456_v0  ;;  %7764 = vmatpush1.bf16.msra.mxu0 %v10626_v27  ;;  %v10668_v27 = vld [vmem:[#allocation4 + $0x1fc0] ss:$16 sps:$4 sm:$0xff]   ;;  %v10671_v26 = vld [vmem:[#allocation4 + $0x448] ss:$16 sps:$4 sm:$0xff]   ;;  %v10682_v51 = vld [vmem:[#allocation4 + $0x1f84] ss:$16 sps:$4 sm:$0xff]  }
 0x3f2   : > { %7831 = vmatpush2.bf16.msra.mxu1 %v10629_v31  ;;  %7765 = vmatprep.subr.bf16.mxu0 %v10634_v63  ;;  %v10676_v31 = vld [vmem:[#allocation4 + $0x1fa4] ss:$16 sps:$4 sm:$0xff]   ;;  %v10679_v63 = vld [vmem:[#allocation4 + $0x42c] ss:$16 sps:$4 sm:$0xff]   ;;  %v10674_v0 = vld [vmem:[#allocation4 + $0x1fa0] ss:$16 sps:$4 sm:$0xff]  }
 0x3f3   : > { %7832 = vmatprep.subr.bf16.mxu1 %v10637_v7  ;;  %v10677_v7 = vld [vmem:[#allocation4 + $0x428] ss:$16 sps:$4 sm:$0xff]  }
 0x3f5   : > { %7766 = vmatpush1.bf16.msra.mxu0 %v10632_v25  ;;  %v10685_v25 = vld [vmem:[#allocation4 + $0x40c] ss:$16 sps:$4 sm:$0xff]  }
 0x3f6   : > { %7833 = vmatpush2.bf16.msra.mxu1 %v10635_v39  ;;  %7767 = vmatprep.subr.bf16.mxu0 %v10640_v40  ;;  %v10680_v39 = vld [vmem:[#allocation4 + $0x1f80] ss:$16 sps:$4 sm:$0xff]   ;;  %v10683_v40 = vld [vmem:[#allocation4 + $0x408] ss:$16 sps:$4 sm:$0xff]  }
 0x3f7   : > { %7888 = vmatprep.subr.bf16.mxu1 %v10643_v42  ;;  %v10688_v42 = vld [vmem:[#allocation4 + $0x1f64] ss:$16 sps:$4 sm:$0xff]  }
 0x3f9   : > { %7835 = vmatmul.mubr.bf16.vlgmr.msra.gmra.mxu1 %v11840_v4  ;;  %7768 = vmatpush1.bf16.msra.mxu0 %v10638_v45  ;;  %v10656_v4 = vld [vmem:[#allocation4 + $0x1e00] ss:$16 sps:$4 sm:$0xff]   ;;  %v10691_v45 = vld [vmem:[#allocation4 + $0x5ec] ss:$16 sps:$4 sm:$0xff]  }
 0x3fa   : > { %7889 = vmatpush1.bf16.msra.mxu1 %v10641_v37  ;;  %7920 = vmatprep.mubr.bf16.mxu1 %v11853_v58  ;;  %v10667_v58 = vld [vmem:[#allocation4 + $0x46c] ss:$16 sps:$4 sm:$0xff]   ;;  %v10686_v37 = vld [vmem:[#allocation4 + $0x1f60] ss:$16 sps:$4 sm:$0xff]  }
 0x3fb   : > { %7769 = vmatprep.subr.bf16.mxu0 %v10646_v18  ;;  %7890 = vmatprep.subr.bf16.mxu1 %v10649_v10  ;;  %v10689_v18 = vld [vmem:[#allocation4 + $0x5e8] ss:$16 sps:$4 sm:$0xff]   ;;  %v10694_v10 = vld [vmem:[#allocation4 + $0x1f44] ss:$16 sps:$4 sm:$0xff]  }
 0x3fd   : > { %7770 = vmatpush1.bf16.msra.mxu0 %v10644_v11  ;;  %v10697_v11 = vld [vmem:[#allocation4 + $0x5cc] ss:$16 sps:$4 sm:$0xff]  }
 0x3fe   : > { %7891 = vmatpush1.bf16.msra.mxu1 %v10647_v57  ;;  %7771 = vmatprep.subr.bf16.mxu0 %v10652_v35  ;;  %v10692_v57 = vld [vmem:[#allocation4 + $0x1f40] ss:$16 sps:$4 sm:$0xff]   ;;  %v10695_v35 = vld [vmem:[#allocation4 + $0x5c8] ss:$16 sps:$4 sm:$0xff]  }
 0x3ff   : > { %7892 = vmatprep.subr.bf16.mxu1 %v10655_v47  ;;  %v10700_v47 = vld [vmem:[#allocation4 + $0x1f24] ss:$16 sps:$4 sm:$0xff]  }
 0x401   : > { %7772 = vmatpush1.bf16.msra.mxu0 %v10650_v2  ;;  %v10703_v2 = vld [vmem:[#allocation4 + $0x5ac] ss:$16 sps:$4 sm:$0xff]  }
 0x402   : > { %7893 = vmatpush1.bf16.msra.mxu1 %v10653_v3  ;;  %7773 = vmatprep.subr.bf16.mxu0 %v10658_v62  ;;  %v10698_v3 = vld [vmem:[#allocation4 + $0x1f20] ss:$16 sps:$4 sm:$0xff]   ;;  %v10701_v62 = vld [vmem:[#allocation4 + $0x5a8] ss:$16 sps:$4 sm:$0xff]  }
 0x403   : > { %7894 = vmatprep.subr.bf16.mxu1 %v10661_v22  ;;  %v10706_v22 = vld [vmem:[#allocation4 + $0x1f04] ss:$16 sps:$4 sm:$0xff]  }
 0x405   : > { %7774 = vmatpush1.bf16.msra.mxu0 %v10656_v4  ;;  %v10709_v4 = vld [vmem:[#allocation4 + $0x58c] ss:$16 sps:$4 sm:$0xff]  }
 0x406   : > { %7895 = vmatpush1.bf16.msra.mxu1 %v10659_v49  ;;  %7775 = vmatprep.subr.bf16.mxu0 %v10664_v61  ;;  %v10704_v49 = vld [vmem:[#allocation4 + $0x1f00] ss:$16 sps:$4 sm:$0xff]   ;;  %v10707_v61 = vld [vmem:[#allocation4 + $0x588] ss:$16 sps:$4 sm:$0xff]  }
 0x407   : > { %7896 = vmatprep.subr.bf16.mxu1 %v10667_v58  ;;  %v10712_v58 = vld [vmem:[#allocation4 + $0x2ec] ss:$16 sps:$4 sm:$0xff]  }
 0x409   : > { %7776 = vmatpush2.bf16.msra.mxu0 %v10662_v23  ;;  %v10715_v23 = vld [vmem:[#allocation4 + $0x56c] ss:$16 sps:$4 sm:$0xff]  }
 0x40a   : > { %7897 = vmatpush1.bf16.msra.mxu1 %v10665_v16  ;;  %7777 = vmatprep.subr.bf16.mxu0 %v10670_v46  ;;  %v7578_v16 = vpop.f32.mrf.mxu1  ;;  %v10710_v46 = vld [vmem:[#allocation4 + $0x2e8] ss:$16 sps:$4 sm:$0xff]  }
 0x40b   : > { %7898 = vmatprep.subr.bf16.mxu1 %v10673_v60  ;;  %v10713_v60 = vld [vmem:[#allocation4 + $0x568] ss:$16 sps:$4 sm:$0xff]  }
 0x40d   : > { %7778 = vmatpush2.bf16.msra.mxu0 %v10668_v27  ;;  %v10718_v27 = vld [vmem:[#allocation4 + $0x2cc] ss:$16 sps:$4 sm:$0xff]  }
 0x40e   : > { %7899 = vmatpush1.bf16.msra.mxu1 %v10671_v26  ;;  %7779 = vmatprep.subr.bf16.mxu0 %v10676_v31  ;;  %v10721_v26 = vld [vmem:[#allocation4 + $0x54c] ss:$16 sps:$4 sm:$0xff]   ;;  %v7580_v31 = vpop.f32.mrf.mxu1 }
 0x40f   : > { %7900 = vmatprep.subr.bf16.mxu1 %v10679_v63 }
 0x411   : > { %7780 = vmatpush2.bf16.msra.mxu0 %v10674_v0 }
 0x412   : > { %7901 = vmatpush1.bf16.msra.mxu1 %v10677_v7  ;;  %7781 = vmatprep.subr.bf16.mxu0 %v10682_v51  ;;  %v10716_v7 = vld [vmem:[#allocation4 + $0x2c8] ss:$16 sps:$4 sm:$0xff]  }
 0x413   : > { %7902 = vmatprep.subr.bf16.mxu1 %v10685_v25  ;;  %v10719_v25 = vld [vmem:[#allocation4 + $0x548] ss:$16 sps:$4 sm:$0xff]  }
 0x415   : > { %7782 = vmatpush2.bf16.msra.mxu0 %v10680_v39  ;;  %v10724_v39 = vld [vmem:[#allocation4 + $0x2ac] ss:$16 sps:$4 sm:$0xff]  }
 0x416   : > { %7903 = vmatpush1.bf16.msra.mxu1 %v10683_v40  ;;  %7783 = vmatprep.subr.bf16.mxu0 %v10688_v42  ;;  %v10727_v42 = vld [vmem:[#allocation4 + $0x52c] ss:$16 sps:$4 sm:$0xff]  }
 0x417   : > { %7904 = vmatprep.subr.bf16.mxu1 %v10691_v45 }
 0x419   : > { %7784 = vmatpush2.bf16.msra.mxu0 %v10686_v37  ;;  %v7582_v37 = vpop.f32.mrf.mxu1 }
 0x41a   : > { %7905 = vmatpush2.bf16.msra.mxu1 %v10689_v18  ;;  %7785 = vmatprep.subr.bf16.mxu0 %v10694_v10 }
 0x41b   : > { %7906 = vmatprep.subr.bf16.mxu1 %v10697_v11 }
 0x41d   : > { %7786 = vmatpush2.bf16.msra.mxu0 %v10692_v57  ;;  %v10725_v57 = vld [vmem:[#allocation4 + $0x528] ss:$16 sps:$4 sm:$0xff]  }
 0x41e   : > { %7907 = vmatpush2.bf16.msra.mxu1 %v10695_v35  ;;  %7787 = vmatprep.subr.bf16.mxu0 %v10700_v47  ;;  %v10730_v35 = vld [vmem:[#allocation4 + $0x28c] ss:$16 sps:$4 sm:$0xff]  }
 0x41f   : > { %7908 = vmatprep.subr.bf16.mxu1 %v10703_v2 }
 0x421   : > { %7788 = vmatpush2.bf16.msra.mxu0 %v10698_v3  ;;  %v7584_v3 = vpop.f32.mrf.mxu1 }
 0x422   : > { %7909 = vmatpush2.bf16.msra.mxu1 %v10701_v62  ;;  %7789 = vmatprep.subr.bf16.mxu0 %v10706_v22  ;;  %v10728_v62 = vld [vmem:[#allocation4 + $0x288] ss:$16 sps:$4 sm:$0xff]  }
 0x423   : > { %7910 = vmatprep.subr.bf16.mxu1 %v10709_v4  ;;  %v10736_v4 = vld [vmem:[#allocation4 + $0x26c] ss:$16 sps:$4 sm:$0xff]  }
 0x425   : > { %7790 = vmatpush2.bf16.msra.mxu0 %v10704_v49  ;;  %v10739_v49 = vld [vmem:[#allocation4 + $0x8ec] ss:$16 sps:$4 sm:$0xff]  }
 0x426   : > { %7911 = vmatpush2.bf16.msra.mxu1 %v10707_v61  ;;  %7845 = vmatprep.subr.bf16.mxu0 %v10712_v58  ;;  %v10734_v61 = vld [vmem:[#allocation4 + $0x268] ss:$16 sps:$4 sm:$0xff]   ;;  %v10742_v58 = vld [vmem:[#allocation4 + $0x24c] ss:$16 sps:$4 sm:$0xff]  }
 0x427   : > { %7912 = vmatprep.subr.bf16.mxu1 %v10715_v23  ;;  %v10745_v23 = vld [vmem:[#allocation4 + $0x8cc] ss:$16 sps:$4 sm:$0xff]  }
 0x428   : > { %v7535_v63 = vpop.f32.mrf.mxu0  ;;  %7792 = vmatmul.mubr.bf16.vlgmr.msra.gmra.mxu0 %v11958_v24 }
 0x429   : > { %v7536_v0 = vadd.f32 %v7535_v63, %v12070_v5  ;;  %7846 = vmatpush1.bf16.msra.mxu0 %v10710_v46  ;;  %7877 = vmatprep.mubr.bf16.mxu0 %v11848_v43  ;;  %v10722_v5 = vld [vmem:[#allocation4 + $0x2a8] ss:$16 sps:$4 sm:$0xff]   ;;  %v10754_v63 = vld [vmem:[#allocation4 + $0x20c] ss:$16 sps:$4 sm:$0xff]  }
 0x42a   : > { %7913 = vmatpush2.bf16.msra.mxu1 %v10713_v60  ;;  %v7537_v51 = vpop.f32.mrf.mxu0  ;;  %7847 = vmatprep.subr.bf16.mxu0 %v10718_v27  ;;  %v10743_v46 = vld [vmem:[#allocation4 + $0x8c8] ss:$16 sps:$4 sm:$0xff]   ;;  %v10748_v60 = vld [vmem:[#allocation4 + $0x22c] ss:$16 sps:$4 sm:$0xff]  }
 0x42b   : > { %v7538_v40 = vadd.f32 %v7537_v51, %v12073_v9  ;;  %7914 = vmatprep.subr.bf16.mxu1 %v10721_v26  ;;  %v12086_v45 = vadd.f32 %v7578_v16, %v7536_v0  ;;  %v10733_v9 = vld [vmem:[#allocation4 + $0x50c] ss:$16 sps:$4 sm:$0xff]   ;;  %v10740_v16 = vld [vmem:[#allocation4 + $0x248] ss:$16 sps:$4 sm:$0xff]  }
 0x42c   : > { %v7539_v18 = vpop.f32.mrf.mxu0  ;;  %v10751_v27 = vld [vmem:[#allocation4 + $0x8ac] ss:$16 sps:$4 sm:$0xff]   ;;  %v10746_v26 = vld [vmem:[#allocation4 + $0x228] ss:$16 sps:$4 sm:$0xff]  }
 0x42d   : > { %v7540_v10 = vadd.f32 %v7539_v18, %v12076_v12  ;;  %7848 = vmatpush1.bf16.msra.mxu0 %v10716_v7  ;;  %v12089_v11 = vadd.f32 %v7580_v31, %v7538_v40  ;;  %v10731_v12 = vld [vmem:[#allocation4 + $0x508] ss:$16 sps:$4 sm:$0xff]   ;;  %v10757_v0 = vld [vmem:[#allocation4 + $0x88c] ss:$16 sps:$4 sm:$0xff]  }
 0x42e   : > { %7915 = vmatpush2.bf16.msra.mxu1 %v10719_v25  ;;  %v7541_v43 = vpop.f32.mrf.mxu0  ;;  %7849 = vmatprep.subr.bf16.mxu0 %v10724_v39  ;;  %v10749_v31 = vld [vmem:[#allocation4 + $0x8a8] ss:$16 sps:$4 sm:$0xff]   ;;  %v10760_v51 = vld [vmem:[#allocation4 + $0x3ec] ss:$16 sps:$4 sm:$0xff]  }
 0x42f   : > { %v7542_v47 = vadd.f32 %v7541_v43, %v12078_v21  ;;  %7916 = vmatprep.subr.bf16.mxu1 %v10727_v42  ;;  %v12092_v2 = vadd.f32 %v7582_v37, %v7540_v10  ;;  %v10737_v21 = vld [vmem:[#allocation4 + $0x8e8] ss:$16 sps:$4 sm:$0xff]   ;;  %v10766_v40 = vld [vmem:[#allocation4 + $0x3cc] ss:$16 sps:$4 sm:$0xff]  }
 0x430   : > { %v10755_v7 = vld [vmem:[#allocation4 + $0x888] ss:$16 sps:$4 sm:$0xff]   ;;  %v10769_v42 = vld [vmem:[#allocation4 + $0x84c] ss:$16 sps:$4 sm:$0xff]  }
 0x431   : > { %7850 = vmatpush1.bf16.msra.mxu0 %v10722_v5  ;;  %v12094_v22 = vadd.f32 %v7584_v3, %v7542_v47  ;;  %v10758_v25 = vld [vmem:[#allocation4 + $0x3e8] ss:$16 sps:$4 sm:$0xff]   ;;  %v10772_v10 = vld [vmem:[#allocation4 + $0x3ac] ss:$16 sps:$4 sm:$0xff]  }
 0x432   : > { %7917 = vmatpush2.bf16.msra.mxu1 %v10725_v57  ;;  %7851 = vmatprep.subr.bf16.mxu0 %v10730_v35  ;;  %v10761_v39 = vld [vmem:[#allocation4 + $0x868] ss:$16 sps:$4 sm:$0xff]   ;;  %v10775_v5 = vld [vmem:[#allocation4 + $0x82c] ss:$16 sps:$4 sm:$0xff]  }
 0x433   : > { %7918 = vmatprep.subr.bf16.mxu1 %v10733_v9  ;;  %v10764_v37 = vld [vmem:[#allocation4 + $0x3c8] ss:$16 sps:$4 sm:$0xff]   ;;  %v10778_v35 = vld [vmem:[#allocation4 + $0x38c] ss:$16 sps:$4 sm:$0xff]  }
 0x434   : > { %v10767_v18 = vld [vmem:[#allocation4 + $0x848] ss:$16 sps:$4 sm:$0xff]   ;;  %v10781_v47 = vld [vmem:[#allocation4 + $0x80c] ss:$16 sps:$4 sm:$0xff]  }
 0x435   : > { %7852 = vmatpush1.bf16.msra.mxu0 %v10728_v62  ;;  %v10770_v43 = vld [vmem:[#allocation4 + $0x3a8] ss:$16 sps:$4 sm:$0xff]   ;;  %v10784_v62 = vld [vmem:[#allocation4 + $0x36c] ss:$16 sps:$4 sm:$0xff]  }
 0x436   : > { %7919 = vmatpush2.bf16.msra.mxu1 %v10731_v12  ;;  %7853 = vmatprep.subr.bf16.mxu0 %v10736_v4  ;;  %v10773_v57 = vld [vmem:[#allocation4 + $0x828] ss:$16 sps:$4 sm:$0xff]   ;;  %v10787_v12 = vld [vmem:[#allocation4 + $0x9ec] ss:$16 sps:$4 sm:$0xff]  }
 0x437   : > { %7974 = vmatprep.subr.bf16.mxu1 %v10739_v49  ;;  %v10776_v9 = vld [vmem:[#allocation4 + $0x388] ss:$16 sps:$4 sm:$0xff]  }
 0x438   : > { %v10779_v3 = vld [vmem:[#allocation4 + $0x808] ss:$16 sps:$4 sm:$0xff]  }
 0x439   : > { %7921 = vmatmul.mubr.bf16.vlgmr.msra.gmra.mxu1 %v11851_v29  ;;  %7854 = vmatpush1.bf16.msra.mxu0 %v10734_v61  ;;  %v10752_v29 = vld [vmem:[#allocation4 + $0x208] ss:$16 sps:$4 sm:$0xff]   ;;  %v10790_v61 = vld [vmem:[#allocation4 + $0x34c] ss:$16 sps:$4 sm:$0xff]  }
 0x43a   : > { %7975 = vmatpush1.bf16.msra.mxu1 %v10737_v21  ;;  %8006 = vmatprep.mubr.bf16.mxu1 %v11867_v30  ;;  %v10763_v30 = vld [vmem:[#allocation4 + $0x86c] ss:$16 sps:$4 sm:$0xff]   ;;  %v10782_v4 = vld [vmem:[#allocation4 + $0x368] ss:$16 sps:$4 sm:$0xff]  }
 0x43b   : > { %7855 = vmatprep.subr.bf16.mxu0 %v10742_v58  ;;  %7976 = vmatprep.subr.bf16.mxu1 %v10745_v23  ;;  %v10785_v49 = vld [vmem:[#allocation4 + $0x9e8] ss:$16 sps:$4 sm:$0xff]   ;;  %v10793_v21 = vld [vmem:[#allocation4 + $0x9cc] ss:$16 sps:$4 sm:$0xff]  }
 0x43c   : > { %v10788_v58 = vld [vmem:[#allocation4 + $0x348] ss:$16 sps:$4 sm:$0xff]  }
 0x43d   : > { %7856 = vmatpush1.bf16.msra.mxu0 %v10740_v16  ;;  %v10791_v23 = vld [vmem:[#allocation4 + $0x9c8] ss:$16 sps:$4 sm:$0xff]   ;;  %v10796_v16 = vld [vmem:[#allocation4 + $0x32c] ss:$16 sps:$4 sm:$0xff]  }
 0x43e   : > { %7977 = vmatpush1.bf16.msra.mxu1 %v10743_v46  ;;  %7857 = vmatprep.subr.bf16.mxu0 %v10748_v60  ;;  %v10799_v46 = vld [vmem:[#allocation4 + $0x9ac] ss:$16 sps:$4 sm:$0xff]   ;;  %v10794_v60 = vld [vmem:[#allocation4 + $0x328] ss:$16 sps:$4 sm:$0xff]  }
 0x43f   : > { %7978 = vmatprep.subr.bf16.mxu1 %v10751_v27  ;;  %v10797_v27 = vld [vmem:[#allocation4 + $0x9a8] ss:$16 sps:$4 sm:$0xff]  }
 0x441   : > { %7858 = vmatpush1.bf16.msra.mxu0 %v10746_v26  ;;  %v10802_v26 = vld [vmem:[#allocation4 + $0x30c] ss:$16 sps:$4 sm:$0xff]  }
 0x442   : > { %7979 = vmatpush1.bf16.msra.mxu1 %v10749_v31  ;;  %7859 = vmatprep.subr.bf16.mxu0 %v10754_v63  ;;  %v10805_v31 = vld [vmem:[#allocation4 + $0x98c] ss:$16 sps:$4 sm:$0xff]   ;;  %v10800_v63 = vld [vmem:[#allocation4 + $0x308] ss:$16 sps:$4 sm:$0xff]  }
 0x443   : > { %7980 = vmatprep.subr.bf16.mxu1 %v10757_v0  ;;  %v10803_v0 = vld [vmem:[#allocation4 + $0x988] ss:$16 sps:$4 sm:$0xff]  }
 0x445   : > { %7860 = vmatpush1.bf16.msra.mxu0 %v10752_v29  ;;  %v10808_v29 = vld [vmem:[#allocation4 + $0x6ec] ss:$16 sps:$4 sm:$0xff]  }
 0x446   : > { %7981 = vmatpush1.bf16.msra.mxu1 %v10755_v7  ;;  %7861 = vmatprep.subr.bf16.mxu0 %v10760_v51  ;;  %v10811_v7 = vld [vmem:[#allocation4 + $0x96c] ss:$16 sps:$4 sm:$0xff]   ;;  %v7664_v51 = vpop.f32.mrf.mxu1 }
 0x447   : > { %7982 = vmatprep.subr.bf16.mxu1 %v10763_v30  ;;  %v10806_v30 = vld [vmem:[#allocation4 + $0x6e8] ss:$16 sps:$4 sm:$0xff]  }
 0x449   : > { %7862 = vmatpush2.bf16.msra.mxu0 %v10758_v25  ;;  %v10809_v25 = vld [vmem:[#allocation4 + $0x968] ss:$16 sps:$4 sm:$0xff]  }
 0x44a   : > { %7983 = vmatpush1.bf16.msra.mxu1 %v10761_v39  ;;  %7863 = vmatprep.subr.bf16.mxu0 %v10766_v40  ;;  %v10814_v39 = vld [vmem:[#allocation4 + $0x6cc] ss:$16 sps:$4 sm:$0xff]  }
 0x44b   : > { %7984 = vmatprep.subr.bf16.mxu1 %v10769_v42  ;;  %v10817_v40 = vld [vmem:[#allocation4 + $0x94c] ss:$16 sps:$4 sm:$0xff]   ;;  %v7666_v42 = vpop.f32.mrf.mxu1 }
 0x44d   : > { %7864 = vmatpush2.bf16.msra.mxu0 %v10764_v37 }
 0x44e   : > { %7985 = vmatpush1.bf16.msra.mxu1 %v10767_v18  ;;  %7865 = vmatprep.subr.bf16.mxu0 %v10772_v10  ;;  %v10812_v10 = vld [vmem:[#allocation4 + $0x6c8] ss:$16 sps:$4 sm:$0xff]  }
 0x44f   : > { %7986 = vmatprep.subr.bf16.mxu1 %v10775_v5 }
 0x451   : > { %7866 = vmatpush2.bf16.msra.mxu0 %v10770_v43  ;;  %v10815_v43 = vld [vmem:[#allocation4 + $0x948] ss:$16 sps:$4 sm:$0xff]  }
 0x452   : > { %7987 = vmatpush1.bf16.msra.mxu1 %v10773_v57  ;;  %7867 = vmatprep.subr.bf16.mxu0 %v10778_v35  ;;  %v10820_v57 = vld [vmem:[#allocation4 + $0x6ac] ss:$16 sps:$4 sm:$0xff]  }
 0x453   : > { %7988 = vmatprep.subr.bf16.mxu1 %v10781_v47  ;;  %v10823_v47 = vld [vmem:[#allocation4 + $0x92c] ss:$16 sps:$4 sm:$0xff]  }
 0x455   : > { %7868 = vmatpush2.bf16.msra.mxu0 %v10776_v9 }
 0x456   : > { %7989 = vmatpush1.bf16.msra.mxu1 %v10779_v3  ;;  %7869 = vmatprep.subr.bf16.mxu0 %v10784_v62  ;;  %v7668_v3 = vpop.f32.mrf.mxu1 }
 0x457   : > { %7990 = vmatprep.subr.bf16.mxu1 %v10787_v12 }
 0x459   : > { %7870 = vmatpush2.bf16.msra.mxu0 %v10782_v4  ;;  %v10821_v4 = vld [vmem:[#allocation4 + $0x928] ss:$16 sps:$4 sm:$0xff]  }
 0x45a   : > { %7991 = vmatpush2.bf16.msra.mxu1 %v10785_v49  ;;  %7871 = vmatprep.subr.bf16.mxu0 %v10790_v61  ;;  %v10826_v49 = vld [vmem:[#allocation4 + $0x68c] ss:$16 sps:$4 sm:$0xff]  }
 0x45b   : > { %7992 = vmatprep.subr.bf16.mxu1 %v10793_v21 }
 0x45d   : > { %7872 = vmatpush2.bf16.msra.mxu0 %v10788_v58  ;;  %v7670_v58 = vpop.f32.mrf.mxu1 }
 0x45e   : > { %7993 = vmatpush2.bf16.msra.mxu1 %v10791_v23  ;;  %7873 = vmatprep.subr.bf16.mxu0 %v10796_v16  ;;  %v10824_v23 = vld [vmem:[#allocation4 + $0x688] ss:$16 sps:$4 sm:$0xff]  }
 0x45f   : > { %7994 = vmatprep.subr.bf16.mxu1 %v10799_v46  ;;  %v10832_v46 = vld [vmem:[#allocation4 + $0x66c] ss:$16 sps:$4 sm:$0xff]  }
 0x461   : > { %7874 = vmatpush2.bf16.msra.mxu0 %v10794_v60  ;;  %v10835_v60 = vld [vmem:[#allocation4 + $0xcec] ss:$16 sps:$4 sm:$0xff]  }
 0x462   : > { %7995 = vmatpush2.bf16.msra.mxu1 %v10797_v27  ;;  %7875 = vmatprep.subr.bf16.mxu0 %v10802_v26  ;;  %v10830_v27 = vld [vmem:[#allocation4 + $0x668] ss:$16 sps:$4 sm:$0xff]   ;;  %v10838_v26 = vld [vmem:[#allocation4 + $0x64c] ss:$16 sps:$4 sm:$0xff]  }
 0x463   : > { %7996 = vmatprep.subr.bf16.mxu1 %v10805_v31  ;;  %v10841_v31 = vld [vmem:[#allocation4 + $0xccc] ss:$16 sps:$4 sm:$0xff]  }
 0x465   : > { %7876 = vmatpush2.bf16.msra.mxu0 %v10800_v63  ;;  %v10836_v63 = vld [vmem:[#allocation4 + $0x648] ss:$16 sps:$4 sm:$0xff]  }
 0x466   : > { %7997 = vmatpush2.bf16.msra.mxu1 %v10803_v0  ;;  %7931 = vmatprep.subr.bf16.mxu0 %v10808_v29  ;;  %v10839_v0 = vld [vmem:[#allocation4 + $0xcc8] ss:$16 sps:$4 sm:$0xff]   ;;  %v10844_v29 = vld [vmem:[#allocation4 + $0x62c] ss:$16 sps:$4 sm:$0xff]  }
 0x467   : > { %7998 = vmatprep.subr.bf16.mxu1 %v10811_v7  ;;  %v10847_v7 = vld [vmem:[#allocation4 + $0xcac] ss:$16 sps:$4 sm:$0xff]  }
 0x468   : > { %v7621_v37 = vpop.f32.mrf.mxu0  ;;  %7878 = vmatmul.mubr.bf16.vlgmr.msra.gmra.mxu0 %v11888_v13 }
 0x469   : > { %v7622_v18 = vadd.f32 %v7621_v37, %v12086_v45  ;;  %7932 = vmatpush1.bf16.msra.mxu0 %v10806_v30  ;;  %7963 = vmatprep.mubr.bf16.mxu0 %v11894_v19  ;;  %v10818_v45 = vld [vmem:[#allocation4 + $0x6a8] ss:$16 sps:$4 sm:$0xff]  }
 0x46a   : > { %7999 = vmatpush2.bf16.msra.mxu1 %v10809_v25  ;;  %v7623_v5 = vpop.f32.mrf.mxu0  ;;  %7933 = vmatprep.subr.bf16.mxu0 %v10814_v39  ;;  %v10845_v30 = vld [vmem:[#allocation4 + $0xca8] ss:$16 sps:$4 sm:$0xff]   ;;  %v10850_v25 = vld [vmem:[#allocation4 + $0x60c] ss:$16 sps:$4 sm:$0xff]  }
 0x46b   : > { %v7624_v35 = vadd.f32 %v7623_v5, %v12089_v11  ;;  %8000 = vmatprep.subr.bf16.mxu1 %v10817_v40  ;;  %v12102_v9 = vadd.f32 %v7664_v51, %v7622_v18  ;;  %v10829_v11 = vld [vmem:[#allocation4 + $0x90c] ss:$16 sps:$4 sm:$0xff]   ;;  %v10842_v51 = vld [vmem:[#allocation4 + $0x628] ss:$16 sps:$4 sm:$0xff]  }
 0x46c   : > { %v7625_v62 = vpop.f32.mrf.mxu0  ;;  %v10853_v39 = vld [vmem:[#allocation4 + $0xc8c] ss:$16 sps:$4 sm:$0xff]   ;;  %v10851_v40 = vld [vmem:[#allocation4 + $0xc88] ss:$16 sps:$4 sm:$0xff]  }
 0x46d   : > { %v7626_v13 = vadd.f32 %v7625_v62, %v12092_v2  ;;  %7934 = vmatpush1.bf16.msra.mxu0 %v10812_v10  ;;  %v12105_v12 = vadd.f32 %v7666_v42, %v7624_v35  ;;  %v10827_v2 = vld [vmem:[#allocation4 + $0x908] ss:$16 sps:$4 sm:$0xff]   ;;  %v10856_v42 = vld [vmem:[#allocation4 + $0x7ec] ss:$16 sps:$4 sm:$0xff]  }
 0x46e   : > { %8001 = vmatpush2.bf16.msra.mxu1 %v10815_v43  ;;  %v7627_v19 = vpop.f32.mrf.mxu0  ;;  %7935 = vmatprep.subr.bf16.mxu0 %v10820_v57  ;;  %v10854_v37 = vld [vmem:[#allocation4 + $0x7e8] ss:$16 sps:$4 sm:$0xff]   ;;  %v10862_v10 = vld [vmem:[#allocation4 + $0x7cc] ss:$16 sps:$4 sm:$0xff]  }
 0x46f   : > { %v7628_v61 = vadd.f32 %v7627_v19, %v12094_v22  ;;  %8002 = vmatprep.subr.bf16.mxu1 %v10823_v47  ;;  %v12108_v21 = vadd.f32 %v7668_v3, %v7626_v13  ;;  %v10833_v22 = vld [vmem:[#allocation4 + $0xce8] ss:$16 sps:$4 sm:$0xff]   ;;  %v10865_v5 = vld [vmem:[#allocation4 + $0xc4c] ss:$16 sps:$4 sm:$0xff]  }
 0x470   : > { %v10857_v18 = vld [vmem:[#allocation4 + $0xc68] ss:$16 sps:$4 sm:$0xff]   ;;  %v10868_v35 = vld [vmem:[#allocation4 + $0x7ac] ss:$16 sps:$4 sm:$0xff]  }
 0x471   : > { %7936 = vmatpush1.bf16.msra.mxu0 %v10818_v45  ;;  %v12110_v16 = vadd.f32 %v7670_v58, %v7628_v61  ;;  %v10860_v43 = vld [vmem:[#allocation4 + $0x7c8] ss:$16 sps:$4 sm:$0xff]   ;;  %v10871_v47 = vld [vmem:[#allocation4 + $0xc2c] ss:$16 sps:$4 sm:$0xff]  }
 0x472   : > { %8003 = vmatpush2.bf16.msra.mxu1 %v10821_v4  ;;  %7937 = vmatprep.subr.bf16.mxu0 %v10826_v49  ;;  %v10863_v57 = vld [vmem:[#allocation4 + $0xc48] ss:$16 sps:$4 sm:$0xff]   ;;  %v10874_v13 = vld [vmem:[#allocation4 + $0x78c] ss:$16 sps:$4 sm:$0xff]  }
 0x473   : > { %8004 = vmatprep.subr.bf16.mxu1 %v10829_v11  ;;  %v10866_v3 = vld [vmem:[#allocation4 + $0x7a8] ss:$16 sps:$4 sm:$0xff]   ;;  %v10877_v45 = vld [vmem:[#allocation4 + $0xc0c] ss:$16 sps:$4 sm:$0xff]  }
 0x474   : > { %v10869_v62 = vld [vmem:[#allocation4 + $0xc28] ss:$16 sps:$4 sm:$0xff]   ;;  %v10880_v49 = vld [vmem:[#allocation4 + $0x76c] ss:$16 sps:$4 sm:$0xff]  }
 0x475   : > { %7938 = vmatpush1.bf16.msra.mxu0 %v10824_v23  ;;  %v10872_v19 = vld [vmem:[#allocation4 + $0x788] ss:$16 sps:$4 sm:$0xff]   ;;  %v10883_v61 = vld [vmem:[#allocation4 + $0xdec] ss:$16 sps:$4 sm:$0xff]  }
 0x476   : > { %8005 = vmatpush2.bf16.msra.mxu1 %v10827_v2  ;;  %7939 = vmatprep.subr.bf16.mxu0 %v10832_v46  ;;  %v10875_v4 = vld [vmem:[#allocation4 + $0xc08] ss:$16 sps:$4 sm:$0xff]   ;;  %v10886_v23 = vld [vmem:[#allocation4 + $0x74c] ss:$16 sps:$4 sm:$0xff]  }
 0x477   : > { %8060 = vmatprep.subr.bf16.mxu1 %v10835_v60  ;;  %v10878_v11 = vld [vmem:[#allocation4 + $0x768] ss:$16 sps:$4 sm:$0xff]   ;;  %v10889_v2 = vld [vmem:[#allocation4 + $0xdcc] ss:$16 sps:$4 sm:$0xff]  }
 0x478   : > { %v10881_v58 = vld [vmem:[#allocation4 + $0xde8] ss:$16 sps:$4 sm:$0xff]  }
 0x479   : > { %8007 = vmatmul.mubr.bf16.vlgmr.msra.gmra.mxu1 %v11912_v50  ;;  %7940 = vmatpush1.bf16.msra.mxu0 %v10830_v27  ;;  %v10848_v50 = vld [vmem:[#allocation4 + $0x608] ss:$16 sps:$4 sm:$0xff]   ;;  %v10892_v27 = vld [vmem:[#allocation4 + $0x72c] ss:$16 sps:$4 sm:$0xff]  }
 0x47a   : > { %8061 = vmatpush1.bf16.msra.mxu1 %v10833_v22  ;;  %8092 = vmatprep.mubr.bf16.mxu1 %v11918_v34  ;;  %v10859_v34 = vld [vmem:[#allocation4 + $0xc6c] ss:$16 sps:$4 sm:$0xff]   ;;  %v10884_v46 = vld [vmem:[#allocation4 + $0x748] ss:$16 sps:$4 sm:$0xff]  }
 0x47b   : > { %7941 = vmatprep.subr.bf16.mxu0 %v10838_v26  ;;  %8062 = vmatprep.subr.bf16.mxu1 %v10841_v31  ;;  %v10887_v60 = vld [vmem:[#allocation4 + $0xdc8] ss:$16 sps:$4 sm:$0xff]   ;;  %v10895_v22 = vld [vmem:[#allocation4 + $0xdac] ss:$16 sps:$4 sm:$0xff]  }
 0x47c   : > { %v10890_v26 = vld [vmem:[#allocation4 + $0x728] ss:$16 sps:$4 sm:$0xff]  }
 0x47d   : > { %7942 = vmatpush1.bf16.msra.mxu0 %v10836_v63  ;;  %v10893_v31 = vld [vmem:[#allocation4 + $0xda8] ss:$16 sps:$4 sm:$0xff]   ;;  %v10898_v63 = vld [vmem:[#allocation4 + $0x70c] ss:$16 sps:$4 sm:$0xff]  }
 0x47e   : > { %8063 = vmatpush1.bf16.msra.mxu1 %v10839_v0  ;;  %7943 = vmatprep.subr.bf16.mxu0 %v10844_v29  ;;  %v10901_v0 = vld [vmem:[#allocation4 + $0xd8c] ss:$16 sps:$4 sm:$0xff]   ;;  %v10896_v29 = vld [vmem:[#allocation4 + $0x708] ss:$16 sps:$4 sm:$0xff]  }
 0x47f   : > { %8064 = vmatprep.subr.bf16.mxu1 %v10847_v7  ;;  %v10899_v7 = vld [vmem:[#allocation4 + $0xd88] ss:$16 sps:$4 sm:$0xff]  }
 0x481   : > { %7944 = vmatpush1.bf16.msra.mxu0 %v10842_v51  ;;  %v10904_v51 = vld [vmem:[#allocation4 + $0xaec] ss:$16 sps:$4 sm:$0xff]  }
 0x482   : > { %8065 = vmatpush1.bf16.msra.mxu1 %v10845_v30  ;;  %7945 = vmatprep.subr.bf16.mxu0 %v10850_v25  ;;  %v10907_v30 = vld [vmem:[#allocation4 + $0xd6c] ss:$16 sps:$4 sm:$0xff]   ;;  %v10902_v25 = vld [vmem:[#allocation4 + $0xae8] ss:$16 sps:$4 sm:$0xff]  }
 0x483   : > { %8066 = vmatprep.subr.bf16.mxu1 %v10853_v39  ;;  %v10905_v39 = vld [vmem:[#allocation4 + $0xd68] ss:$16 sps:$4 sm:$0xff]  }
 0x485   : > { %7946 = vmatpush1.bf16.msra.mxu0 %v10848_v50  ;;  %v10910_v50 = vld [vmem:[#allocation4 + $0xacc] ss:$16 sps:$4 sm:$0xff]  }
 0x486   : > { %8067 = vmatpush1.bf16.msra.mxu1 %v10851_v40  ;;  %7947 = vmatprep.subr.bf16.mxu0 %v10856_v42  ;;  %v10913_v40 = vld [vmem:[#allocation4 + $0xd4c] ss:$16 sps:$4 sm:$0xff]   ;;  %v7750_v42 = vpop.f32.mrf.mxu1 }
 0x487   : > { %8068 = vmatprep.subr.bf16.mxu1 %v10859_v34 }
 0x489   : > { %7948 = vmatpush2.bf16.msra.mxu0 %v10854_v37 }
 0x48a   : > { %8069 = vmatpush1.bf16.msra.mxu1 %v10857_v18  ;;  %7949 = vmatprep.subr.bf16.mxu0 %v10862_v10  ;;  %v10908_v18 = vld [vmem:[#allocation4 + $0xac8] ss:$16 sps:$4 sm:$0xff]  }
 0x48b   : > { %8070 = vmatprep.subr.bf16.mxu1 %v10865_v5  ;;  %v10911_v5 = vld [vmem:[#allocation4 + $0xd48] ss:$16 sps:$4 sm:$0xff]  }
 0x48d   : > { %7950 = vmatpush2.bf16.msra.mxu0 %v10860_v43  ;;  %v10916_v43 = vld [vmem:[#allocation4 + $0xaac] ss:$16 sps:$4 sm:$0xff]  }
 0x48e   : > { %8071 = vmatpush1.bf16.msra.mxu1 %v10863_v57  ;;  %7951 = vmatprep.subr.bf16.mxu0 %v10868_v35  ;;  %v10919_v35 = vld [vmem:[#allocation4 + $0xd2c] ss:$16 sps:$4 sm:$0xff]  }
 0x48f   : > { %8072 = vmatprep.subr.bf16.mxu1 %v10871_v47 }
 0x491   : > { %7952 = vmatpush2.bf16.msra.mxu0 %v10866_v3  ;;  %v7752_v3 = vpop.f32.mrf.mxu1 }
 0x492   : > { %8073 = vmatpush1.bf16.msra.mxu1 %v10869_v62  ;;  %7953 = vmatprep.subr.bf16.mxu0 %v10874_v13 }
 0x493   : > { %8074 = vmatprep.subr.bf16.mxu1 %v10877_v45  ;;  %v10917_v45 = vld [vmem:[#allocation4 + $0xd28] ss:$16 sps:$4 sm:$0xff]  }
 0x495   : > { %7954 = vmatpush2.bf16.msra.mxu0 %v10872_v19  ;;  %v10922_v19 = vld [vmem:[#allocation4 + $0xa8c] ss:$16 sps:$4 sm:$0xff]  }
 0x496   : > { %8075 = vmatpush1.bf16.msra.mxu1 %v10875_v4  ;;  %7955 = vmatprep.subr.bf16.mxu0 %v10880_v49  ;;  %v10925_v4 = vld [vmem:[#allocation4 + $0xd0c] ss:$16 sps:$4 sm:$0xff]   ;;  %v10920_v49 = vld [vmem:[#allocation4 + $0xa88] ss:$16 sps:$4 sm:$0xff]  }
 0x497   : > { %8076 = vmatprep.subr.bf16.mxu1 %v10883_v61  ;;  %v10928_v61 = vld [vmem:[#allocation4 + $0xa6c] ss:$16 sps:$4 sm:$0xff]  }
 0x499   : > { %7956 = vmatpush2.bf16.msra.mxu0 %v10878_v11  ;;  %v10931_v11 = vld [vmem:[#allocation4 + $0x10ec] ss:$16 sps:$4 sm:$0xff]  }
 0x49a   : > { %8077 = vmatpush2.bf16.msra.mxu1 %v10881_v58  ;;  %7957 = vmatprep.subr.bf16.mxu0 %v10886_v23  ;;  %v10926_v58 = vld [vmem:[#allocation4 + $0xa68] ss:$16 sps:$4 sm:$0xff]  }
 0x49b   : > { %8078 = vmatprep.subr.bf16.mxu1 %v10889_v2  ;;  %v10929_v23 = vld [vmem:[#allocation4 + $0x10e8] ss:$16 sps:$4 sm:$0xff]   ;;  %v10934_v2 = vld [vmem:[#allocation4 + $0xa4c] ss:$16 sps:$4 sm:$0xff]  }
 0x49d   : > { %7958 = vmatpush2.bf16.msra.mxu0 %v10884_v46  ;;  %v10937_v46 = vld [vmem:[#allocation4 + $0x10cc] ss:$16 sps:$4 sm:$0xff]  }
 0x49e   : > { %8079 = vmatpush2.bf16.msra.mxu1 %v10887_v60  ;;  %7959 = vmatprep.subr.bf16.mxu0 %v10892_v27  ;;  %v10935_v60 = vld [vmem:[#allocation4 + $0x10c8] ss:$16 sps:$4 sm:$0xff]   ;;  %v10940_v27 = vld [vmem:[#allocation4 + $0xa2c] ss:$16 sps:$4 sm:$0xff]  }
 0x49f   : > { %8080 = vmatprep.subr.bf16.mxu1 %v10895_v22  ;;  %v10943_v22 = vld [vmem:[#allocation4 + $0x10ac] ss:$16 sps:$4 sm:$0xff]  }
 0x4a1   : > { %7960 = vmatpush2.bf16.msra.mxu0 %v10890_v26  ;;  %v10938_v26 = vld [vmem:[#allocation4 + $0xa28] ss:$16 sps:$4 sm:$0xff]  }
 0x4a2   : > { %8081 = vmatpush2.bf16.msra.mxu1 %v10893_v31  ;;  %7961 = vmatprep.subr.bf16.mxu0 %v10898_v63  ;;  %v10941_v31 = vld [vmem:[#allocation4 + $0x10a8] ss:$16 sps:$4 sm:$0xff]   ;;  %v10946_v63 = vld [vmem:[#allocation4 + $0xa0c] ss:$16 sps:$4 sm:$0xff]  }
 0x4a3   : > { %8082 = vmatprep.subr.bf16.mxu1 %v10901_v0  ;;  %v10949_v0 = vld [vmem:[#allocation4 + $0x108c] ss:$16 sps:$4 sm:$0xff]  }
 0x4a5   : > { %7962 = vmatpush2.bf16.msra.mxu0 %v10896_v29  ;;  %v10947_v29 = vld [vmem:[#allocation4 + $0x1088] ss:$16 sps:$4 sm:$0xff]  }
 0x4a6   : > { %8083 = vmatpush2.bf16.msra.mxu1 %v10899_v7  ;;  %8017 = vmatprep.subr.bf16.mxu0 %v10904_v51  ;;  %v10952_v7 = vld [vmem:[#allocation4 + $0xbec] ss:$16 sps:$4 sm:$0xff]   ;;  %v10950_v51 = vld [vmem:[#allocation4 + $0xbe8] ss:$16 sps:$4 sm:$0xff]  }
 0x4a7   : > { %8084 = vmatprep.subr.bf16.mxu1 %v10907_v30  ;;  %v10953_v30 = vld [vmem:[#allocation4 + $0x1068] ss:$16 sps:$4 sm:$0xff]  }
 0x4a8   : > { %v7707_v34 = vpop.f32.mrf.mxu0  ;;  %7964 = vmatmul.mubr.bf16.vlgmr.msra.gmra.mxu0 %v11859_v6 }
 0x4a9   : > { %v7708_v37 = vadd.f32 %v7707_v34, %v12102_v9  ;;  %8018 = vmatpush1.bf16.msra.mxu0 %v10902_v25  ;;  %8049 = vmatprep.mubr.bf16.mxu0 %v11962_v14  ;;  %v10914_v9 = vld [vmem:[#allocation4 + $0xaa8] ss:$16 sps:$4 sm:$0xff]   ;;  %v10958_v25 = vld [vmem:[#allocation4 + $0xbcc] ss:$16 sps:$4 sm:$0xff]  }
 0x4aa   : > { %8085 = vmatpush2.bf16.msra.mxu1 %v10905_v39  ;;  %v7709_v10 = vpop.f32.mrf.mxu0  ;;  %8019 = vmatprep.subr.bf16.mxu0 %v10910_v50  ;;  %v10961_v39 = vld [vmem:[#allocation4 + $0x104c] ss:$16 sps:$4 sm:$0xff]   ;;  %v10956_v50 = vld [vmem:[#allocation4 + $0xbc8] ss:$16 sps:$4 sm:$0xff]  }
 0x4ab   : > { %v7710_v57 = vadd.f32 %v7709_v10, %v12105_v12  ;;  %8086 = vmatprep.subr.bf16.mxu1 %v10913_v40  ;;  %v12118_v47 = vadd.f32 %v7750_v42, %v7708_v37  ;;  %v10959_v40 = vld [vmem:[#allocation4 + $0x1048] ss:$16 sps:$4 sm:$0xff]   ;;  %v10964_v42 = vld [vmem:[#allocation4 + $0xbac] ss:$16 sps:$4 sm:$0xff]  }
 0x4ac   : > { %v7711_v62 = vpop.f32.mrf.mxu0  ;;  %v10967_v34 = vld [vmem:[#allocation4 + $0x102c] ss:$16 sps:$4 sm:$0xff]   ;;  %v10962_v37 = vld [vmem:[#allocation4 + $0xba8] ss:$16 sps:$4 sm:$0xff]  }
 0x4ad   : > { %v12121_v6 = vadd.f32 %v7711_v62, %v12108_v21  ;;  %8020 = vmatpush1.bf16.msra.mxu0 %v10908_v18  ;;  %v12123_v14 = vadd.f32 %v7752_v3, %v7710_v57  ;;  %v10923_v21 = vld [vmem:[#allocation4 + $0xd08] ss:$16 sps:$4 sm:$0xff]   ;;  %v10970_v10 = vld [vmem:[#allocation4 + $0xb8c] ss:$16 sps:$4 sm:$0xff]  }
 0x4ae   : > { %8087 = vmatpush2.bf16.msra.mxu1 %v10911_v5  ;;  %v7713_v13 = vpop.f32.mrf.mxu0  ;;  %8021 = vmatprep.subr.bf16.mxu0 %v10916_v43  ;;  %v10965_v18 = vld [vmem:[#allocation4 + $0x1028] ss:$16 sps:$4 sm:$0xff]   ;;  %v10973_v5 = vld [vmem:[#allocation4 + $0x100c] ss:$16 sps:$4 sm:$0xff]  }
 0x4af   : > { %v12126_v12 = vadd.f32 %v7713_v13, %v12110_v16  ;;  %8088 = vmatprep.subr.bf16.mxu1 %v10919_v35  ;;  %v10932_v16 = vld [vmem:[#allocation4 + $0xa48] ss:$16 sps:$4 sm:$0xff]   ;;  %v10976_v35 = vld [vmem:[#allocation4 + $0xb6c] ss:$16 sps:$4 sm:$0xff]  }
 0x4b0   : > { %v10968_v43 = vld [vmem:[#allocation4 + $0xb88] ss:$16 sps:$4 sm:$0xff]   ;;  %v10979_v3 = vld [vmem:[#allocation4 + $0x11ec] ss:$16 sps:$4 sm:$0xff]  }
 0x4b1   : > { %8022 = vmatpush1.bf16.msra.mxu0 %v10914_v9  ;;  %v10971_v57 = vld [vmem:[#allocation4 + $0x1008] ss:$16 sps:$4 sm:$0xff]   ;;  %v10982_v13 = vld [vmem:[#allocation4 + $0xb4c] ss:$16 sps:$4 sm:$0xff]  }
 0x4b2   : > { %8089 = vmatpush2.bf16.msra.mxu1 %v10917_v45  ;;  %8023 = vmatprep.subr.bf16.mxu0 %v10922_v19  ;;  %v10974_v62 = vld [vmem:[#allocation4 + $0xb68] ss:$16 sps:$4 sm:$0xff]   ;;  %v10985_v45 = vld [vmem:[#allocation4 + $0x11cc] ss:$16 sps:$4 sm:$0xff]  }
 0x4b3   : > { %8090 = vmatprep.subr.bf16.mxu1 %v10925_v4  ;;  %v10977_v9 = vld [vmem:[#allocation4 + $0x11e8] ss:$16 sps:$4 sm:$0xff]  }
 0x4b4   : > { %v10980_v19 = vld [vmem:[#allocation4 + $0xb48] ss:$16 sps:$4 sm:$0xff]  }
 0x4b5   : > { %8024 = vmatpush1.bf16.msra.mxu0 %v10920_v49  ;;  %v10983_v4 = vld [vmem:[#allocation4 + $0x11c8] ss:$16 sps:$4 sm:$0xff]   ;;  %v10988_v49 = vld [vmem:[#allocation4 + $0xb2c] ss:$16 sps:$4 sm:$0xff]  }
 0x4b6   : > { %8091 = vmatpush2.bf16.msra.mxu1 %v10923_v21  ;;  %8025 = vmatprep.subr.bf16.mxu0 %v10928_v61  ;;  %v10991_v21 = vld [vmem:[#allocation4 + $0x11ac] ss:$16 sps:$4 sm:$0xff]   ;;  %v10986_v61 = vld [vmem:[#allocation4 + $0xb28] ss:$16 sps:$4 sm:$0xff]  }
 0x4b7   : > { %8146 = vmatprep.subr.bf16.mxu1 %v10931_v11  ;;  %v10989_v11 = vld [vmem:[#allocation4 + $0x11a8] ss:$16 sps:$4 sm:$0xff]  }
 0x4b9   : > { %8093 = vmatmul.mubr.bf16.vlgmr.msra.gmra.mxu1 %v11968_v53  ;;  %8026 = vmatpush1.bf16.msra.mxu0 %v10926_v58  ;;  %v10944_v53 = vld [vmem:[#allocation4 + $0xa08] ss:$16 sps:$4 sm:$0xff]   ;;  %v10994_v58 = vld [vmem:[#allocation4 + $0xb0c] ss:$16 sps:$4 sm:$0xff]  }
 0x4ba   : > { %8147 = vmatpush1.bf16.msra.mxu1 %v10929_v23  ;;  %8178 = vmatprep.mubr.bf16.mxu1 %v11972_v1  ;;  %v10955_v1 = vld [vmem:[#allocation4 + $0x106c] ss:$16 sps:$4 sm:$0xff]  }
 0x4bb   : > { %8027 = vmatprep.subr.bf16.mxu0 %v10934_v2  ;;  %8148 = vmatprep.subr.bf16.mxu1 %v10937_v46  ;;  %v10997_v23 = vld [vmem:[#allocation4 + $0x118c] ss:$16 sps:$4 sm:$0xff]   ;;  %v10992_v2 = vld [vmem:[#allocation4 + $0xb08] ss:$16 sps:$4 sm:$0xff]  }
 0x4bc   : > { %v10995_v46 = vld [vmem:[#allocation4 + $0x1188] ss:$16 sps:$4 sm:$0xff]  }
 0x4bd   : > { %8028 = vmatpush1.bf16.msra.mxu0 %v10932_v16  ;;  %v11000_v16 = vld [vmem:[#allocation4 + $0xeec] ss:$16 sps:$4 sm:$0xff]  }
 0x4be   : > { %8149 = vmatpush1.bf16.msra.mxu1 %v10935_v60  ;;  %8029 = vmatprep.subr.bf16.mxu0 %v10940_v27  ;;  %v11003_v60 = vld [vmem:[#allocation4 + $0x116c] ss:$16 sps:$4 sm:$0xff]   ;;  %v10998_v27 = vld [vmem:[#allocation4 + $0xee8] ss:$16 sps:$4 sm:$0xff]  }
 0x4bf   : > { %8150 = vmatprep.subr.bf16.mxu1 %v10943_v22  ;;  %v11001_v22 = vld [vmem:[#allocation4 + $0x1168] ss:$16 sps:$4 sm:$0xff]  }
 0x4c1   : > { %8030 = vmatpush1.bf16.msra.mxu0 %v10938_v26  ;;  %v11006_v26 = vld [vmem:[#allocation4 + $0xecc] ss:$16 sps:$4 sm:$0xff]  }
 0x4c2   : > { %8151 = vmatpush1.bf16.msra.mxu1 %v10941_v31  ;;  %8031 = vmatprep.subr.bf16.mxu0 %v10946_v63  ;;  %v11009_v31 = vld [vmem:[#allocation4 + $0x114c] ss:$16 sps:$4 sm:$0xff]   ;;  %v7754_v63 = vpop.f32.mrf.mxu1 }
 0x4c3   : > { %8152 = vmatprep.subr.bf16.mxu1 %v10949_v0 }
 0x4c5   : > { %8032 = vmatpush1.bf16.msra.mxu0 %v10944_v53 }
 0x4c6   : > { %8153 = vmatpush1.bf16.msra.mxu1 %v10947_v29  ;;  %8033 = vmatprep.subr.bf16.mxu0 %v10952_v7  ;;  %v11004_v29 = vld [vmem:[#allocation4 + $0xec8] ss:$16 sps:$4 sm:$0xff]  }
 0x4c7   : > { %8154 = vmatprep.subr.bf16.mxu1 %v10955_v1  ;;  %v11007_v1 = vld [vmem:[#allocation4 + $0x1148] ss:$16 sps:$4 sm:$0xff]  }
 0x4c9   : > { %8034 = vmatpush2.bf16.msra.mxu0 %v10950_v51  ;;  %v11012_v51 = vld [vmem:[#allocation4 + $0xeac] ss:$16 sps:$4 sm:$0xff]  }
 0x4ca   : > { %8155 = vmatpush1.bf16.msra.mxu1 %v10953_v30  ;;  %8035 = vmatprep.subr.bf16.mxu0 %v10958_v25  ;;  %v7755_v25 = vadd.f32 %v7754_v63, %v12121_v6 }
 0x4cb   : > { %8156 = vmatprep.subr.bf16.mxu1 %v10961_v39  ;;  %v11015_v39 = vld [vmem:[#allocation4 + $0x112c] ss:$16 sps:$4 sm:$0xff]  }
 0x4cd   : > { %8036 = vmatpush2.bf16.msra.mxu0 %v10956_v50 }
 0x4ce   : > { %8157 = vmatpush1.bf16.msra.mxu1 %v10959_v40  ;;  %8037 = vmatprep.subr.bf16.mxu0 %v10964_v42  ;;  %v11010_v40 = vld [vmem:[#allocation4 + $0xea8] ss:$16 sps:$4 sm:$0xff]  }
 0x4cf   : > { %8158 = vmatprep.subr.bf16.mxu1 %v10967_v34  ;;  %v11013_v34 = vld [vmem:[#allocation4 + $0x1128] ss:$16 sps:$4 sm:$0xff]  }
 0x4d1   : > { %8038 = vmatpush2.bf16.msra.mxu0 %v10962_v37  ;;  %v11018_v37 = vld [vmem:[#allocation4 + $0xe8c] ss:$16 sps:$4 sm:$0xff]  }
 0x4d2   : > { %8159 = vmatpush1.bf16.msra.mxu1 %v10965_v18  ;;  %8039 = vmatprep.subr.bf16.mxu0 %v10970_v10 }
 0x4d3   : > { %8160 = vmatprep.subr.bf16.mxu1 %v10973_v5  ;;  %v11021_v5 = vld [vmem:[#allocation4 + $0x110c] ss:$16 sps:$4 sm:$0xff]  }
 0x4d5   : > { %8040 = vmatpush2.bf16.msra.mxu0 %v10968_v43 }
 0x4d6   : > { %8161 = vmatpush1.bf16.msra.mxu1 %v10971_v57  ;;  %8041 = vmatprep.subr.bf16.mxu0 %v10976_v35 }
 0x4d7   : > { %8162 = vmatprep.subr.bf16.mxu1 %v10979_v3 }
 0x4d9   : > { %8042 = vmatpush2.bf16.msra.mxu0 %v10974_v62  ;;  %v11016_v62 = vld [vmem:[#allocation4 + $0xe88] ss:$16 sps:$4 sm:$0xff]  }
 0x4da   : > { %8163 = vmatpush2.bf16.msra.mxu1 %v10977_v9  ;;  %8043 = vmatprep.subr.bf16.mxu0 %v10982_v13  ;;  %v11019_v9 = vld [vmem:[#allocation4 + $0x1108] ss:$16 sps:$4 sm:$0xff]   ;;  %v11024_v13 = vld [vmem:[#allocation4 + $0xe6c] ss:$16 sps:$4 sm:$0xff]  }
 0x4db   : > { %8164 = vmatprep.subr.bf16.mxu1 %v10985_v45 }
 0x4dd   : > { %8044 = vmatpush2.bf16.msra.mxu0 %v10980_v19 }
 0x4de   : > { %8165 = vmatpush2.bf16.msra.mxu1 %v10983_v4  ;;  %8045 = vmatprep.subr.bf16.mxu0 %v10988_v49 }
 0x4df   : > { %8166 = vmatprep.subr.bf16.mxu1 %v10991_v21  ;;  %v11027_v21 = vld [vmem:[#allocation4 + $0x14ec] ss:$16 sps:$4 sm:$0xff]  }
 0x4e1   : > { %8046 = vmatpush2.bf16.msra.mxu0 %v10986_v61 }
 0x4e2   : > { %8167 = vmatpush2.bf16.msra.mxu1 %v10989_v11  ;;  %8047 = vmatprep.subr.bf16.mxu0 %v10994_v58 }
 0x4e3   : > { %8168 = vmatprep.subr.bf16.mxu1 %v10997_v23 }
 0x4e5   : > { %8048 = vmatpush2.bf16.msra.mxu0 %v10992_v2  ;;  %v11022_v2 = vld [vmem:[#allocation4 + $0xe68] ss:$16 sps:$4 sm:$0xff]  }
 0x4e6   : > { %8169 = vmatpush2.bf16.msra.mxu1 %v10995_v46  ;;  %8103 = vmatprep.subr.bf16.mxu0 %v11000_v16  ;;  %v11025_v46 = vld [vmem:[#allocation4 + $0x14e8] ss:$16 sps:$4 sm:$0xff]  }
 0x4e7   : > { %8170 = vmatprep.subr.bf16.mxu1 %v11003_v60 }
 0x4e8   : > { %v7793_v0 = vpop.f32.mrf.mxu0  ;;  %8050 = vmatmul.mubr.bf16.vlgmr.msra.gmra.mxu0 %v11872_v44  ;;  %v7756_v44 = vpop.f32.mrf.mxu1 }
 0x4e9   : > { %v12132_v53 = vadd.f32 %v7793_v0, %v12118_v47  ;;  %8104 = vmatpush1.bf16.msra.mxu0 %v10998_v27  ;;  %8135 = vmatprep.mubr.bf16.mxu0 %v11978_v52  ;;  %v7757_v52 = vadd.f32 %v7756_v44, %v12126_v12 }
 0x4ea   : > { %8171 = vmatpush2.bf16.msra.mxu1 %v11001_v22  ;;  %v7795_v7 = vpop.f32.mrf.mxu0  ;;  %8105 = vmatprep.subr.bf16.mxu0 %v11006_v26  ;;  %v11030_v26 = vld [vmem:[#allocation4 + $0xe4c] ss:$16 sps:$4 sm:$0xff]  }
 0x4eb   : > { %v12136_v30 = vadd.f32 %v7795_v7, %v12123_v14  ;;  %8172 = vmatprep.subr.bf16.mxu1 %v11009_v31  ;;  %v8522_v14 = vmul.f32 %v12132_v53, %v12132_v53  ;;  %v11033_v31 = vld [vmem:[#allocation4 + $0x14cc] ss:$16 sps:$4 sm:$0xff]  }
 0x4ec   : > { %v7797_v50 = vpop.f32.mrf.mxu0 }
 0x4ed   : > { %v12139_v47 = vadd.f32 %v7797_v50, %v7755_v25  ;;  %8106 = vmatpush1.bf16.msra.mxu0 %v11004_v29  ;;  %v8523_v12 = vmul.f32 %v12136_v30, %v12136_v30  ;;  %v11036_v25 = vld [vmem:[#allocation4 + $0xe2c] ss:$16 sps:$4 sm:$0xff]  }
 0x4ee   : > { %8173 = vmatpush2.bf16.msra.mxu1 %v11007_v1  ;;  %v7799_v42 = vpop.f32.mrf.mxu0  ;;  %8107 = vmatprep.subr.bf16.mxu0 %v11012_v51  ;;  %v11028_v1 = vld [vmem:[#allocation4 + $0xe48] ss:$16 sps:$4 sm:$0xff]  }
 0x4ef   : > { %v8490_v6 = vadd.f32 %v12139_v47, %v12132_v53  ;;  %v8526_v18 = vmul.f32 %v12139_v47, %v12139_v47  ;;  %v12148_v10 = vadd.f32 %v7799_v42, %v7757_v52  ;;  %8174 = vmatprep.subr.bf16.mxu1 %v11015_v39  ;;  %v11031_v51 = vld [vmem:[#allocation4 + $0x14c8] ss:$16 sps:$4 sm:$0xff]  }
 0x4f1   : > { %v8491_v43 = vrot.slane %v8490_v6, 4  ;;  %v8530_v57 = vadd.f32 %v8526_v18, %v8522_v14  ;;  %v8497_v35 = vadd.f32 %v12148_v10, %v12136_v30  ;;  %v8527_v3 = vmul.f32 %v12148_v10, %v12148_v10  ;;  %8108 = vmatpush1.bf16.msra.mxu0 %v11010_v40  ;;  %v11039_v40 = vld [vmem:[#allocation4 + $0x14ac] ss:$16 sps:$4 sm:$0xff]  }
 0x4f2   : > { %8175 = vmatpush2.bf16.msra.mxu1 %v11013_v34  ;;  %8109 = vmatprep.subr.bf16.mxu0 %v11018_v37 }
 0x4f3   : > { %v8492_v45 = vadd.f32 %v8491_v43, %v8490_v6  ;;  %v8531_v19 = vrot.slane %v8530_v57, 4  ;;  %v8498_v4 = vrot.slane %v8497_v35, 4  ;;  %v8537_v49 = vadd.f32 %v8527_v3, %v8523_v12  ;;  %8176 = vmatprep.subr.bf16.mxu1 %v11021_v5  ;;  %v11037_v6 = vld [vmem:[#allocation4 + $0x14a8] ss:$16 sps:$4 sm:$0xff]  }
 0x4f5   : > { %v8493_v61 = vrot.slane %v8492_v45, 2  ;;  %v8532_v11 = vadd.f32 %v8531_v19, %v8530_v57  ;;  %v8499_v58 = vadd.f32 %v8498_v4, %v8497_v35  ;;  %v8538_v23 = vrot.slane %v8537_v49, 4  ;;  %8110 = vmatpush1.bf16.msra.mxu0 %v11016_v62  ;;  %v11045_v57 = vld [vmem:[#allocation4 + $0x148c] ss:$16 sps:$4 sm:$0xff]  }
 0x4f6   : > { %8177 = vmatpush2.bf16.msra.mxu1 %v11019_v9  ;;  %8111 = vmatprep.subr.bf16.mxu0 %v11024_v13  ;;  %v11040_v9 = vld [vmem:[#allocation4 + $0xe08] ss:$16 sps:$4 sm:$0xff]  }
 0x4f7   : > { %v8494_v16 = vadd.f32 %v8493_v61, %v8492_v45  ;;  %v8533_v60 = vrot.slane %v8532_v11, 2  ;;  %v8500_v27 = vrot.slane %v8499_v58, 2  ;;  %v8539_v22 = vadd.f32 %v8538_v23, %v8537_v49  ;;  %8232 = vmatprep.subr.bf16.mxu1 %v11027_v21  ;;  %v11043_v49 = vld [vmem:[#allocation4 + $0x1488] ss:$16 sps:$4 sm:$0xff]  }
 0x4f8   : > { %v11049_v23 = vld [vmem:[#allocation4 + $0x1468] ss:$16 sps:$4 sm:$0xff]  }
 0x4f9   : > { %v8495_v63 = vrot.slane %v8494_v16, 1  ;;  %v8534_v0 = vadd.f32 %v8533_v60, %v8532_v11  ;;  %v8501_v29 = vadd.f32 %v8500_v27, %v8499_v58  ;;  %v8540_v7 = vrot.slane %v8539_v22, 2  ;;  %8179 = vmatmul.mubr.bf16.vlgmr.msra.gmra.mxu1 %v11984_v36  ;;  %8112 = vmatpush1.bf16.msra.mxu0 %v11022_v2  ;;  %v11034_v36 = vld [vmem:[#allocation4 + $0xe28] ss:$16 sps:$4 sm:$0xff]   ;;  %v11054_v2 = vld [vmem:[#allocation4 + $0xfcc] ss:$16 sps:$4 sm:$0xff]  }
 0x4fa   : > { %8233 = vmatpush1.bf16.msra.mxu1 %v11025_v46  ;;  %8264 = vmatprep.mubr.bf16.mxu1 %v11988_v32  ;;  %v11042_v32 = vld [vmem:[#allocation4 + $0xe0c] ss:$16 sps:$4 sm:$0xff]   ;;  %v11046_v11 = vld [vmem:[#allocation4 + $0xfe8] ss:$16 sps:$4 sm:$0xff]  }
 0x4fb   : > { %v8496_v39 = vadd.f32 %v8495_v63, %v8494_v16  ;;  %v8535_v44 = vrot.slane %v8534_v0, 1  ;;  %v8502_v50 = vrot.slane %v8501_v29, 1  ;;  %v8541_v52 = vadd.f32 %v8540_v7, %v8539_v22  ;;  %8113 = vmatprep.subr.bf16.mxu0 %v11030_v26  ;;  %8234 = vmatprep.subr.bf16.mxu1 %v11033_v31  ;;  %v11055_v46 = vld [vmem:[#allocation4 + $0x1448] ss:$16 sps:$4 sm:$0xff]   ;;  %v11060_v16 = vld [vmem:[#allocation4 + $0xfac] ss:$16 sps:$4 sm:$0xff]  }
 0x4fc   : > { %v11063_v60 = vld [vmem:[#allocation4 + $0x142c] ss:$16 sps:$4 sm:$0xff]   ;;  %v11058_v27 = vld [vmem:[#allocation4 + $0xfa8] ss:$16 sps:$4 sm:$0xff]  }
 0x4fd   : > { %v12158_v42 = vmul.f32 0.0625, %v8496_v39  ;;  %v8536_v34 = vadd.f32 %v8535_v44, %v8534_v0  ;;  %v8503_v37 = vadd.f32 %v8502_v50, %v8501_v29  ;;  %v8542_v14 = vrot.slane %v8541_v52, 1  ;;  %8114 = vmatpush1.bf16.msra.mxu0 %v11028_v1  ;;  %v11061_v22 = vld [vmem:[#allocation4 + $0x1428] ss:$16 sps:$4 sm:$0xff]   ;;  %v11066_v26 = vld [vmem:[#allocation4 + $0xf8c] ss:$16 sps:$4 sm:$0xff]  }
 0x4fe   : > { %8235 = vmatpush1.bf16.msra.mxu1 %v11031_v51  ;;  %8115 = vmatprep.subr.bf16.mxu0 %v11036_v25  ;;  %v11069_v31 = vld [vmem:[#allocation4 + $0x140c] ss:$16 sps:$4 sm:$0xff]   ;;  %v11064_v63 = vld [vmem:[#allocation4 + $0xf88] ss:$16 sps:$4 sm:$0xff]  }
 0x4ff   : > { %v8558_v18 = vmul.f32 0.0625, %v8536_v34  ;;  %v8562_v5 = vmul.f32 %v12158_v42, %v12158_v42  ;;  %v8570_v12 = vsub.f32 %v12132_v53, %v12158_v42  ;;  %v8574_v43 = vsub.f32 %v12139_v47, %v12158_v42  ;;  %8236 = vmatprep.subr.bf16.mxu1 %v11039_v40  ;;  %v11048_v53 = vld [vmem:[#allocation4 + $0xfec] ss:$16 sps:$4 sm:$0xff]   ;;  %v11067_v29 = vld [vmem:[#allocation4 + $0x1408] ss:$16 sps:$4 sm:$0xff]  }
 0x500   : > { %v8519_v35 = vmul.f32 0.0625, %v8503_v37  ;;  %v8543_v3 = vadd.f32 %v8542_v14, %v8541_v52  ;;  %v11051_v47 = vld [vmem:[#allocation4 + $0x146c] ss:$16 sps:$4 sm:$0xff]   ;;  %v11070_v44 = vld [vmem:[#allocation4 + $0xf68] ss:$16 sps:$4 sm:$0xff]  }
 0x501   : > { %v8566_v62 = vsub.f32 %v8558_v18, %v8562_v5  ;;  %8116 = vmatpush1.bf16.msra.mxu0 %v11034_v36  ;;  %v11072_v7 = vld [vmem:[#allocation4 + $0xf6c] ss:$16 sps:$4 sm:$0xff]   ;;  %v11073_v42 = vld [vmem:[#allocation4 + $0x15e8] ss:$16 sps:$4 sm:$0xff]  }
 0x502   : > { %v8559_v13 = vmul.f32 0.0625, %v8543_v3  ;;  %v8563_v45 = vmul.f32 %v8519_v35, %v8519_v35  ;;  %v8571_v19 = vsub.f32 %v12136_v30, %v8519_v35  ;;  %v8575_v4 = vsub.f32 %v12148_v10, %v8519_v35  ;;  %8237 = vmatpush1.bf16.msra.mxu1 %v11037_v6  ;;  %8117 = vmatprep.subr.bf16.mxu0 %v11042_v32  ;;  %v11057_v30 = vld [vmem:[#allocation4 + $0x144c] ss:$16 sps:$4 sm:$0xff]   ;;  %v11052_v10 = vld [vmem:[#allocation4 + $0xfc8] ss:$16 sps:$4 sm:$0xff]   ;;  %v1342_v32 = vld [vmem:[#allocation6] sm:$0xff] }
 0x503   : > { %v8578_v21 = vadd.f32 1e-05, %v8566_v62  ;;  %8238 = vmatprep.subr.bf16.mxu1 %v11045_v57  ;;  %v11075_v25 = vld [vmem:[#allocation4 + $0x15ec] ss:$16 sps:$4 sm:$0xff]   ;;  %v11076_v6 = vld [vmem:[#allocation4 + $0xf48] ss:$16 sps:$4 sm:$0xff]  }
 0x504   : > { %v8567_v61 = vsub.f32 %v8559_v13, %v8563_v45  ;;  %v11078_v34 = vld [vmem:[#allocation4 + $0xf4c] ss:$16 sps:$4 sm:$0xff]   ;;  %v11079_v5 = vld [vmem:[#allocation4 + $0x15c8] ss:$16 sps:$4 sm:$0xff]  }
 0x505   : > { %11398 = vrsqrt.f32 %v8578_v21  ;;  %8118 = vmatpush1.bf16.msra.mxu0 %v11040_v9  ;;  %v11081_v37 = vld [vmem:[#allocation4 + $0x15cc] ss:$16 sps:$4 sm:$0xff]   ;;  %v11082_v62 = vld [vmem:[#allocation4 + $0xf28] ss:$16 sps:$4 sm:$0xff]  }
 0x506   : > { %v8579_v58 = vadd.f32 1e-05, %v8567_v61  ;;  %8239 = vmatpush1.bf16.msra.mxu1 %v11043_v49  ;;  %8119 = vmatprep.subr.bf16.mxu0 %v11048_v53  ;;  %v1343_v18 = vld [vmem:[#allocation6 + $0x8] sm:$0xff] }
 0x507   : > { %8240 = vmatprep.subr.bf16.mxu1 %v11051_v47  ;;  %v11087_v57 = vld [vmem:[#allocation4 + $0x15ac] ss:$16 sps:$4 sm:$0xff]   ;;  %v11085_v9 = vld [vmem:[#allocation4 + $0x15a8] ss:$16 sps:$4 sm:$0xff]  }
 0x508   : > { %11400 = vrsqrt.f32 %v8579_v58  ;;  %v11090_v13 = vld [vmem:[#allocation4 + $0xf0c] ss:$16 sps:$4 sm:$0xff]   ;;  %v11091_v49 = vld [vmem:[#allocation4 + $0x1588] ss:$16 sps:$4 sm:$0xff]  }
 0x509   : > { %8120 = vmatpush2.bf16.msra.mxu0 %v11046_v11  ;;  %v11096_v53 = vld [vmem:[#allocation4 + $0x12ec] ss:$16 sps:$4 sm:$0xff]   ;;  %v11094_v47 = vld [vmem:[#allocation4 + $0x12e8] ss:$16 sps:$4 sm:$0xff]  }
 0x50a   : > { %8241 = vmatpush1.bf16.msra.mxu1 %v11049_v23  ;;  %8121 = vmatprep.subr.bf16.mxu0 %v11054_v2  ;;  %v11099_v21 = vld [vmem:[#allocation4 + $0x156c] ss:$16 sps:$4 sm:$0xff]   ;;  %v11097_v61 = vld [vmem:[#allocation4 + $0x1568] ss:$16 sps:$4 sm:$0xff]  }
 0x50b   : > { %8242 = vmatprep.subr.bf16.mxu1 %v11057_v30  ;;  %v11102_v11 = vld [vmem:[#allocation4 + $0x12cc] ss:$16 sps:$4 sm:$0xff]   ;;  %v11100_v23 = vld [vmem:[#allocation4 + $0x12c8] ss:$16 sps:$4 sm:$0xff]  }
 0x50c   : > { %v11105_v58 = vld [vmem:[#allocation4 + $0x154c] ss:$16 sps:$4 sm:$0xff]   ;;  %v11103_v2 = vld [vmem:[#allocation4 + $0x1548] ss:$16 sps:$4 sm:$0xff]  }
 0x50d   : > { %8122 = vmatpush2.bf16.msra.mxu0 %v11052_v10  ;;  %v11108_v30 = vld [vmem:[#allocation4 + $0x12ac] ss:$16 sps:$4 sm:$0xff]  }
 0x50e   : > { %8243 = vmatpush1.bf16.msra.mxu1 %v11055_v46  ;;  %8123 = vmatprep.subr.bf16.mxu0 %v11060_v16  ;;  %v11111_v10 = vld [vmem:[#allocation4 + $0x152c] ss:$16 sps:$4 sm:$0xff]   ;;  %v11106_v46 = vld [vmem:[#allocation4 + $0x12a8] ss:$16 sps:$4 sm:$0xff]  }
 0x50f   : > { %8244 = vmatprep.subr.bf16.mxu1 %v11063_v60  ;;  %v11109_v16 = vld [vmem:[#allocation4 + $0x1528] ss:$16 sps:$4 sm:$0xff]   ;;  %v11114_v60 = vld [vmem:[#allocation4 + $0x128c] ss:$16 sps:$4 sm:$0xff]  }
 0x511   : > { %8124 = vmatpush2.bf16.msra.mxu0 %v11058_v27  ;;  %v11117_v27 = vld [vmem:[#allocation4 + $0x150c] ss:$16 sps:$4 sm:$0xff]  }
 0x512   : > { %v11399_v0 = vpop.eup %11398  ;;  %8245 = vmatpush1.bf16.msra.mxu1 %v11061_v22  ;;  %8125 = vmatprep.subr.bf16.mxu0 %v11066_v26  ;;  %v11120_v22 = vld [vmem:[#allocation4 + $0x126c] ss:$16 sps:$4 sm:$0xff]  }
 0x513   : > { %v8586_v1 = vmul.f32 %v11399_v0, %v8570_v12  ;;  %v12168_v51 = vmul.f32 %v11399_v0, %v8574_v43  ;;  %8246 = vmatprep.subr.bf16.mxu1 %v11069_v31  ;;  %v11084_v12 = vld [vmem:[#allocation4 + $0xf2c] ss:$16 sps:$4 sm:$0xff]   ;;  %v11118_v31 = vld [vmem:[#allocation4 + $0x1268] ss:$16 sps:$4 sm:$0xff]  }
 0x514   : > { %v11123_v26 = vld [vmem:[#allocation4 + $0x18ec] ss:$16 sps:$4 sm:$0xff]  }
 0x515   : > { %v11401_v39 = vpop.eup %11400  ;;  %8126 = vmatpush2.bf16.msra.mxu0 %v11064_v63  ;;  %v8594_v50 = vmul.f32 0.2, %v8586_v1  ;;  %v11121_v63 = vld [vmem:[#allocation4 + $0x18e8] ss:$16 sps:$4 sm:$0xff]   ;;  %v11126_v0 = vld [vmem:[#allocation4 + $0x124c] ss:$16 sps:$4 sm:$0xff]  }
 0x516   : > { %v8587_v52 = vmul.f32 %v11401_v39, %v8571_v19  ;;  %v12170_v40 = vmul.f32 %v11401_v39, %v8575_v4  ;;  %8247 = vmatpush1.bf16.msra.mxu1 %v11067_v29  ;;  %8127 = vmatprep.subr.bf16.mxu0 %v11072_v7  ;;  %v11093_v19 = vld [vmem:[#allocation4 + $0x158c] ss:$16 sps:$4 sm:$0xff]   ;;  %v11088_v4 = vld [vmem:[#allocation4 + $0xf08] ss:$16 sps:$4 sm:$0xff]  }
 0x517   : > { %8248 = vmatprep.subr.bf16.mxu1 %v11075_v25  ;;  %v8602_v36 = vmax.f32 %v8586_v1, %v8594_v50  ;;  %v11129_v29 = vld [vmem:[#allocation4 + $0x18cc] ss:$16 sps:$4 sm:$0xff]   ;;  %v11124_v7 = vld [vmem:[#allocation4 + $0x1248] ss:$16 sps:$4 sm:$0xff]  }
 0x518   : > { %v8595_v14 = vmul.f32 0.2, %v8587_v52  ;;  %v11127_v1 = vld [vmem:[#allocation4 + $0x18c8] ss:$16 sps:$4 sm:$0xff]   ;;  %v11132_v25 = vld [vmem:[#allocation4 + $0x122c] ss:$16 sps:$4 sm:$0xff]  }
 0x519   : > { %8128 = vmatpush2.bf16.msra.mxu0 %v11070_v44  ;;  %v8610_v35 = vmul.f32 %v8602_v36, %v1342_v32  ;;  %v11135_v39 = vld [vmem:[#allocation4 + $0x18ac] ss:$16 sps:$4 sm:$0xff]   ;;  %v11130_v44 = vld [vmem:[#allocation4 + $0x1228] ss:$16 sps:$4 sm:$0xff]  }
 0x51a   : > { %8249 = vmatpush2.bf16.msra.mxu1 %v11073_v42  ;;  %8129 = vmatprep.subr.bf16.mxu0 %v11078_v34  ;;  %v8603_v43 = vmax.f32 %v8587_v52, %v8595_v14  ;;  %v11133_v50 = vld [vmem:[#allocation4 + $0x18a8] ss:$16 sps:$4 sm:$0xff]   ;;  %v11138_v52 = vld [vmem:[#allocation4 + $0x120c] ss:$16 sps:$4 sm:$0xff]  }
 0x51b   : > { %8250 = vmatprep.subr.bf16.mxu1 %v11081_v37  ;;  %v11141_v42 = vld [vmem:[#allocation4 + $0x188c] ss:$16 sps:$4 sm:$0xff]   ;;  %v11139_v34 = vld [vmem:[#allocation4 + $0x1888] ss:$16 sps:$4 sm:$0xff]  }
 0x51c   : > { %v8611_v3 = vmul.f32 %v8603_v43, %v1343_v18  ;;  %v11144_v37 = vld [vmem:[#allocation4 + $0x13ec] ss:$16 sps:$4 sm:$0xff]   ;;  %v11142_v14 = vld [vmem:[#allocation4 + $0x13e8] ss:$16 sps:$4 sm:$0xff]  }
 0x51d   : > { %8130 = vmatpush2.bf16.msra.mxu0 %v11076_v6  ;;  %v11145_v36 = vld [vmem:[#allocation4 + $0x1868] ss:$16 sps:$4 sm:$0xff]   ;;  %v11150_v6 = vld [vmem:[#allocation4 + $0x13cc] ss:$16 sps:$4 sm:$0xff]  }
 0x51e   : > { %8251 = vmatpush2.bf16.msra.mxu1 %v11079_v5  ;;  %8131 = vmatprep.subr.bf16.mxu0 %v11084_v12  ;;  %v12172_v45 = vadd.f32 %v8611_v3, %v8610_v35  ;;  %v11153_v32 = vld [vmem:[#allocation4 + $0x184c] ss:$16 sps:$4 sm:$0xff]   ;;  %v11148_v18 = vld [vmem:[#allocation4 + $0x13c8] ss:$16 sps:$4 sm:$0xff]  }
 0x51f   : > { %8252 = vmatprep.subr.bf16.mxu1 %v11087_v57  ;;  %v11151_v5 = vld [vmem:[#allocation4 + $0x1848] ss:$16 sps:$4 sm:$0xff]   ;;  %v11156_v12 = vld [vmem:[#allocation4 + $0x13ac] ss:$16 sps:$4 sm:$0xff]  }
 0x520   : > { %v11159_v43 = vld [vmem:[#allocation4 + $0x182c] ss:$16 sps:$4 sm:$0xff]   ;;  %v11154_v57 = vld [vmem:[#allocation4 + $0x13a8] ss:$16 sps:$4 sm:$0xff]  }
 0x521   : > { %8132 = vmatpush2.bf16.msra.mxu0 %v11082_v62  ;;  %v11157_v35 = vld [vmem:[#allocation4 + $0x1828] ss:$16 sps:$4 sm:$0xff]   ;;  %v11162_v3 = vld [vmem:[#allocation4 + $0x138c] ss:$16 sps:$4 sm:$0xff]  }
 0x522   : > { %8253 = vmatpush2.bf16.msra.mxu1 %v11085_v9  ;;  %8133 = vmatprep.subr.bf16.mxu0 %v11090_v13  ;;  %v11165_v62 = vld [vmem:[#allocation4 + $0x180c] ss:$16 sps:$4 sm:$0xff]   ;;  %v11160_v9 = vld [vmem:[#allocation4 + $0x1388] ss:$16 sps:$4 sm:$0xff]  }
 0x523   : > { %8254 = vmatprep.subr.bf16.mxu1 %v11093_v19  ;;  %v11163_v13 = vld [vmem:[#allocation4 + $0x1808] ss:$16 sps:$4 sm:$0xff]   ;;  %v11168_v19 = vld [vmem:[#allocation4 + $0x136c] ss:$16 sps:$4 sm:$0xff]  }
 0x525   : > { %8134 = vmatpush2.bf16.msra.mxu0 %v11088_v4  ;;  %v11171_v4 = vld [vmem:[#allocation4 + $0x19ec] ss:$16 sps:$4 sm:$0xff]  }
 0x526   : > { %8255 = vmatpush2.bf16.msra.mxu1 %v11091_v49  ;;  %8189 = vmatprep.subr.bf16.mxu0 %v11096_v53  ;;  %v11166_v49 = vld [vmem:[#allocation4 + $0x1368] ss:$16 sps:$4 sm:$0xff]  }
 0x527   : > { %8256 = vmatprep.subr.bf16.mxu1 %v11099_v21  ;;  %v11169_v53 = vld [vmem:[#allocation4 + $0x19e8] ss:$16 sps:$4 sm:$0xff]   ;;  %v11174_v21 = vld [vmem:[#allocation4 + $0x134c] ss:$16 sps:$4 sm:$0xff]  }
 0x528   : > { %8136 = vmatmul.mubr.bf16.vlgmr.msra.gmra.mxu0 %v11890_v17  ;;  %v11112_v17 = vld [vmem:[#allocation4 + $0x1288] ss:$16 sps:$4 sm:$0xff]  }
 0x529   : > { %8190 = vmatpush1.bf16.msra.mxu0 %v11094_v47  ;;  %8221 = vmatprep.mubr.bf16.mxu0 %v11996_v38  ;;  %v11115_v38 = vld [vmem:[#allocation4 + $0x1508] ss:$16 sps:$4 sm:$0xff]   ;;  %v11177_v47 = vld [vmem:[#allocation4 + $0x19cc] ss:$16 sps:$4 sm:$0xff]  }
 0x52a   : > { %8257 = vmatpush2.bf16.msra.mxu1 %v11097_v61  ;;  %8191 = vmatprep.subr.bf16.mxu0 %v11102_v11  ;;  %v11172_v61 = vld [vmem:[#allocation4 + $0x1348] ss:$16 sps:$4 sm:$0xff]  }
 0x52b   : > { %8258 = vmatprep.subr.bf16.mxu1 %v11105_v58  ;;  %v11175_v11 = vld [vmem:[#allocation4 + $0x19c8] ss:$16 sps:$4 sm:$0xff]   ;;  %v11180_v58 = vld [vmem:[#allocation4 + $0x132c] ss:$16 sps:$4 sm:$0xff]  }
 0x52d   : > { %8192 = vmatpush1.bf16.msra.mxu0 %v11100_v23  ;;  %v11183_v23 = vld [vmem:[#allocation4 + $0x19ac] ss:$16 sps:$4 sm:$0xff]  }
 0x52e   : > { %8259 = vmatpush2.bf16.msra.mxu1 %v11103_v2  ;;  %8193 = vmatprep.subr.bf16.mxu0 %v11108_v30  ;;  %v11178_v2 = vld [vmem:[#allocation4 + $0x1328] ss:$16 sps:$4 sm:$0xff]  }
 0x52f   : > { %8260 = vmatprep.subr.bf16.mxu1 %v11111_v10  ;;  %v11181_v30 = vld [vmem:[#allocation4 + $0x19a8] ss:$16 sps:$4 sm:$0xff]   ;;  %v11186_v10 = vld [vmem:[#allocation4 + $0x130c] ss:$16 sps:$4 sm:$0xff]  }
 0x531   : > { %8194 = vmatpush1.bf16.msra.mxu0 %v11106_v46  ;;  %v11189_v46 = vld [vmem:[#allocation4 + $0x198c] ss:$16 sps:$4 sm:$0xff]  }
 0x532   : > { %8261 = vmatpush2.bf16.msra.mxu1 %v11109_v16  ;;  %8195 = vmatprep.subr.bf16.mxu0 %v11114_v60  ;;  %v11184_v16 = vld [vmem:[#allocation4 + $0x1308] ss:$16 sps:$4 sm:$0xff]  }
 0x533   : > { %8262 = vmatprep.subr.bf16.mxu1 %v11117_v27  ;;  %v11187_v60 = vld [vmem:[#allocation4 + $0x1988] ss:$16 sps:$4 sm:$0xff]   ;;  %v11192_v27 = vld [vmem:[#allocation4 + $0x16ec] ss:$16 sps:$4 sm:$0xff]  }
 0x535   : > { %8196 = vmatpush1.bf16.msra.mxu0 %v11112_v17  ;;  %v11195_v17 = vld [vmem:[#allocation4 + $0x196c] ss:$16 sps:$4 sm:$0xff]  }
 0x536   : > { %8263 = vmatpush2.bf16.msra.mxu1 %v11115_v38  ;;  %8197 = vmatprep.subr.bf16.mxu0 %v11120_v22  ;;  %v11190_v38 = vld [vmem:[#allocation4 + $0x16e8] ss:$16 sps:$4 sm:$0xff]  }
 0x537   : > { %8318 = vmatprep.subr.bf16.mxu1 %v11123_v26  ;;  %v11193_v22 = vld [vmem:[#allocation4 + $0x1968] ss:$16 sps:$4 sm:$0xff]   ;;  %v11198_v26 = vld [vmem:[#allocation4 + $0x16cc] ss:$16 sps:$4 sm:$0xff]  }
 0x539   : > { %8265 = vmatmul.mubr.bf16.vlgmr.msra.gmra.mxu1 %v12010_v28  ;;  %8198 = vmatpush1.bf16.msra.mxu0 %v11118_v31  ;;  %v11136_v28 = vld [vmem:[#allocation4 + $0x1208] ss:$16 sps:$4 sm:$0xff]   ;;  %v11201_v31 = vld [vmem:[#allocation4 + $0x194c] ss:$16 sps:$4 sm:$0xff]  }
 0x53a   : > { %8319 = vmatpush1.bf16.msra.mxu1 %v11121_v63  ;;  %8350 = vmatprep.mubr.bf16.mxu1 %v12014_v59  ;;  %v11147_v59 = vld [vmem:[#allocation4 + $0x186c] ss:$16 sps:$4 sm:$0xff]   ;;  %v11196_v63 = vld [vmem:[#allocation4 + $0x16c8] ss:$16 sps:$4 sm:$0xff]  }
 0x53b   : > { %8199 = vmatprep.subr.bf16.mxu0 %v11126_v0  ;;  %8320 = vmatprep.subr.bf16.mxu1 %v11129_v29  ;;  %v11199_v0 = vld [vmem:[#allocation4 + $0x1948] ss:$16 sps:$4 sm:$0xff]   ;;  %v11204_v29 = vld [vmem:[#allocation4 + $0x16ac] ss:$16 sps:$4 sm:$0xff]  }
 0x53d   : > { %8200 = vmatpush1.bf16.msra.mxu0 %v11124_v7  ;;  %v11207_v7 = vld [vmem:[#allocation4 + $0x192c] ss:$16 sps:$4 sm:$0xff]  }
 0x53e   : > { %8321 = vmatpush1.bf16.msra.mxu1 %v11127_v1  ;;  %8201 = vmatprep.subr.bf16.mxu0 %v11132_v25  ;;  %v11202_v1 = vld [vmem:[#allocation4 + $0x16a8] ss:$16 sps:$4 sm:$0xff]  }
 0x53f   : > { %8322 = vmatprep.subr.bf16.mxu1 %v11135_v39  ;;  %v11205_v25 = vld [vmem:[#allocation4 + $0x1928] ss:$16 sps:$4 sm:$0xff]   ;;  %v11210_v39 = vld [vmem:[#allocation4 + $0x168c] ss:$16 sps:$4 sm:$0xff]  }
 0x541   : > { %8202 = vmatpush1.bf16.msra.mxu0 %v11130_v44  ;;  %v11213_v44 = vld [vmem:[#allocation4 + $0x190c] ss:$16 sps:$4 sm:$0xff]  }
 0x542   : > { %8323 = vmatpush1.bf16.msra.mxu1 %v11133_v50  ;;  %8203 = vmatprep.subr.bf16.mxu0 %v11138_v52  ;;  %v11216_v50 = vld [vmem:[#allocation4 + $0x166c] ss:$16 sps:$4 sm:$0xff]  }
 0x543   : > { %8324 = vmatprep.subr.bf16.mxu1 %v11141_v42  ;;  %v11219_v52 = vld [vmem:[#allocation4 + $0x1cec] ss:$16 sps:$4 sm:$0xff]   ;;  %v11214_v42 = vld [vmem:[#allocation4 + $0x1668] ss:$16 sps:$4 sm:$0xff]  }
 0x545   : > { %8204 = vmatpush1.bf16.msra.mxu0 %v11136_v28  ;;  %v11217_v28 = vld [vmem:[#allocation4 + $0x1ce8] ss:$16 sps:$4 sm:$0xff]  }
 0x546   : > { %8325 = vmatpush1.bf16.msra.mxu1 %v11139_v34  ;;  %8205 = vmatprep.subr.bf16.mxu0 %v11144_v37  ;;  %v11222_v34 = vld [vmem:[#allocation4 + $0x164c] ss:$16 sps:$4 sm:$0xff]  }
 0x547   : > { %8326 = vmatprep.subr.bf16.mxu1 %v11147_v59  ;;  %v11225_v37 = vld [vmem:[#allocation4 + $0x1ccc] ss:$16 sps:$4 sm:$0xff]   ;;  %v11220_v59 = vld [vmem:[#allocation4 + $0x1648] ss:$16 sps:$4 sm:$0xff]  }
 0x549   : > { %8206 = vmatpush2.bf16.msra.mxu0 %v11142_v14  ;;  %v11223_v14 = vld [vmem:[#allocation4 + $0x1cc8] ss:$16 sps:$4 sm:$0xff]  }
 0x54a   : > { %8327 = vmatpush1.bf16.msra.mxu1 %v11145_v36  ;;  %8207 = vmatprep.subr.bf16.mxu0 %v11150_v6  ;;  %v11228_v36 = vld [vmem:[#allocation4 + $0x162c] ss:$16 sps:$4 sm:$0xff]  }
 0x54b   : > { %8328 = vmatprep.subr.bf16.mxu1 %v11153_v32  ;;  %v11231_v6 = vld [vmem:[#allocation4 + $0x1cac] ss:$16 sps:$4 sm:$0xff]   ;;  %v11226_v32 = vld [vmem:[#allocation4 + $0x1628] ss:$16 sps:$4 sm:$0xff]  }
 0x54d   : > { %8208 = vmatpush2.bf16.msra.mxu0 %v11148_v18  ;;  %v11229_v18 = vld [vmem:[#allocation4 + $0x1ca8] ss:$16 sps:$4 sm:$0xff]  }
 0x54e   : > { %8329 = vmatpush1.bf16.msra.mxu1 %v11151_v5  ;;  %8209 = vmatprep.subr.bf16.mxu0 %v11156_v12  ;;  %v11234_v5 = vld [vmem:[#allocation4 + $0x160c] ss:$16 sps:$4 sm:$0xff]  }
 0x54f   : > { %8330 = vmatprep.subr.bf16.mxu1 %v11159_v43  ;;  %v11237_v12 = vld [vmem:[#allocation4 + $0x1c8c] ss:$16 sps:$4 sm:$0xff]   ;;  %v11235_v43 = vld [vmem:[#allocation4 + $0x1c88] ss:$16 sps:$4 sm:$0xff]  }
 0x551   : > { %8210 = vmatpush2.bf16.msra.mxu0 %v11154_v57  ;;  %v11240_v57 = vld [vmem:[#allocation4 + $0x17ec] ss:$16 sps:$4 sm:$0xff]  }
 0x552   : > { %8331 = vmatpush1.bf16.msra.mxu1 %v11157_v35  ;;  %8211 = vmatprep.subr.bf16.mxu0 %v11162_v3  ;;  %v11238_v35 = vld [vmem:[#allocation4 + $0x17e8] ss:$16 sps:$4 sm:$0xff]  }
 0x553   : > { %8332 = vmatprep.subr.bf16.mxu1 %v11165_v62  ;;  %v11241_v3 = vld [vmem:[#allocation4 + $0x1c68] ss:$16 sps:$4 sm:$0xff]   ;;  %v11246_v62 = vld [vmem:[#allocation4 + $0x17cc] ss:$16 sps:$4 sm:$0xff]  }
 0x555   : > { %8212 = vmatpush2.bf16.msra.mxu0 %v11160_v9  ;;  %v11249_v9 = vld [vmem:[#allocation4 + $0x1c4c] ss:$16 sps:$4 sm:$0xff]  }
 0x556   : > { %8333 = vmatpush1.bf16.msra.mxu1 %v11163_v13  ;;  %8213 = vmatprep.subr.bf16.mxu0 %v11168_v19  ;;  %v11244_v13 = vld [vmem:[#allocation4 + $0x17c8] ss:$16 sps:$4 sm:$0xff]  }
 0x557   : > { %8334 = vmatprep.subr.bf16.mxu1 %v11171_v4  ;;  %v11247_v19 = vld [vmem:[#allocation4 + $0x1c48] ss:$16 sps:$4 sm:$0xff]   ;;  %v11252_v4 = vld [vmem:[#allocation4 + $0x17ac] ss:$16 sps:$4 sm:$0xff]  }
 0x559   : > { %8214 = vmatpush2.bf16.msra.mxu0 %v11166_v49  ;;  %v11255_v49 = vld [vmem:[#allocation4 + $0x1c2c] ss:$16 sps:$4 sm:$0xff]  }
 0x55a   : > { %8335 = vmatpush2.bf16.msra.mxu1 %v11169_v53  ;;  %8215 = vmatprep.subr.bf16.mxu0 %v11174_v21  ;;  %v11250_v53 = vld [vmem:[#allocation4 + $0x17a8] ss:$16 sps:$4 sm:$0xff]  }
 0x55b   : > { %8336 = vmatprep.subr.bf16.mxu1 %v11177_v47  ;;  %v11253_v21 = vld [vmem:[#allocation4 + $0x1c28] ss:$16 sps:$4 sm:$0xff]   ;;  %v11258_v47 = vld [vmem:[#allocation4 + $0x178c] ss:$16 sps:$4 sm:$0xff]  }
 0x55d   : > { %8216 = vmatpush2.bf16.msra.mxu0 %v11172_v61  ;;  %v11261_v61 = vld [vmem:[#allocation4 + $0x1c0c] ss:$16 sps:$4 sm:$0xff]  }
 0x55e   : > { %8337 = vmatpush2.bf16.msra.mxu1 %v11175_v11  ;;  %8217 = vmatprep.subr.bf16.mxu0 %v11180_v58  ;;  %v11256_v11 = vld [vmem:[#allocation4 + $0x1788] ss:$16 sps:$4 sm:$0xff]  }
 0x55f   : > { %8338 = vmatprep.subr.bf16.mxu1 %v11183_v23  ;;  %v11259_v58 = vld [vmem:[#allocation4 + $0x1c08] ss:$16 sps:$4 sm:$0xff]   ;;  %v11264_v23 = vld [vmem:[#allocation4 + $0x176c] ss:$16 sps:$4 sm:$0xff]  }
 0x561   : > { %8218 = vmatpush2.bf16.msra.mxu0 %v11178_v2  ;;  %v11267_v2 = vld [vmem:[#allocation4 + $0x1dec] ss:$16 sps:$4 sm:$0xff]  }
 0x562   : > { %8339 = vmatpush2.bf16.msra.mxu1 %v11181_v30  ;;  %8219 = vmatprep.subr.bf16.mxu0 %v11186_v10  ;;  %v11262_v30 = vld [vmem:[#allocation4 + $0x1768] ss:$16 sps:$4 sm:$0xff]  }
 0x563   : > { %8340 = vmatprep.subr.bf16.mxu1 %v11189_v46  ;;  %v11265_v10 = vld [vmem:[#allocation4 + $0x1de8] ss:$16 sps:$4 sm:$0xff]   ;;  %v11270_v46 = vld [vmem:[#allocation4 + $0x174c] ss:$16 sps:$4 sm:$0xff]  }
 0x565   : > { %8220 = vmatpush2.bf16.msra.mxu0 %v11184_v16  ;;  %v11273_v16 = vld [vmem:[#allocation4 + $0x1dcc] ss:$16 sps:$4 sm:$0xff]  }
 0x566   : > { %8341 = vmatpush2.bf16.msra.mxu1 %v11187_v60  ;;  %8275 = vmatprep.subr.bf16.mxu0 %v11192_v27  ;;  %v11268_v60 = vld [vmem:[#allocation4 + $0x1748] ss:$16 sps:$4 sm:$0xff]  }
 0x567   : > { %8342 = vmatprep.subr.bf16.mxu1 %v11195_v17  ;;  %v11271_v27 = vld [vmem:[#allocation4 + $0x1dc8] ss:$16 sps:$4 sm:$0xff]   ;;  %v11276_v17 = vld [vmem:[#allocation4 + $0x172c] ss:$16 sps:$4 sm:$0xff]  }
 0x568   : > { %8222 = vmatmul.mubr.bf16.vlgmr.msra.gmra.mxu0 %v11914_v55  ;;  %v11208_v55 = vld [vmem:[#allocation4 + $0x1688] ss:$16 sps:$4 sm:$0xff]  }
 0x569   : > { %8276 = vmatpush1.bf16.msra.mxu0 %v11190_v38  ;;  %8307 = vmatprep.mubr.bf16.mxu0 %v12020_v15  ;;  %v11211_v15 = vld [vmem:[#allocation4 + $0x1908] ss:$16 sps:$4 sm:$0xff]   ;;  %v11279_v38 = vld [vmem:[#allocation4 + $0x1dac] ss:$16 sps:$4 sm:$0xff]  }
 0x56a   : > { %8343 = vmatpush2.bf16.msra.mxu1 %v11193_v22  ;;  %8277 = vmatprep.subr.bf16.mxu0 %v11198_v26  ;;  %v11274_v22 = vld [vmem:[#allocation4 + $0x1728] ss:$16 sps:$4 sm:$0xff]  }
 0x56b   : > { %8344 = vmatprep.subr.bf16.mxu1 %v11201_v31  ;;  %v11277_v26 = vld [vmem:[#allocation4 + $0x1da8] ss:$16 sps:$4 sm:$0xff]   ;;  %v11282_v31 = vld [vmem:[#allocation4 + $0x170c] ss:$16 sps:$4 sm:$0xff]  }
 0x56d   : > { %8278 = vmatpush1.bf16.msra.mxu0 %v11196_v63  ;;  %v11285_v63 = vld [vmem:[#allocation4 + $0x1d8c] ss:$16 sps:$4 sm:$0xff]  }
 0x56e   : > { %8345 = vmatpush2.bf16.msra.mxu1 %v11199_v0  ;;  %8279 = vmatprep.subr.bf16.mxu0 %v11204_v29  ;;  %v11280_v0 = vld [vmem:[#allocation4 + $0x1708] ss:$16 sps:$4 sm:$0xff]  }
 0x56f   : > { %8346 = vmatprep.subr.bf16.mxu1 %v11207_v7  ;;  %v11283_v29 = vld [vmem:[#allocation4 + $0x1d88] ss:$16 sps:$4 sm:$0xff]   ;;  %v11288_v7 = vld [vmem:[#allocation4 + $0x1aec] ss:$16 sps:$4 sm:$0xff]  }
 0x571   : > { %8280 = vmatpush1.bf16.msra.mxu0 %v11202_v1  ;;  %v11291_v1 = vld [vmem:[#allocation4 + $0x1d6c] ss:$16 sps:$4 sm:$0xff]  }
 0x572   : > { %8347 = vmatpush2.bf16.msra.mxu1 %v11205_v25  ;;  %8281 = vmatprep.subr.bf16.mxu0 %v11210_v39  ;;  %v11286_v25 = vld [vmem:[#allocation4 + $0x1ae8] ss:$16 sps:$4 sm:$0xff]  }
 0x573   : > { %8348 = vmatprep.subr.bf16.mxu1 %v11213_v44  ;;  %v11289_v39 = vld [vmem:[#allocation4 + $0x1d68] ss:$16 sps:$4 sm:$0xff]   ;;  %v11294_v44 = vld [vmem:[#allocation4 + $0x1acc] ss:$16 sps:$4 sm:$0xff]  }
 0x575   : > { %8282 = vmatpush1.bf16.msra.mxu0 %v11208_v55  ;;  %v11297_v55 = vld [vmem:[#allocation4 + $0x1d4c] ss:$16 sps:$4 sm:$0xff]  }
 0x576   : > { %8349 = vmatpush2.bf16.msra.mxu1 %v11211_v15  ;;  %8283 = vmatprep.subr.bf16.mxu0 %v11216_v50  ;;  %v11292_v15 = vld [vmem:[#allocation4 + $0x1ac8] ss:$16 sps:$4 sm:$0xff]  }
 0x577   : > { %8404 = vmatprep.subr.bf16.mxu1 %v11219_v52  ;;  %v11295_v50 = vld [vmem:[#allocation4 + $0x1d48] ss:$16 sps:$4 sm:$0xff]   ;;  %v11300_v52 = vld [vmem:[#allocation4 + $0x1aac] ss:$16 sps:$4 sm:$0xff]  }
 0x579   : > { %8351 = vmatmul.mubr.bf16.vlgmr.msra.gmra.mxu1 %v11940_v54  ;;  %8284 = vmatpush1.bf16.msra.mxu0 %v11214_v42  ;;  %v11232_v54 = vld [vmem:[#allocation4 + $0x1608] ss:$16 sps:$4 sm:$0xff]   ;;  %v11303_v42 = vld [vmem:[#allocation4 + $0x1d2c] ss:$16 sps:$4 sm:$0xff]  }
 0x57a   : > { %8405 = vmatpush1.bf16.msra.mxu1 %v11217_v28  ;;  %8436 = vmatprep.mubr.bf16.mxu1 %v12038_v41  ;;  %v11243_v41 = vld [vmem:[#allocation4 + $0x1c6c] ss:$16 sps:$4 sm:$0xff]   ;;  %v11298_v28 = vld [vmem:[#allocation4 + $0x1aa8] ss:$16 sps:$4 sm:$0xff]  }
 0x57b   : > { %8285 = vmatprep.subr.bf16.mxu0 %v11222_v34  ;;  %8406 = vmatprep.subr.bf16.mxu1 %v11225_v37  ;;  %v11301_v34 = vld [vmem:[#allocation4 + $0x1d28] ss:$16 sps:$4 sm:$0xff]   ;;  %v11306_v37 = vld [vmem:[#allocation4 + $0x1a8c] ss:$16 sps:$4 sm:$0xff]  }
 0x57d   : > { %8286 = vmatpush1.bf16.msra.mxu0 %v11220_v59  ;;  %v11309_v59 = vld [vmem:[#allocation4 + $0x1d0c] ss:$16 sps:$4 sm:$0xff]  }
 0x57e   : > { %8407 = vmatpush1.bf16.msra.mxu1 %v11223_v14  ;;  %8287 = vmatprep.subr.bf16.mxu0 %v11228_v36  ;;  %v11312_v14 = vld [vmem:[#allocation4 + $0x1a6c] ss:$16 sps:$4 sm:$0xff]   ;;  %v11310_v36 = vld [vmem:[#allocation4 + $0x1a68] ss:$16 sps:$4 sm:$0xff]  }
 0x57f   : > { %8408 = vmatprep.subr.bf16.mxu1 %v11231_v6  ;;  %v11315_v6 = vld [vmem:[#allocation4 + $0x1a4c] ss:$16 sps:$4 sm:$0xff]  }
 0x581   : > { %8288 = vmatpush1.bf16.msra.mxu0 %v11226_v32  ;;  %v11313_v32 = vld [vmem:[#allocation4 + $0x1a48] ss:$16 sps:$4 sm:$0xff]  }
 0x582   : > { %8409 = vmatpush1.bf16.msra.mxu1 %v11229_v18  ;;  %8289 = vmatprep.subr.bf16.mxu0 %v11234_v5  ;;  %v11318_v18 = vld [vmem:[#allocation4 + $0x1a2c] ss:$16 sps:$4 sm:$0xff]   ;;  %v11316_v5 = vld [vmem:[#allocation4 + $0x1a28] ss:$16 sps:$4 sm:$0xff]  }
 0x583   : > { %8410 = vmatprep.subr.bf16.mxu1 %v11237_v12  ;;  %v11321_v12 = vld [vmem:[#allocation4 + $0x1a0c] ss:$16 sps:$4 sm:$0xff]  }
 0x585   : > { %8290 = vmatpush1.bf16.msra.mxu0 %v11232_v54  ;;  %v11319_v54 = vld [vmem:[#allocation4 + $0x1a08] ss:$16 sps:$4 sm:$0xff]  }
 0x586   : > { %8411 = vmatpush1.bf16.msra.mxu1 %v11235_v43  ;;  %8291 = vmatprep.subr.bf16.mxu0 %v11240_v57  ;;  %v11324_v43 = vld [vmem:[#allocation4 + $0x1bec] ss:$16 sps:$4 sm:$0xff]   ;;  %v11322_v57 = vld [vmem:[#allocation4 + $0x1be8] ss:$16 sps:$4 sm:$0xff]  }
 0x587   : > { %8412 = vmatprep.subr.bf16.mxu1 %v11243_v41  ;;  %v11327_v41 = vld [vmem:[#allocation4 + $0x1bcc] ss:$16 sps:$4 sm:$0xff]  }
 0x589   : > { %8292 = vmatpush2.bf16.msra.mxu0 %v11238_v35  ;;  %v11325_v35 = vld [vmem:[#allocation4 + $0x1bc8] ss:$16 sps:$4 sm:$0xff]  }
 0x58a   : > { %8413 = vmatpush1.bf16.msra.mxu1 %v11241_v3  ;;  %8293 = vmatprep.subr.bf16.mxu0 %v11246_v62  ;;  %v11328_v3 = vld [vmem:[#allocation4 + $0x1ba8] ss:$16 sps:$4 sm:$0xff]   ;;  %v11333_v62 = vld [vmem:[#allocation4 + $0x1b8c] ss:$16 sps:$4 sm:$0xff]  }
 0x58b   : > { %8414 = vmatprep.subr.bf16.mxu1 %v11249_v9  ;;  %v11331_v9 = vld [vmem:[#allocation4 + $0x1b88] ss:$16 sps:$4 sm:$0xff]  }
 0x58d   : > { %8294 = vmatpush2.bf16.msra.mxu0 %v11244_v13  ;;  %v11336_v13 = vld [vmem:[#allocation4 + $0x1b6c] ss:$16 sps:$4 sm:$0xff]  }
 0x58e   : > { %8415 = vmatpush1.bf16.msra.mxu1 %v11247_v19  ;;  %8295 = vmatprep.subr.bf16.mxu0 %v11252_v4  ;;  %v11334_v19 = vld [vmem:[#allocation4 + $0x1b68] ss:$16 sps:$4 sm:$0xff]   ;;  %v11339_v4 = vld [vmem:[#allocation4 + $0x1b4c] ss:$16 sps:$4 sm:$0xff]  }
 0x58f   : > { %8416 = vmatprep.subr.bf16.mxu1 %v11255_v49  ;;  %v11337_v49 = vld [vmem:[#allocation4 + $0x1b48] ss:$16 sps:$4 sm:$0xff]  }
 0x591   : > { %8296 = vmatpush2.bf16.msra.mxu0 %v11250_v53  ;;  %v11342_v53 = vld [vmem:[#allocation4 + $0x1b2c] ss:$16 sps:$4 sm:$0xff]  }
 0x592   : > { %8417 = vmatpush1.bf16.msra.mxu1 %v11253_v21  ;;  %8297 = vmatprep.subr.bf16.mxu0 %v11258_v47  ;;  %v11340_v21 = vld [vmem:[#allocation4 + $0x1b28] ss:$16 sps:$4 sm:$0xff]   ;;  %v11345_v47 = vld [vmem:[#allocation4 + $0x1b0c] ss:$16 sps:$4 sm:$0xff]  }
 0x593   : > { %8418 = vmatprep.subr.bf16.mxu1 %v11261_v61  ;;  %v11343_v61 = vld [vmem:[#allocation4 + $0x1b08] ss:$16 sps:$4 sm:$0xff]  }
 0x595   : > { %8298 = vmatpush2.bf16.msra.mxu0 %v11256_v11  ;;  %v11348_v11 = vld [vmem:[#allocation4 + $0x1eec] ss:$16 sps:$4 sm:$0xff]  }
 0x596   : > { %8419 = vmatpush1.bf16.msra.mxu1 %v11259_v58  ;;  %8299 = vmatprep.subr.bf16.mxu0 %v11264_v23  ;;  %v11346_v58 = vld [vmem:[#allocation4 + $0x1ee8] ss:$16 sps:$4 sm:$0xff]   ;;  %v11351_v23 = vld [vmem:[#allocation4 + $0x1ecc] ss:$16 sps:$4 sm:$0xff]  }
 0x597   : > { %8420 = vmatprep.subr.bf16.mxu1 %v11267_v2  ;;  %v11349_v2 = vld [vmem:[#allocation4 + $0x1ec8] ss:$16 sps:$4 sm:$0xff]  }
 0x599   : > { %8300 = vmatpush2.bf16.msra.mxu0 %v11262_v30  ;;  %v11354_v30 = vld [vmem:[#allocation4 + $0x1eac] ss:$16 sps:$4 sm:$0xff]  }
 0x59a   : > { %8421 = vmatpush2.bf16.msra.mxu1 %v11265_v10  ;;  %8301 = vmatprep.subr.bf16.mxu0 %v11270_v46  ;;  %v11352_v10 = vld [vmem:[#allocation4 + $0x1ea8] ss:$16 sps:$4 sm:$0xff]   ;;  %v11357_v46 = vld [vmem:[#allocation4 + $0x1e8c] ss:$16 sps:$4 sm:$0xff]  }
 0x59b   : > { %8422 = vmatprep.subr.bf16.mxu1 %v11273_v16  ;;  %v11355_v16 = vld [vmem:[#allocation4 + $0x1e88] ss:$16 sps:$4 sm:$0xff]  }
 0x59d   : > { %8302 = vmatpush2.bf16.msra.mxu0 %v11268_v60  ;;  %v11360_v60 = vld [vmem:[#allocation4 + $0x1e6c] ss:$16 sps:$4 sm:$0xff]  }
 0x59e   : > { %8423 = vmatpush2.bf16.msra.mxu1 %v11271_v27  ;;  %8303 = vmatprep.subr.bf16.mxu0 %v11276_v17  ;;  %v11358_v27 = vld [vmem:[#allocation4 + $0x1e68] ss:$16 sps:$4 sm:$0xff]   ;;  %v11363_v17 = vld [vmem:[#allocation4 + $0x1e4c] ss:$16 sps:$4 sm:$0xff]  }
 0x59f   : > { %8424 = vmatprep.subr.bf16.mxu1 %v11279_v38  ;;  %v11366_v38 = vld [vmem:[#allocation4 + $0x1e2c] ss:$16 sps:$4 sm:$0xff]  }
 0x5a1   : > { %8304 = vmatpush2.bf16.msra.mxu0 %v11274_v22  ;;  %v11369_v22 = vld [vmem:[#allocation4 + $0x1e0c] ss:$16 sps:$4 sm:$0xff]  }
 0x5a2   : > { %8425 = vmatpush2.bf16.msra.mxu1 %v11277_v26  ;;  %8305 = vmatprep.subr.bf16.mxu0 %v11282_v31  ;;  %v11367_v26 = vld [vmem:[#allocation4 + $0x1e08] ss:$16 sps:$4 sm:$0xff]   ;;  %v11372_v31 = vld [vmem:[#allocation4 + $0x1fec] ss:$16 sps:$4 sm:$0xff]  }
 0x5a3   : > { %8426 = vmatprep.subr.bf16.mxu1 %v11285_v63  ;;  %v11370_v63 = vld [vmem:[#allocation4 + $0x1fe8] ss:$16 sps:$4 sm:$0xff]  }
 0x5a5   : > { %8306 = vmatpush2.bf16.msra.mxu0 %v11280_v0  ;;  %v11375_v0 = vld [vmem:[#allocation4 + $0x1fcc] ss:$16 sps:$4 sm:$0xff]  }
 0x5a6   : > { %8427 = vmatpush2.bf16.msra.mxu1 %v11283_v29  ;;  %8361 = vmatprep.subr.bf16.mxu0 %v11288_v7  ;;  %v11373_v29 = vld [vmem:[#allocation4 + $0x1fc8] ss:$16 sps:$4 sm:$0xff]   ;;  %v11378_v7 = vld [vmem:[#allocation4 + $0x1fac] ss:$16 sps:$4 sm:$0xff]  }
 0x5a7   : > { %8428 = vmatprep.subr.bf16.mxu1 %v11291_v1  ;;  %v11376_v1 = vld [vmem:[#allocation4 + $0x1fa8] ss:$16 sps:$4 sm:$0xff]  }
 0x5a8   : > { %8308 = vmatmul.mubr.bf16.vlgmr.msra.gmra.mxu0 %v11934_v33  ;;  %v11304_v33 = vld [vmem:[#allocation4 + $0x1a88] ss:$16 sps:$4 sm:$0xff]  }
 0x5a9   : > { %8362 = vmatpush1.bf16.msra.mxu0 %v11286_v25  ;;  %8393 = vmatprep.mubr.bf16.mxu0 %v12044_v56  ;;  %v11307_v56 = vld [vmem:[#allocation4 + $0x1d08] ss:$16 sps:$4 sm:$0xff]   ;;  %v11381_v25 = vld [vmem:[#allocation4 + $0x1f8c] ss:$16 sps:$4 sm:$0xff]  }
 0x5aa   : > { %8429 = vmatpush2.bf16.msra.mxu1 %v11289_v39  ;;  %8363 = vmatprep.subr.bf16.mxu0 %v11294_v44  ;;  %v11379_v39 = vld [vmem:[#allocation4 + $0x1f88] ss:$16 sps:$4 sm:$0xff]   ;;  %v11384_v44 = vld [vmem:[#allocation4 + $0x1f6c] ss:$16 sps:$4 sm:$0xff]  }
 0x5ab   : > { %8430 = vmatprep.subr.bf16.mxu1 %v11297_v55  ;;  %v11382_v55 = vld [vmem:[#allocation4 + $0x1f68] ss:$16 sps:$4 sm:$0xff]  }
 0x5ad   : > { %8364 = vmatpush1.bf16.msra.mxu0 %v11292_v15  ;;  %v11387_v15 = vld [vmem:[#allocation4 + $0x1f4c] ss:$16 sps:$4 sm:$0xff]  }
 0x5ae   : > { %8431 = vmatpush2.bf16.msra.mxu1 %v11295_v50  ;;  %8365 = vmatprep.subr.bf16.mxu0 %v11300_v52  ;;  %v11385_v50 = vld [vmem:[#allocation4 + $0x1f48] ss:$16 sps:$4 sm:$0xff]   ;;  %v11390_v52 = vld [vmem:[#allocation4 + $0x1f2c] ss:$16 sps:$4 sm:$0xff]  }
 0x5af   : > { %8432 = vmatprep.subr.bf16.mxu1 %v11303_v42  ;;  %v11388_v42 = vld [vmem:[#allocation4 + $0x1f28] ss:$16 sps:$4 sm:$0xff]  }
 0x5b1   : > { %8366 = vmatpush1.bf16.msra.mxu0 %v11298_v28  ;;  %v11393_v28 = vld [vmem:[#allocation4 + $0x1f0c] ss:$16 sps:$4 sm:$0xff]  }
 0x5b2   : > { %8433 = vmatpush2.bf16.msra.mxu1 %v11301_v34  ;;  %8367 = vmatprep.subr.bf16.mxu0 %v11306_v37  ;;  %v11391_v34 = vld [vmem:[#allocation4 + $0x1f08] ss:$16 sps:$4 sm:$0xff]   ;;  %v7836_v37 = vpop.f32.mrf.mxu1 }
 0x5b3   : > { %8434 = vmatprep.subr.bf16.mxu1 %v11309_v59 }
 0x5b4   : > { %v7838_v59 = vpop.f32.mrf.mxu1 }
 0x5b5   : > { %8368 = vmatpush1.bf16.msra.mxu0 %v11304_v33 }
 0x5b6   : > { %8435 = vmatpush2.bf16.msra.mxu1 %v11307_v56  ;;  %8369 = vmatprep.subr.bf16.mxu0 %v11312_v14  ;;  %v7840_v33 = vpop.f32.mrf.mxu1  ;;  %v7879_v56 = vpop.f32.mrf.mxu0 }
 0x5b8   : > { %v7842_v14 = vpop.f32.mrf.mxu1 }
 0x5b9   : > { %8437 = vmatmul.mubr.bf16.vlgmr.msra.gmra.mxu1 %v11952_v48  ;;  %8370 = vmatpush1.bf16.msra.mxu0 %v11310_v36  ;;  %v11330_v48 = vld [vmem:[#allocation4 + $0x1bac] ss:$16 sps:$4 sm:$0xff]   ;;  %v7881_v36 = vpop.f32.mrf.mxu0 }
 0x5ba   : > { %8371 = vmatprep.subr.bf16.mxu0 %v11315_v6  ;;  %v7922_v6 = vpop.f32.mrf.mxu1 }
 0x5bd   : > { %8372 = vmatpush1.bf16.msra.mxu0 %v11313_v32  ;;  %v7883_v32 = vpop.f32.mrf.mxu0 }
 0x5be   : > { %8373 = vmatprep.subr.bf16.mxu0 %v11318_v18  ;;  %v7924_v18 = vpop.f32.mrf.mxu1 }
 0x5c1   : > { %8374 = vmatpush1.bf16.msra.mxu0 %v11316_v5  ;;  %v7885_v5 = vpop.f32.mrf.mxu0 }
 0x5c2   : > { %8375 = vmatprep.subr.bf16.mxu0 %v11321_v12  ;;  %v7926_v12 = vpop.f32.mrf.mxu1 }
 0x5c5   : > { %8376 = vmatpush1.bf16.msra.mxu0 %v11319_v54  ;;  %v7965_v54 = vpop.f32.mrf.mxu0 }
 0x5c6   : > { %8377 = vmatprep.subr.bf16.mxu0 %v11324_v43  ;;  %v7928_v43 = vpop.f32.mrf.mxu1 }
 0x5c9   : > { %8378 = vmatpush2.bf16.msra.mxu0 %v11322_v57  ;;  %v7967_v57 = vpop.f32.mrf.mxu0 }
 0x5ca   : > { %8379 = vmatprep.subr.bf16.mxu0 %v11327_v41  ;;  %v8008_v41 = vpop.f32.mrf.mxu1 }
 0x5cd   : > { %8380 = vmatpush2.bf16.msra.mxu0 %v11325_v35  ;;  %v7969_v35 = vpop.f32.mrf.mxu0 }
 0x5ce   : > { %8381 = vmatprep.subr.bf16.mxu0 %v11330_v48  ;;  %v8010_v48 = vpop.f32.mrf.mxu1 }
 0x5d1   : > { %8382 = vmatpush2.bf16.msra.mxu0 %v11328_v3  ;;  %v7971_v3 = vpop.f32.mrf.mxu0 }
 0x5d2   : > { %8383 = vmatprep.subr.bf16.mxu0 %v11333_v62  ;;  %v8012_v62 = vpop.f32.mrf.mxu1 }
 0x5d5   : > { %8384 = vmatpush2.bf16.msra.mxu0 %v11331_v9  ;;  %v8014_v9 = vpop.f32.mrf.mxu1 }
 0x5d6   : > { %8385 = vmatprep.subr.bf16.mxu0 %v11336_v13 }
 0x5d9   : > { %8386 = vmatpush2.bf16.msra.mxu0 %v11334_v19  ;;  %v8094_v19 = vpop.f32.mrf.mxu1 }
 0x5da   : > { %8387 = vmatprep.subr.bf16.mxu0 %v11339_v4 }
 0x5dd   : > { %8388 = vmatpush2.bf16.msra.mxu0 %v11337_v49  ;;  %v8096_v49 = vpop.f32.mrf.mxu1 }
 0x5de   : > { %8389 = vmatprep.subr.bf16.mxu0 %v11342_v53 }
 0x5e1   : > { %8390 = vmatpush2.bf16.msra.mxu0 %v11340_v21  ;;  %v8098_v21 = vpop.f32.mrf.mxu1 }
 0x5e2   : > { %8391 = vmatprep.subr.bf16.mxu0 %v11345_v47 }
 0x5e5   : > { %8392 = vmatpush2.bf16.msra.mxu0 %v11343_v61  ;;  %v8100_v61 = vpop.f32.mrf.mxu1 }
 0x5e6   : > { %8447 = vmatprep.subr.bf16.mxu0 %v11348_v11 }
 0x5e8   : > { %8394 = vmatmul.mubr.bf16.vlgmr.msra.gmra.mxu0 %v11946_v8  ;;  %v11361_v8 = vld [vmem:[#allocation4 + $0x1e48] ss:$16 sps:$4 sm:$0xff]  }
 0x5e9   : > { %8448 = vmatpush1.bf16.msra.mxu0 %v11346_v58  ;;  %8479 = vmatprep.mubr.bf16.mxu0 %v12064_v20  ;;  %v11364_v20 = vld [vmem:[#allocation4 + $0x1e28] ss:$16 sps:$4 sm:$0xff]   ;;  %v8180_v58 = vpop.f32.mrf.mxu1 }
 0x5ea   : > { %8449 = vmatprep.subr.bf16.mxu0 %v11351_v23 }
 0x5ed   : > { %8450 = vmatpush1.bf16.msra.mxu0 %v11349_v2  ;;  %v8182_v2 = vpop.f32.mrf.mxu1 }
 0x5ee   : > { %8451 = vmatprep.subr.bf16.mxu0 %v11354_v30 }
 0x5f1   : > { %8452 = vmatpush1.bf16.msra.mxu0 %v11352_v10  ;;  %v8184_v10 = vpop.f32.mrf.mxu1 }
 0x5f2   : > { %8453 = vmatprep.subr.bf16.mxu0 %v11357_v46 }
 0x5f5   : > { %8454 = vmatpush1.bf16.msra.mxu0 %v11355_v16  ;;  %v7880_v16 = vadd.f32 %v7879_v56, %v7836_v37 }
 0x5f6   : > { %8455 = vmatprep.subr.bf16.mxu0 %v11360_v60  ;;  %v7882_v60 = vadd.f32 %v7881_v36, %v7838_v59 }
 0x5f9   : > { %8456 = vmatpush1.bf16.msra.mxu0 %v11358_v27  ;;  %v8186_v27 = vpop.f32.mrf.mxu1 }
 0x5fa   : > { %8457 = vmatprep.subr.bf16.mxu0 %v11363_v17 }
 0x5fd   : > { %8458 = vmatpush1.bf16.msra.mxu0 %v11361_v8  ;;  %v7884_v8 = vadd.f32 %v7883_v32, %v7840_v33 }
 0x5fe   : > { %8459 = vmatprep.subr.bf16.mxu0 %v11366_v38  ;;  %v8266_v38 = vpop.f32.mrf.mxu1 }
 0x601   : > { %8460 = vmatpush1.bf16.msra.mxu0 %v11364_v20  ;;  %v7886_v20 = vadd.f32 %v7885_v5, %v7842_v14 }
 0x602   : > { %8461 = vmatprep.subr.bf16.mxu0 %v11369_v22  ;;  %v7923_v22 = vadd.f32 %v7922_v6, %v7880_v16 }
 0x605   : > { %8462 = vmatpush1.bf16.msra.mxu0 %v11367_v26  ;;  %v7925_v26 = vadd.f32 %v7924_v18, %v7882_v60 }
 0x606   : > { %8463 = vmatprep.subr.bf16.mxu0 %v11372_v31 }
 0x609   : > { %8464 = vmatpush2.bf16.msra.mxu0 %v11370_v63  ;;  %v7966_v63 = vadd.f32 %v7965_v54, %v7923_v22 }
 0x60a   : > { %8465 = vmatprep.subr.bf16.mxu0 %v11375_v0  ;;  %v7927_v0 = vadd.f32 %v7926_v12, %v7884_v8 }
 0x60d   : > { %8466 = vmatpush2.bf16.msra.mxu0 %v11373_v29  ;;  %v7968_v29 = vadd.f32 %v7967_v57, %v7925_v26 }
 0x60e   : > { %8467 = vmatprep.subr.bf16.mxu0 %v11378_v7  ;;  %v8268_v7 = vpop.f32.mrf.mxu1 }
 0x611   : > { %8468 = vmatpush2.bf16.msra.mxu0 %v11376_v1  ;;  %v7970_v1 = vadd.f32 %v7969_v35, %v7927_v0 }
 0x612   : > { %8469 = vmatprep.subr.bf16.mxu0 %v11381_v25  ;;  %v7929_v25 = vadd.f32 %v7928_v43, %v7886_v20 }
 0x615   : > { %8470 = vmatpush2.bf16.msra.mxu0 %v11379_v39 }
 0x616   : > { %8471 = vmatprep.subr.bf16.mxu0 %v11384_v44  ;;  %v7972_v44 = vadd.f32 %v7971_v3, %v7929_v25 }
 0x618   : > { %v8015_v59 = vadd.f32 %v8014_v9, %v7972_v44 }
 0x619   : > { %8472 = vmatpush2.bf16.msra.mxu0 %v11382_v55  ;;  %v8009_v55 = vadd.f32 %v8008_v41, %v7966_v63 }
 0x61a   : > { %8473 = vmatprep.subr.bf16.mxu0 %v11387_v15  ;;  %v8011_v15 = vadd.f32 %v8010_v48, %v7968_v29 }
 0x61d   : > { %8474 = vmatpush2.bf16.msra.mxu0 %v11385_v50  ;;  %v8270_v50 = vpop.f32.mrf.mxu1 }
 0x61e   : > { %8475 = vmatprep.subr.bf16.mxu0 %v11390_v52 }
 0x61f   : > { %v8272_v33 = vpop.f32.mrf.mxu1 }
 0x621   : > { %8476 = vmatpush2.bf16.msra.mxu0 %v11388_v42 }
 0x622   : > { %8477 = vmatprep.subr.bf16.mxu0 %v11393_v28  ;;  %v8013_v28 = vadd.f32 %v8012_v62, %v7970_v1 }
 0x625   : > { %8478 = vmatpush2.bf16.msra.mxu0 %v11391_v34 }
 0x628   : > { %8480 = vmatmul.mubr.bf16.vlgmr.msra.gmra.mxu0 %v11958_v24  ;;  %v8051_v24 = vpop.f32.mrf.mxu0 }
 0x629   : > { %v8052_v42 = vadd.f32 %v8051_v24, %v8009_v55 }
 0x62a   : > { %v8053_v13 = vpop.f32.mrf.mxu0 }
 0x62b   : > { %v8054_v34 = vadd.f32 %v8053_v13, %v8011_v15  ;;  %v8095_v36 = vadd.f32 %v8094_v19, %v8052_v42 }
 0x62c   : > { %v8055_v4 = vpop.f32.mrf.mxu0 }
 0x62d   : > { %v8056_v37 = vadd.f32 %v8055_v4, %v8013_v28  ;;  %v8097_v6 = vadd.f32 %v8096_v49, %v8054_v34 }
 0x62e   : > { %v8057_v53 = vpop.f32.mrf.mxu0 }
 0x62f   : > { %v8058_v14 = vadd.f32 %v8057_v53, %v8015_v59  ;;  %v8099_v5 = vadd.f32 %v8098_v21, %v8056_v37 }
 0x630   : > { %v8137_v47 = vpop.f32.mrf.mxu0 }
 0x631   : > { %v8138_v18 = vadd.f32 %v8137_v47, %v8095_v36  ;;  %v8101_v57 = vadd.f32 %v8100_v61, %v8058_v14 }
 0x632   : > { %v8139_v11 = vpop.f32.mrf.mxu0 }
 0x633   : > { %v8140_v12 = vadd.f32 %v8139_v11, %v8097_v6  ;;  %v8181_v48 = vadd.f32 %v8180_v58, %v8138_v18 }
 0x634   : > { %v8141_v23 = vpop.f32.mrf.mxu0 }
 0x635   : > { %v8142_v43 = vadd.f32 %v8141_v23, %v8099_v5  ;;  %v8183_v3 = vadd.f32 %v8182_v2, %v8140_v12 }
 0x636   : > { %v8143_v30 = vpop.f32.mrf.mxu0 }
 0x637   : > { %v8144_v35 = vadd.f32 %v8143_v30, %v8101_v57  ;;  %v8185_v13 = vadd.f32 %v8184_v10, %v8142_v43 }
 0x638   : > { %v8223_v46 = vpop.f32.mrf.mxu0 }
 0x639   : > { %v8352_v32 = vpop.f32.mrf.mxu1  ;;  %v8224_v24 = vadd.f32 %v8223_v46, %v8181_v48  ;;  %v8187_v19 = vadd.f32 %v8186_v27, %v8144_v35 }
 0x63a   : > { %v8225_v17 = vpop.f32.mrf.mxu0 }
 0x63b   : > { %v8354_v41 = vpop.f32.mrf.mxu1  ;;  %v8226_v9 = vadd.f32 %v8225_v17, %v8183_v3  ;;  %v8267_v60 = vadd.f32 %v8266_v38, %v8224_v24 }
 0x63c   : > { %v8227_v31 = vpop.f32.mrf.mxu0 }
 0x63d   : > { %v8356_v4 = vpop.f32.mrf.mxu1  ;;  %v8228_v53 = vadd.f32 %v8227_v31, %v8185_v13  ;;  %v8269_v21 = vadd.f32 %v8268_v7, %v8226_v9 }
 0x63e   : > { %v8229_v39 = vpop.f32.mrf.mxu0 }
 0x63f   : > { %v8230_v49 = vadd.f32 %v8229_v39, %v8187_v19  ;;  %v8358_v47 = vpop.f32.mrf.mxu1  ;;  %v8271_v23 = vadd.f32 %v8270_v50, %v8228_v53 }
 0x641   : > { %v8273_v58 = vadd.f32 %v8272_v33, %v8230_v49 }
 0x668   : > { %v8309_v52 = vpop.f32.mrf.mxu0 }
 0x669   : > { %v8310_v8 = vadd.f32 %v8309_v52, %v8267_v60 }
 0x66a   : > { %v8311_v56 = vpop.f32.mrf.mxu0 }
 0x66b   : > { %v8312_v61 = vadd.f32 %v8311_v56, %v8269_v21  ;;  %v8353_v46 = vadd.f32 %v8352_v32, %v8310_v8 }
 0x66c   : > { %v8313_v54 = vpop.f32.mrf.mxu0 }
 0x66d   : > { %v8314_v30 = vadd.f32 %v8313_v54, %v8271_v23  ;;  %v8355_v17 = vadd.f32 %v8354_v41, %v8312_v61 }
 0x66e   : > { %v8315_v62 = vpop.f32.mrf.mxu0 }
 0x66f   : > { %v8316_v22 = vadd.f32 %v8315_v62, %v8273_v58  ;;  %v8357_v63 = vadd.f32 %v8356_v4, %v8314_v30 }
 0x671   : > { %v8359_v38 = vadd.f32 %v8358_v47, %v8316_v22 }
 0x679   : > { %v8438_v20 = vpop.f32.mrf.mxu1 }
 0x67b   : > { %v8440_v10 = vpop.f32.mrf.mxu1 }
 0x67d   : > { %v8442_v29 = vpop.f32.mrf.mxu1 }
 0x67f   : > { %v8444_v50 = vpop.f32.mrf.mxu1 }
 0x6a8   : > { %v8395_v16 = vpop.f32.mrf.mxu0 }
 0x6a9   : > { %v8396_v26 = vadd.f32 %v8395_v16, %v8353_v46 }
 0x6aa   : > { %v8397_v11 = vpop.f32.mrf.mxu0 }
 0x6ab   : > { %v8398_v31 = vadd.f32 %v8397_v11, %v8355_v17  ;;  %v8439_v25 = vadd.f32 %v8438_v20, %v8396_v26 }
 0x6ac   : > { %v8399_v2 = vpop.f32.mrf.mxu0 }
 0x6ad   : > { %v8400_v0 = vadd.f32 %v8399_v2, %v8357_v63  ;;  %v8441_v39 = vadd.f32 %v8440_v10, %v8398_v31 }
 0x6ae   : > { %v8401_v27 = vpop.f32.mrf.mxu0 }
 0x6af   : > { %v8402_v1 = vadd.f32 %v8401_v27, %v8359_v38  ;;  %v8443_v15 = vadd.f32 %v8442_v29, %v8400_v0 }
 0x6b1   : > { %v8445_v34 = vadd.f32 %v8444_v50, %v8402_v1 }
 0x6e8   : > { %v8481_v7 = vpop.f32.mrf.mxu0 }
 0x6e9   : > { %v8482_v55 = vadd.f32 %v8481_v7, %v8439_v25  ;;  %v8598_v25 = vmul.f32 0.2, %v12168_v51 }
 0x6ea   : > { %v8483_v44 = vpop.f32.mrf.mxu0 }
 0x6eb   : > { %v8484_v52 = vadd.f32 %v8483_v44, %v8441_v39  ;;  %v8524_v59 = vmul.f32 %v8482_v55, %v8482_v55 }
 0x6ec   : > { %v8485_v42 = vpop.f32.mrf.mxu0 }
 0x6ed   : > { %v8486_v28 = vadd.f32 %v8485_v42, %v8443_v15  ;;  %v8525_v36 = vmul.f32 %v8484_v52, %v8484_v52  ;;  %v1344_v15 = vld [vmem:[#allocation6 + $0x10] sm:$0xff] }
 0x6ee   : > { %v8487_v37 = vpop.f32.mrf.mxu0 }
 0x6ef   : > { %v8504_v33 = vadd.f32 %v8486_v28, %v8482_v55  ;;  %v8528_v56 = vmul.f32 %v8486_v28, %v8486_v28  ;;  %v8488_v14 = vadd.f32 %v8487_v37, %v8445_v34  ;;  %v8599_v34 = vmul.f32 0.2, %v12170_v40 }
 0x6f1   : > { %v8505_v6 = vrot.slane %v8504_v33, 4  ;;  %v8544_v32 = vadd.f32 %v8528_v56, %v8524_v59  ;;  %v8511_v18 = vadd.f32 %v8488_v14, %v8484_v52  ;;  %v8529_v5 = vmul.f32 %v8488_v14, %v8488_v14 }
 0x6f3   : > { %v8506_v12 = vadd.f32 %v8505_v6, %v8504_v33  ;;  %v8545_v54 = vrot.slane %v8544_v32, 4  ;;  %v8512_v43 = vrot.slane %v8511_v18, 4  ;;  %v8551_v57 = vadd.f32 %v8529_v5, %v8525_v36  ;;  %v1345_v33 = vld [vmem:[#allocation6 + $0x18] sm:$0xff]  ;;  %v1347_v5 = vld [vmem:[#allocation6 + $0x28] sm:$0xff] }
 0x6f5   : > { %v8507_v41 = vrot.slane %v8506_v12, 2  ;;  %v8546_v35 = vadd.f32 %v8545_v54, %v8544_v32  ;;  %v8513_v48 = vadd.f32 %v8512_v43, %v8511_v18  ;;  %v8552_v3 = vrot.slane %v8551_v57, 4 }
 0x6f6   : > { %v8607_v18 = vmax.f32 %v12170_v40, %v8599_v34 }
 0x6f7   : > { %v8508_v62 = vadd.f32 %v8507_v41, %v8506_v12  ;;  %v8547_v24 = vrot.slane %v8546_v35, 2  ;;  %v8514_v13 = vrot.slane %v8513_v48, 2  ;;  %v8553_v9 = vadd.f32 %v8552_v3, %v8551_v57  ;;  %v1348_v57 = vld [vmem:[#allocation6 + $0x30] sm:$0xff]  ;;  %v1349_v3 = vld [vmem:[#allocation6 + $0x38] sm:$0xff] }
 0x6f9   : > { %v8509_v4 = vrot.slane %v8508_v62, 1  ;;  %v8548_v16 = vadd.f32 %v8547_v24, %v8546_v35  ;;  %v8515_v53 = vadd.f32 %v8514_v13, %v8513_v48  ;;  %v8554_v19 = vrot.slane %v8553_v9, 2 }
 0x6fa   : > { %v8615_v35 = vmul.f32 %v8607_v18, %v1347_v5 }
 0x6fb   : > { %v8510_v49 = vadd.f32 %v8509_v4, %v8508_v62  ;;  %v8549_v60 = vrot.slane %v8548_v16, 1  ;;  %v8516_v47 = vrot.slane %v8515_v53, 1  ;;  %v8555_v21 = vadd.f32 %v8554_v19, %v8553_v9 }
 0x6fd   : > { %v8520_v11 = vmul.f32 0.0625, %v8510_v49  ;;  %v8550_v8 = vadd.f32 %v8549_v60, %v8548_v16  ;;  %v8517_v23 = vadd.f32 %v8516_v47, %v8515_v53  ;;  %v8556_v61 = vrot.slane %v8555_v21, 1 }
 0x6ff   : > { %v8560_v20 = vmul.f32 0.0625, %v8550_v8  ;;  %v8564_v30 = vmul.f32 %v8520_v11, %v8520_v11  ;;  %v8521_v58 = vmul.f32 0.0625, %v8517_v23  ;;  %v8557_v2 = vadd.f32 %v8556_v61, %v8555_v21 }
 0x700   : > { %v8572_v31 = vsub.f32 %v8482_v55, %v8520_v11  ;;  %v8576_v38 = vsub.f32 %v8486_v28, %v8520_v11  ;;  %v8606_v55 = vmax.f32 %v12168_v51, %v8598_v25 }
 0x701   : > { %v8568_v22 = vsub.f32 %v8560_v20, %v8564_v30  ;;  %v8561_v46 = vmul.f32 0.0625, %v8557_v2  ;;  %v8565_v10 = vmul.f32 %v8521_v58, %v8521_v58  ;;  %v8573_v29 = vsub.f32 %v8484_v52, %v8521_v58  ;;  %v1346_v52 = vld [vmem:[#allocation6 + $0x20] sm:$0xff] }
 0x702   : > { %v8577_v44 = vsub.f32 %v8488_v14, %v8521_v58  ;;  %v8614_v54 = vmul.f32 %v8606_v55, %v1346_v52 }
 0x703   : > { %v8580_v17 = vadd.f32 1e-05, %v8568_v22  ;;  %v8569_v26 = vsub.f32 %v8561_v46, %v8565_v10 }
 0x705   : > { %11402 = vrsqrt.f32 %v8580_v17  ;;  %v8581_v63 = vadd.f32 1e-05, %v8569_v26 }
 0x707   : > { %11404 = vrsqrt.f32 %v8581_v63 }
 0x712   : > { %v11403_v27 = vpop.eup %11402 }
 0x713   : > { %v8588_v0 = vmul.f32 %v11403_v27, %v8572_v31  ;;  %v8592_v39 = vmul.f32 %v11403_v27, %v8576_v38 }
 0x714   : > { %v11405_v7 = vpop.eup %11404 }
 0x715   : > { %v8596_v1 = vmul.f32 0.2, %v8588_v0  ;;  %v8589_v50 = vmul.f32 %v11405_v7, %v8573_v29  ;;  %v8593_v37 = vmul.f32 %v11405_v7, %v8577_v44  ;;  %v8600_v36 = vmul.f32 0.2, %v8592_v39 }
 0x717   : > { %v8604_v42 = vmax.f32 %v8588_v0, %v8596_v1  ;;  %v8597_v59 = vmul.f32 0.2, %v8589_v50  ;;  %v8601_v32 = vmul.f32 0.2, %v8593_v37  ;;  %v8608_v12 = vmax.f32 %v8592_v39, %v8600_v36 }
 0x719   : > { %v8612_v56 = vmul.f32 %v8604_v42, %v1344_v15  ;;  %v8605_v28 = vmax.f32 %v8589_v50, %v8597_v59  ;;  %v8609_v41 = vmax.f32 %v8593_v37, %v8601_v32  ;;  %v8616_v51 = vmul.f32 %v8608_v12, %v1348_v57 }
 0x71b   : > { %v8619_v6 = vadd.f32 %v12172_v45, %v8612_v56  ;;  %v8613_v14 = vmul.f32 %v8605_v28, %v1345_v33  ;;  %v8617_v24 = vmul.f32 %v8609_v41, %v1349_v3 }
 0x71d   : > { %v8620_v43 = vadd.f32 %v8619_v6, %v8613_v14 }
 0x71f   : > { %v8621_v48 = vadd.f32 %v8620_v43, %v8614_v54 }
 0x721   : > { %v8622_v62 = vadd.f32 %v8621_v48, %v8615_v35 }
 0x723   : > { %v8623_v13 = vadd.f32 %v8622_v62, %v8616_v51 }
 0x725   : > { %v8624_v9 = vadd.f32 %v8623_v13, %v8617_v24 }
 0x727   : > { %8625 = vadd.xlane.f32.xlu0 %v8624_v9 }
 0x7b0   : > { %v8626_v45 = vpop.xlane.xlu0 %8625 }
 0x7b1   : > { %v8627_v4 = vrot.slane %v8626_v45, 4 }
 0x7b3   : > { %v8628_v40 = vadd.f32 %v8627_v4, %v8626_v45 }
 0x7b5   : > { %v8629_v16 = vrot.slane %v8628_v40, 2 }
 0x7b7   : > { %v8630_v53 = vadd.f32 %v8629_v16, %v8628_v40 }
 0x7b9   : > { %v8631_v19 = vrot.slane %v8630_v53, 1 }
 0x7bb   : > { %v8632_v49 = vadd.f32 %v8631_v19, %v8630_v53 }
 0x7bd   : > { %9795 = vpush %v8632_v49 }
 0x7ee   : > { %s9796_s9 = spop %9795 }
 0x7ef   : > { %v8634_v60 = vstv %s9796_s9 }
 0x7f0   : > { %8636 = vst.msk [vmem:[%s264_s8] sm:$0x1] %vm8635_vm2, %v8634_v60 }
 0x7f1 PF: > { %s17_s18 = sadd.s32 1, %s11498_s18  }
 0x7f2   : > { %p14_p2 = scmp.ge.s32.totalorder %s17_s18, 4  }
 0x7f4   :  { %16 = sbr.rel (!%p14_p2) target bundleno = 2 (0x2), region = 83 }
 0x7f9   :  { %8654 = vsyncpa [#allocation3], 1 }
 0x7fa   :  { %8656 = vsyncpa [#allocation3 + $0x1], 1 }
 0x7fb   :  { %8657 = vsyncpa [#allocation5], 1 }

</bundles_post_ra>
